<compile_context>
chip_gen: v7x
topology: tpu7x:2x2x1
jax: 0.10.0
libtpu: 0.0.40
codegen_flags: <defaults>
</compile_context>

<pallas_src>
import functools
import math

import jax
import jax.numpy as jnp
from jax import lax
from jax.experimental import pallas as pl
from jax.experimental.pallas import tpu as pltpu


# ----------------------------------------------------------------------------
# In-kernel helpers (traced inside the Pallas kernel body)
# ----------------------------------------------------------------------------
def _linear(x, w_ref, b_ref):
    """y = x @ W_t + b with f32 accumulation; operands cast to the weight dtype."""
    w = w_ref[...]
    y = jnp.dot(x.astype(w.dtype), w, preferred_element_type=jnp.float32)
    return y + b_ref[...]


def _layer_norm(y, g_ref, b_ref, eps):
    mu = jnp.mean(y, axis=-1, keepdims=True)
    var = jnp.mean(jnp.square(y - mu), axis=-1, keepdims=True)
    return (y - mu) * lax.rsqrt(var + eps) * g_ref[...] + b_ref[...]


def _multi_head_attention(qkv_ref, q_off, k_off, v_off, mask_bias, merge_ref,
                          *, heads, dim_head, cdt, approx):
    """qkv_ref: (V, >=3*d_model) VMEM scratch holding head-contiguous Q/K/V
    column blocks at offsets q_off / k_off / v_off.  Writes the merged
    'b v (h d)' result into merge_ref (V, d_model) and returns it."""
    scale = dim_head ** (-0.5)
    for h in range(heads):
        lo = h * dim_head
        qh = qkv_ref[:, q_off + lo: q_off + lo + dim_head].astype(cdt)
        kh = qkv_ref[:, k_off + lo: k_off + lo + dim_head].astype(cdt)
        vh = qkv_ref[:, v_off + lo: v_off + lo + dim_head].astype(cdt)

        # scores[i, j] = sum_d q[i, d] * k[j, d]   (contract last dims)
        s = lax.dot_general(qh, kh, (((1,), (1,)), ((), ())),
                            preferred_element_type=jnp.float32) * scale
        if mask_bias is not None:
            s = s + mask_bias

        # numerically-stable softmax along the last axis
        s = s - jnp.max(s, axis=-1, keepdims=True)
        p = jnp.exp(s)
        p = p * pl.reciprocal(jnp.sum(p, axis=-1, keepdims=True), approx=approx)

        merge_ref[:, lo: lo + dim_head] = jnp.dot(
            p.astype(cdt), vh, preferred_element_type=jnp.float32)
    return merge_ref[...]


# ----------------------------------------------------------------------------
# Fused DecoderLayer kernel (one grid step per batch element)
# ----------------------------------------------------------------------------
def _decoder_layer_kernel(
        x_ref, enc_ref, maskb_ref,
        wqkv1_ref, bqkv1_ref, wo1_ref, bo1_ref, g1_ref, be1_ref,
        wqk2_ref, bqk2_ref, wv2_ref, bv2_ref, wo2_ref, bo2_ref, g2_ref, be2_ref,
        wf1_ref, bf1_ref, wf2_ref, bf2_ref, g3_ref, be3_ref,
        o_ref,
        qkv_scr, merge_scr,
        *, heads, dim_head, eps):
    d_model = heads * dim_head
    cdt = wqkv1_ref.dtype                       # matmul operand dtype (f32 / bf16)
    approx = cdt == jnp.bfloat16                # EUP approx reciprocal on fast path

    x = x_ref[0]                                # (V, d_model) f32
    enc = enc_ref[0]                            # (V, d_model) f32
    mask_bias = maskb_ref[...]                  # (V, V) additive bias (0 / -1e30)

    # ---- masked self-attention + add&norm ---------------------------------
    qkv_scr[...] = _linear(x, wqkv1_ref, bqkv1_ref)          # fused Q|K|V (V, 3D)
    attn1 = _multi_head_attention(
        qkv_scr, 0, d_model, 2 * d_model, mask_bias, merge_scr,
        heads=heads, dim_head=dim_head, cdt=cdt, approx=approx)
    attn1 = _linear(attn1, wo1_ref, bo1_ref)
    # TODO(synk): dropout1 treated as identity (eval mode).
    out1 = _layer_norm(x + attn1, g1_ref, be1_ref, eps)

    # ---- cross-attention (Q,K from encoder_out, V from out1) + add&norm ----
    qkv_scr[:, : 2 * d_model] = _linear(enc, wqk2_ref, bqk2_ref)   # fused Q|K
    qkv_scr[:, 2 * d_model:] = _linear(out1, wv2_ref, bv2_ref)     # V
    attn2 = _multi_head_attention(
        qkv_scr, 0, d_model, 2 * d_model, None, merge_scr,
        heads=heads, dim_head=dim_head, cdt=cdt, approx=approx)
    attn2 = _linear(attn2, wo2_ref, bo2_ref)
    out2 = _layer_norm(out1 + attn2, g2_ref, be2_ref, eps)

    # ---- feed-forward + add&norm -------------------------------------------
    hid = jnp.maximum(_linear(out2, wf1_ref, bf1_ref), 0.0)        # ReLU
    ff = _linear(hid, wf2_ref, bf2_ref)
    out = _layer_norm(out2 + ff, g3_ref, be3_ref, eps)

    o_ref[0] = out.astype(o_ref.dtype)


# ----------------------------------------------------------------------------
# Host-side wrappers
# ----------------------------------------------------------------------------
_WEIGHT_ORDER = ("wqkv1", "bqkv1", "wo1", "bo1", "g1", "be1",
                 "wqk2", "bqk2", "wv2", "bv2", "wo2", "bo2", "g2", "be2",
                 "wf1", "bf1", "wf2", "bf2", "g3", "be3")


def prepare_decoder_params(params, heads, compute_dtype=jnp.float32):
    """One-time weight prep: permute Q/K/V output columns so heads are the
    OUTER factor ('(d h)' -> '(h d)'), fuse Q|K|V / Q|K weights, optionally
    cast matmul weights to bf16.  Biases / LN params stay f32."""
    d_model = params["Wq1_t"].shape[0]
    dim_head = d_model // heads
    # new column h*dim_head + d  <-  old column d*heads + h
    perm = jnp.arange(d_model).reshape(dim_head, heads).T.reshape(-1)

    def headify(w_t, b):
        return w_t[:, perm], b[:, perm]

    wq1, bq1 = headify(params["Wq1_t"], params["bq1"])
    wk1, bk1 = headify(params["Wk1_t"], params["bk1"])
    wv1, bv1 = headify(params["Wv1_t"], params["bv1"])
    wq2, bq2 = headify(params["Wq2_t"], params["bq2"])
    wk2, bk2 = headify(params["Wk2_t"], params["bk2"])
    wv2, bv2 = headify(params["Wv2_t"], params["bv2"])

    cdt = compute_dtype
    return {
        "wqkv1": jnp.concatenate([wq1, wk1, wv1], axis=1).astype(cdt),
        "bqkv1": jnp.concatenate([bq1, bk1, bv1], axis=1),
        "wo1": params["Wo1_t"].astype(cdt), "bo1": params["bo1"],
        "g1": params["g1"], "be1": params["beta1"],
        "wqk2": jnp.concatenate([wq2, wk2], axis=1).astype(cdt),
        "bqk2": jnp.concatenate([bq2, bk2], axis=1),
        "wv2": wv2.astype(cdt), "bv2": bv2,
        "wo2": params["Wo2_t"].astype(cdt), "bo2": params["bo2"],
        "g2": params["g2"], "be2": params["beta2"],
        "wf1": params["Wff1_t"].astype(cdt), "bf1": params["bff1"],
        "wf2": params["Wff2_t"].astype(cdt), "bf2": params["bff2"],
        "g3": params["g3"], "be3": params["beta3"],
    }


def decoder_layer_pallas(prep, x, encoder_out, mask=None, *, heads):
    """Fused DecoderLayer forward.  x, encoder_out: (B, V, d_model) f32.
    mask: optional bool (V, V); True = masked (torch masked_fill semantics)."""
    B, V, d_model = x.shape
    dim_head = d_model // heads
    hidden = prep["wf1"].shape[1]

    if mask is None:
        mask_bias = jnp.zeros((V, V), jnp.float32)
    else:
        # -1e30 instead of -inf: identical softmax result for any row with at
        # least one unmasked key, and avoids (-inf)-(-inf) NaNs in max-subtract.
        mask_bias = jnp.where(mask, jnp.float32(-1e30), jnp.float32(0.0))

    kern = functools.partial(_decoder_layer_kernel, heads=heads,
                             dim_head=dim_head, eps=1e-5)

    act_spec = pl.BlockSpec((1, V, d_model), lambda b: (b, 0, 0))

    def whole(arr):   # whole-array block, constant across the batch grid
        zeros = (0,) * arr.ndim
        return pl.BlockSpec(arr.shape, lambda b: zeros)

    w_args = [prep[name] for name in _WEIGHT_ORDER]

    # Advisory cost hint for XLA scheduling around the custom call.
    mm_flops = 16 * V * d_model * d_model + 4 * V * d_model * hidden
    attn_flops = 8 * V * V * d_model
    flops = int(B * (mm_flops + attn_flops))
    transc = int(B * (2 * heads * V * V + 2 * heads * V + 3 * V))
    bytes_accessed = int(sum(a.size * a.dtype.itemsize for a in w_args)
                         + 3 * B * V * d_model * 4 + V * V * 4)

    return pl.pallas_call(
        kern,
        out_shape=jax.ShapeDtypeStruct((B, V, d_model), x.dtype),
        grid=(B,),
        in_specs=[act_spec, act_spec, whole(mask_bias)]
                 + [whole(a) for a in w_args],
        out_specs=act_spec,
        scratch_shapes=[pltpu.VMEM((V, 3 * d_model), jnp.float32),   # fused QKV
                        pltpu.VMEM((V, d_model), jnp.float32)],      # head merge
        compiler_params=pltpu.CompilerParams(
            dimension_semantics=("parallel",)),     # batch axis -> both TCs (v7x)
        cost_estimate=pl.CostEstimate(flops=flops, transcendentals=transc,
                                      bytes_accessed=bytes_accessed),
    )(x, encoder_out, mask_bias, *w_args)


# ----------------------------------------------------------------------------
# Pure-JAX reference mirroring the torch forward (for correctness check)
# ----------------------------------------------------------------------------
def _attention_reference(p, tag, in_q, in_k, in_v, heads, mask_bias):
    d_model = in_q.shape[-1]
    dim_head = d_model // heads
    scale = dim_head ** (-0.5)

    def lin(x, w_t, b):
        return x @ w_t + b

    def split(y):                                   # 'b v (d h) -> b h v d'
        B, V, _ = y.shape
        return jnp.transpose(y.reshape(B, V, dim_head, heads), (0, 3, 1, 2))

    q = split(lin(in_q, p[f"Wq{tag}_t"], p[f"bq{tag}"]))
    k = split(lin(in_k, p[f"Wk{tag}_t"], p[f"bk{tag}"]))
    v = split(lin(in_v, p[f"Wv{tag}_t"], p[f"bv{tag}"]))
    s = jnp.einsum("bhid,bhjd->bhij", q, k) * scale
    if mask_bias is not None:
        s = s + mask_bias
    a = jax.nn.softmax(s, axis=-1)
    o = jnp.einsum("bhij,bhjd->bhid", a, v)
    B, H, V, _ = o.shape
    o = jnp.transpose(o, (0, 2, 1, 3)).reshape(B, V, H * dim_head)  # 'b h v d -> b v (h d)'
    return lin(o, p[f"Wo{tag}_t"], p[f"bo{tag}"])


def _layer_norm_reference(x, g, b, eps=1e-5):
    mu = x.mean(axis=-1, keepdims=True)
    var = ((x - mu) ** 2).mean(axis=-1, keepdims=True)
    return (x - mu) / jnp.sqrt(var + eps) * g + b


def decoder_layer_reference(params, x, encoder_out, mask, heads):
    mask_bias = None if mask is None else jnp.where(
        mask, jnp.float32(-1e30), jnp.float32(0.0))
    a1 = _attention_reference(params, "1", x, x, x, heads, mask_bias)
    out1 = _layer_norm_reference(x + a1, params["g1"], params["beta1"])
    a2 = _attention_reference(params, "2", encoder_out, encoder_out, out1,
                              heads, None)
    out2 = _layer_norm_reference(out1 + a2, params["g2"], params["beta2"])
    hid = jnp.maximum(out2 @ params["Wff1_t"] + params["bff1"], 0.0)
    ff = hid @ params["Wff2_t"] + params["bff2"]
    return _layer_norm_reference(out2 + ff, params["g3"], params["beta3"])


# ----------------------------------------------------------------------------
# Deterministic parameter init + smoke test
# ----------------------------------------------------------------------------
def init_decoder_params(key, d_model, hidden_dim=2048):
    keys = iter(jax.random.split(key, 26))

    def w(din, dout):
        return jax.random.normal(next(keys), (din, dout), jnp.float32) / math.sqrt(din)

    def b(dout):
        return jax.random.normal(next(keys), (1, dout), jnp.float32) * 0.02

    p = {}
    for tag in ("1", "2"):
        p[f"Wq{tag}_t"] = w(d_model, d_model); p[f"bq{tag}"] = b(d_model)
        p[f"Wk{tag}_t"] = w(d_model, d_model); p[f"bk{tag}"] = b(d_model)
        p[f"Wv{tag}_t"] = w(d_model, d_model); p[f"bv{tag}"] = b(d_model)
        p[f"Wo{tag}_t"] = w(d_model, d_model); p[f"bo{tag}"] = b(d_model)
    p["Wff1_t"] = w(d_model, hidden_dim); p["bff1"] = b(hidden_dim)
    p["Wff2_t"] = w(hidden_dim, d_model); p["bff2"] = b(d_model)
    for i in (1, 2, 3):
        p[f"g{i}"] = 1.0 + 0.1 * jax.random.normal(next(keys), (1, d_model), jnp.float32)
        p[f"beta{i}"] = 0.05 * jax.random.normal(next(keys), (1, d_model), jnp.float32)
    return p


if __name__ == "__main__":
    B, V, D_MODEL, HEADS = 2, 8, 32, 8      # dim_head = 4
    HIDDEN = 2048                           # FeedForward default hidden_dim

    key = jax.random.PRNGKey(0)
    k_params, k_x, k_enc = jax.random.split(key, 3)

    params = init_decoder_params(k_params, D_MODEL, HIDDEN)
    x = jax.random.normal(k_x, (B, V, D_MODEL), jnp.float32)
    encoder_out = jax.random.normal(k_enc, (B, V, D_MODEL), jnp.float32)

    # causal decoder mask: True above the diagonal -> masked (torch masked_fill)
    rows = jnp.arange(V)[:, None]
    cols = jnp.arange(V)[None, :]
    mask = cols > rows

    ref = decoder_layer_reference(params, x, encoder_out, mask, HEADS)

    # f32 path: exact module semantics, tight tolerance.
    prep_f32 = prepare_decoder_params(params, HEADS, jnp.float32)
    out_f32 = decoder_layer_pallas(prep_f32, x, encoder_out, mask, heads=HEADS)
    out_f32 = jax.block_until_ready(out_f32)
    assert out_f32.shape == (B, V, D_MODEL)
    assert jnp.allclose(out_f32, ref, atol=2e-4, rtol=2e-4), \
        "f32 kernel mismatch vs reference"

    # bf16 fast path: bf16 MXU operands + f32 accumulation, loose tolerance.
    prep_bf16 = prepare_decoder_params(params, HEADS, jnp.bfloat16)
    out_bf16 = decoder_layer_pallas(prep_bf16, x, encoder_out, mask, heads=HEADS)
    out_bf16 = jax.block_until_ready(out_bf16)
    assert jnp.allclose(out_bf16, ref, atol=1.5e-1, rtol=1.5e-1), \
        "bf16 kernel mismatch vs reference"

    print("KERNEL_OK")
</pallas_src>

<mosaic_0001>
module attributes {stable_mosaic.version = 11 : i64} {
  func.func @_decoder_layer_kernel(%arg0: i32, %arg1: memref<1x8x32xf32, #tpu.memory_space<vmem>>, %arg2: memref<1x8x32xf32, #tpu.memory_space<vmem>>, %arg3: memref<8x8xf32, #tpu.memory_space<vmem>>, %arg4: memref<32x96xf32, #tpu.memory_space<vmem>>, %arg5: memref<1x96xf32, #tpu.memory_space<vmem>>, %arg6: memref<32x32xf32, #tpu.memory_space<vmem>>, %arg7: memref<1x32xf32, #tpu.memory_space<vmem>>, %arg8: memref<1x32xf32, #tpu.memory_space<vmem>>, %arg9: memref<1x32xf32, #tpu.memory_space<vmem>>, %arg10: memref<32x64xf32, #tpu.memory_space<vmem>>, %arg11: memref<1x64xf32, #tpu.memory_space<vmem>>, %arg12: memref<32x32xf32, #tpu.memory_space<vmem>>, %arg13: memref<1x32xf32, #tpu.memory_space<vmem>>, %arg14: memref<32x32xf32, #tpu.memory_space<vmem>>, %arg15: memref<1x32xf32, #tpu.memory_space<vmem>>, %arg16: memref<1x32xf32, #tpu.memory_space<vmem>>, %arg17: memref<1x32xf32, #tpu.memory_space<vmem>>, %arg18: memref<32x2048xf32, #tpu.memory_space<vmem>>, %arg19: memref<1x2048xf32, #tpu.memory_space<vmem>>, %arg20: memref<2048x32xf32, #tpu.memory_space<vmem>>, %arg21: memref<1x32xf32, #tpu.memory_space<vmem>>, %arg22: memref<1x32xf32, #tpu.memory_space<vmem>>, %arg23: memref<1x32xf32, #tpu.memory_space<vmem>>, %arg24: memref<1x8x32xf32, #tpu.memory_space<vmem>>, %arg25: memref<8x96xf32, #tpu.memory_space<vmem>>, %arg26: memref<8x32xf32, #tpu.memory_space<vmem>>) attributes {dimension_semantics = [#tpu.dimension_semantics<parallel>], iteration_bounds = array<i64: 2>, scalar_prefetch = 0 : i64, scratch_operands = 2 : i64, tpu.core_type = #tpu.core_type<tc>, window_params = [{transform_indices = @transform_0, window_bounds = array<i64: 1, 8, 32>}, {transform_indices = @transform_1, window_bounds = array<i64: 1, 8, 32>}, {pipeline_mode = #tpu.pipeline_mode<synchronous>, transform_indices = @transform_2, window_bounds = array<i64: 8, 8>}, {pipeline_mode = #tpu.pipeline_mode<synchronous>, transform_indices = @transform_3, window_bounds = array<i64: 32, 96>}, {pipeline_mode = #tpu.pipeline_mode<synchronous>, transform_indices = @transform_4, window_bounds = array<i64: 1, 96>}, {pipeline_mode = #tpu.pipeline_mode<synchronous>, transform_indices = @transform_5, window_bounds = array<i64: 32, 32>}, {pipeline_mode = #tpu.pipeline_mode<synchronous>, transform_indices = @transform_6, window_bounds = array<i64: 1, 32>}, {pipeline_mode = #tpu.pipeline_mode<synchronous>, transform_indices = @transform_7, window_bounds = array<i64: 1, 32>}, {pipeline_mode = #tpu.pipeline_mode<synchronous>, transform_indices = @transform_8, window_bounds = array<i64: 1, 32>}, {pipeline_mode = #tpu.pipeline_mode<synchronous>, transform_indices = @transform_9, window_bounds = array<i64: 32, 64>}, {pipeline_mode = #tpu.pipeline_mode<synchronous>, transform_indices = @transform_10, window_bounds = array<i64: 1, 64>}, {pipeline_mode = #tpu.pipeline_mode<synchronous>, transform_indices = @transform_11, window_bounds = array<i64: 32, 32>}, {pipeline_mode = #tpu.pipeline_mode<synchronous>, transform_indices = @transform_12, window_bounds = array<i64: 1, 32>}, {pipeline_mode = #tpu.pipeline_mode<synchronous>, transform_indices = @transform_13, window_bounds = array<i64: 32, 32>}, {pipeline_mode = #tpu.pipeline_mode<synchronous>, transform_indices = @transform_14, window_bounds = array<i64: 1, 32>}, {pipeline_mode = #tpu.pipeline_mode<synchronous>, transform_indices = @transform_15, window_bounds = array<i64: 1, 32>}, {pipeline_mode = #tpu.pipeline_mode<synchronous>, transform_indices = @transform_16, window_bounds = array<i64: 1, 32>}, {pipeline_mode = #tpu.pipeline_mode<synchronous>, transform_indices = @transform_17, window_bounds = array<i64: 32, 2048>}, {pipeline_mode = #tpu.pipeline_mode<synchronous>, transform_indices = @transform_18, window_bounds = array<i64: 1, 2048>}, {pipeline_mode = #tpu.pipeline_mode<synchronous>, transform_indices = @transform_19, window_bounds = array<i64: 2048, 32>}, {pipeline_mode = #tpu.pipeline_mode<synchronous>, transform_indices = @transform_20, window_bounds = array<i64: 1, 32>}, {pipeline_mode = #tpu.pipeline_mode<synchronous>, transform_indices = @transform_21, window_bounds = array<i64: 1, 32>}, {pipeline_mode = #tpu.pipeline_mode<synchronous>, transform_indices = @transform_22, window_bounds = array<i64: 1, 32>}, {transform_indices = @transform_23, window_bounds = array<i64: 1, 8, 32>}]} {
    %c0 = arith.constant 0 : index
    %c0_0 = arith.constant 0 : index
    %c0_1 = arith.constant 0 : index
    %0 = vector.load %arg1[%c0, %c0_0, %c0_1] : memref<1x8x32xf32, #tpu.memory_space<vmem>>, vector<1x8x32xf32>
    %1 = vector.shape_cast %0 : vector<1x8x32xf32> to vector<8x32xf32>
    %c0_2 = arith.constant 0 : index
    %c0_3 = arith.constant 0 : index
    %c0_4 = arith.constant 0 : index
    %2 = vector.load %arg2[%c0_2, %c0_3, %c0_4] : memref<1x8x32xf32, #tpu.memory_space<vmem>>, vector<1x8x32xf32>
    %3 = vector.shape_cast %2 : vector<1x8x32xf32> to vector<8x32xf32>
    %c0_5 = arith.constant 0 : index
    %c0_6 = arith.constant 0 : index
    %4 = vector.load %arg3[%c0_5, %c0_6] : memref<8x8xf32, #tpu.memory_space<vmem>>, vector<8x8xf32>
    %c0_7 = arith.constant 0 : index
    %c0_8 = arith.constant 0 : index
    %5 = vector.load %arg4[%c0_7, %c0_8] : memref<32x96xf32, #tpu.memory_space<vmem>>, vector<32x96xf32>
    %cst = arith.constant dense<0.000000e+00> : vector<8x96xf32>
    %6 = tpu.matmul %1, %5, %cst {dimension_numbers = #tpu.dot_dimension_numbers<[1], [0], [0], [1], [0, 0, 1, 1], [], []>} : vector<8x32xf32>, vector<32x96xf32>, vector<8x96xf32> -> vector<8x96xf32>
    %c0_9 = arith.constant 0 : index
    %c0_10 = arith.constant 0 : index
    %7 = vector.load %arg5[%c0_9, %c0_10] : memref<1x96xf32, #tpu.memory_space<vmem>>, vector<1x96xf32>
    %8 = vector.broadcast %7 : vector<1x96xf32> to vector<8x96xf32>
    %9 = arith.addf %6, %8 : vector<8x96xf32>
    %c0_11 = arith.constant 0 : index
    %c0_12 = arith.constant 0 : index
    %10 = vector.load %arg25[%c0_11, %c0_12] : memref<8x96xf32, #tpu.memory_space<vmem>>, vector<8x96xf32>
    tpu.vector_store %arg25[%c0_11, %c0_12], %9 {strides = array<i32>} : memref<8x96xf32, #tpu.memory_space<vmem>>, vector<8x96xf32>,
    %c0_13 = arith.constant 0 : index
    %c0_14 = arith.constant 0 : index
    %11 = vector.load %arg25[%c0_13, %c0_14] : memref<8x96xf32, #tpu.memory_space<vmem>>, vector<8x4xf32>
    %c0_15 = arith.constant 0 : index
    %c32 = arith.constant 32 : index
    %12 = vector.load %arg25[%c0_15, %c32] : memref<8x96xf32, #tpu.memory_space<vmem>>, vector<8x4xf32>
    %c0_16 = arith.constant 0 : index
    %c64 = arith.constant 64 : index
    %13 = vector.load %arg25[%c0_16, %c64] : memref<8x96xf32, #tpu.memory_space<vmem>>, vector<8x4xf32>
    %cst_17 = arith.constant dense<0.000000e+00> : vector<8x8xf32>
    %14 = tpu.matmul %11, %12, %cst_17 {dimension_numbers = #tpu.dot_dimension_numbers<[1], [1], [0], [0], [0, 0, 1, 0], [], []>} : vector<8x4xf32>, vector<8x4xf32>, vector<8x8xf32> -> vector<8x8xf32>
    %cst_18 = arith.constant 5.000000e-01 : f32
    %15 = vector.broadcast %cst_18 : f32 to vector<8x8xf32>
    %16 = arith.mulf %14, %15 : vector<8x8xf32>
    %17 = arith.addf %16, %4 : vector<8x8xf32>
    %cst_19 = arith.constant dense<0xFF800000> : vector<8xf32>
    %18 = vector.multi_reduction <maximumf>, %17, %cst_19 [1] : vector<8x8xf32> to vector<8xf32>
    %19 = vector.shape_cast %18 : vector<8xf32> to vector<8x1xf32>
    %20 = vector.broadcast %19 : vector<8x1xf32> to vector<8x8xf32>
    %21 = arith.subf %17, %20 : vector<8x8xf32>
    %22 = math.exp %21 : vector<8x8xf32>
    %cst_20 = arith.constant dense<0.000000e+00> : vector<8xf32>
    %23 = vector.multi_reduction <add>, %22, %cst_20 [1] : vector<8x8xf32> to vector<8xf32>
    %24 = vector.shape_cast %23 : vector<8xf32> to vector<8x1xf32>
    %25 = tpu.reciprocal %24 : vector<8x1xf32> -> vector<8x1xf32>
    %26 = vector.broadcast %25 : vector<8x1xf32> to vector<8x8xf32>
    %27 = arith.mulf %22, %26 : vector<8x8xf32>
    %cst_21 = arith.constant dense<0.000000e+00> : vector<8x4xf32>
    %28 = tpu.matmul %27, %13, %cst_21 {dimension_numbers = #tpu.dot_dimension_numbers<[1], [0], [0], [1], [0, 0, 1, 1], [], []>} : vector<8x8xf32>, vector<8x4xf32>, vector<8x4xf32> -> vector<8x4xf32>
    %c0_22 = arith.constant 0 : index
    %c0_23 = arith.constant 0 : index
    %29 = vector.load %arg26[%c0_22, %c0_23] : memref<8x32xf32, #tpu.memory_space<vmem>>, vector<8x4xf32>
    tpu.vector_store %arg26[%c0_22, %c0_23], %28 {strides = array<i32>} : memref<8x32xf32, #tpu.memory_space<vmem>>, vector<8x4xf32>,
    %c0_24 = arith.constant 0 : index
    %c4 = arith.constant 4 : index
    %30 = vector.load %arg25[%c0_24, %c4] : memref<8x96xf32, #tpu.memory_space<vmem>>, vector<8x4xf32>
    %c0_25 = arith.constant 0 : index
    %c36 = arith.constant 36 : index
    %31 = vector.load %arg25[%c0_25, %c36] : memref<8x96xf32, #tpu.memory_space<vmem>>, vector<8x4xf32>
    %c0_26 = arith.constant 0 : index
    %c68 = arith.constant 68 : index
    %32 = vector.load %arg25[%c0_26, %c68] : memref<8x96xf32, #tpu.memory_space<vmem>>, vector<8x4xf32>
    %cst_27 = arith.constant dense<0.000000e+00> : vector<8x8xf32>
    %33 = tpu.matmul %30, %31, %cst_27 {dimension_numbers = #tpu.dot_dimension_numbers<[1], [1], [0], [0], [0, 0, 1, 0], [], []>} : vector<8x4xf32>, vector<8x4xf32>, vector<8x8xf32> -> vector<8x8xf32>
    %cst_28 = arith.constant 5.000000e-01 : f32
    %34 = vector.broadcast %cst_28 : f32 to vector<8x8xf32>
    %35 = arith.mulf %33, %34 : vector<8x8xf32>
    %36 = arith.addf %35, %4 : vector<8x8xf32>
    %cst_29 = arith.constant dense<0xFF800000> : vector<8xf32>
    %37 = vector.multi_reduction <maximumf>, %36, %cst_29 [1] : vector<8x8xf32> to vector<8xf32>
    %38 = vector.shape_cast %37 : vector<8xf32> to vector<8x1xf32>
    %39 = vector.broadcast %38 : vector<8x1xf32> to vector<8x8xf32>
    %40 = arith.subf %36, %39 : vector<8x8xf32>
    %41 = math.exp %40 : vector<8x8xf32>
    %cst_30 = arith.constant dense<0.000000e+00> : vector<8xf32>
    %42 = vector.multi_reduction <add>, %41, %cst_30 [1] : vector<8x8xf32> to vector<8xf32>
    %43 = vector.shape_cast %42 : vector<8xf32> to vector<8x1xf32>
    %44 = tpu.reciprocal %43 : vector<8x1xf32> -> vector<8x1xf32>
    %45 = vector.broadcast %44 : vector<8x1xf32> to vector<8x8xf32>
    %46 = arith.mulf %41, %45 : vector<8x8xf32>
    %cst_31 = arith.constant dense<0.000000e+00> : vector<8x4xf32>
    %47 = tpu.matmul %46, %32, %cst_31 {dimension_numbers = #tpu.dot_dimension_numbers<[1], [0], [0], [1], [0, 0, 1, 1], [], []>} : vector<8x8xf32>, vector<8x4xf32>, vector<8x4xf32> -> vector<8x4xf32>
    %c0_32 = arith.constant 0 : index
    %c4_33 = arith.constant 4 : index
    %48 = vector.load %arg26[%c0_32, %c4_33] : memref<8x32xf32, #tpu.memory_space<vmem>>, vector<8x4xf32>
    tpu.vector_store %arg26[%c0_32, %c4_33], %47 {strides = array<i32>} : memref<8x32xf32, #tpu.memory_space<vmem>>, vector<8x4xf32>,
    %c0_34 = arith.constant 0 : index
    %c8 = arith.constant 8 : index
    %49 = vector.load %arg25[%c0_34, %c8] : memref<8x96xf32, #tpu.memory_space<vmem>>, vector<8x4xf32>
    %c0_35 = arith.constant 0 : index
    %c40 = arith.constant 40 : index
    %50 = vector.load %arg25[%c0_35, %c40] : memref<8x96xf32, #tpu.memory_space<vmem>>, vector<8x4xf32>
    %c0_36 = arith.constant 0 : index
    %c72 = arith.constant 72 : index
    %51 = vector.load %arg25[%c0_36, %c72] : memref<8x96xf32, #tpu.memory_space<vmem>>, vector<8x4xf32>
    %cst_37 = arith.constant dense<0.000000e+00> : vector<8x8xf32>
    %52 = tpu.matmul %49, %50, %cst_37 {dimension_numbers = #tpu.dot_dimension_numbers<[1], [1], [0], [0], [0, 0, 1, 0], [], []>} : vector<8x4xf32>, vector<8x4xf32>, vector<8x8xf32> -> vector<8x8xf32>
    %cst_38 = arith.constant 5.000000e-01 : f32
    %53 = vector.broadcast %cst_38 : f32 to vector<8x8xf32>
    %54 = arith.mulf %52, %53 : vector<8x8xf32>
    %55 = arith.addf %54, %4 : vector<8x8xf32>
    %cst_39 = arith.constant dense<0xFF800000> : vector<8xf32>
    %56 = vector.multi_reduction <maximumf>, %55, %cst_39 [1] : vector<8x8xf32> to vector<8xf32>
    %57 = vector.shape_cast %56 : vector<8xf32> to vector<8x1xf32>
    %58 = vector.broadcast %57 : vector<8x1xf32> to vector<8x8xf32>
    %59 = arith.subf %55, %58 : vector<8x8xf32>
    %60 = math.exp %59 : vector<8x8xf32>
    %cst_40 = arith.constant dense<0.000000e+00> : vector<8xf32>
    %61 = vector.multi_reduction <add>, %60, %cst_40 [1] : vector<8x8xf32> to vector<8xf32>
    %62 = vector.shape_cast %61 : vector<8xf32> to vector<8x1xf32>
    %63 = tpu.reciprocal %62 : vector<8x1xf32> -> vector<8x1xf32>
    %64 = vector.broadcast %63 : vector<8x1xf32> to vector<8x8xf32>
    %65 = arith.mulf %60, %64 : vector<8x8xf32>
    %cst_41 = arith.constant dense<0.000000e+00> : vector<8x4xf32>
    %66 = tpu.matmul %65, %51, %cst_41 {dimension_numbers = #tpu.dot_dimension_numbers<[1], [0], [0], [1], [0, 0, 1, 1], [], []>} : vector<8x8xf32>, vector<8x4xf32>, vector<8x4xf32> -> vector<8x4xf32>
    %c0_42 = arith.constant 0 : index
    %c8_43 = arith.constant 8 : index
    %67 = vector.load %arg26[%c0_42, %c8_43] : memref<8x32xf32, #tpu.memory_space<vmem>>, vector<8x4xf32>
    tpu.vector_store %arg26[%c0_42, %c8_43], %66 {strides = array<i32>} : memref<8x32xf32, #tpu.memory_space<vmem>>, vector<8x4xf32>,
    %c0_44 = arith.constant 0 : index
    %c12 = arith.constant 12 : index
    %68 = vector.load %arg25[%c0_44, %c12] : memref<8x96xf32, #tpu.memory_space<vmem>>, vector<8x4xf32>
    %c0_45 = arith.constant 0 : index
    %c44 = arith.constant 44 : index
    %69 = vector.load %arg25[%c0_45, %c44] : memref<8x96xf32, #tpu.memory_space<vmem>>, vector<8x4xf32>
    %c0_46 = arith.constant 0 : index
    %c76 = arith.constant 76 : index
    %70 = vector.load %arg25[%c0_46, %c76] : memref<8x96xf32, #tpu.memory_space<vmem>>, vector<8x4xf32>
    %cst_47 = arith.constant dense<0.000000e+00> : vector<8x8xf32>
    %71 = tpu.matmul %68, %69, %cst_47 {dimension_numbers = #tpu.dot_dimension_numbers<[1], [1], [0], [0], [0, 0, 1, 0], [], []>} : vector<8x4xf32>, vector<8x4xf32>, vector<8x8xf32> -> vector<8x8xf32>
    %cst_48 = arith.constant 5.000000e-01 : f32
    %72 = vector.broadcast %cst_48 : f32 to vector<8x8xf32>
    %73 = arith.mulf %71, %72 : vector<8x8xf32>
    %74 = arith.addf %73, %4 : vector<8x8xf32>
    %cst_49 = arith.constant dense<0xFF800000> : vector<8xf32>
    %75 = vector.multi_reduction <maximumf>, %74, %cst_49 [1] : vector<8x8xf32> to vector<8xf32>
    %76 = vector.shape_cast %75 : vector<8xf32> to vector<8x1xf32>
    %77 = vector.broadcast %76 : vector<8x1xf32> to vector<8x8xf32>
    %78 = arith.subf %74, %77 : vector<8x8xf32>
    %79 = math.exp %78 : vector<8x8xf32>
    %cst_50 = arith.constant dense<0.000000e+00> : vector<8xf32>
    %80 = vector.multi_reduction <add>, %79, %cst_50 [1] : vector<8x8xf32> to vector<8xf32>
    %81 = vector.shape_cast %80 : vector<8xf32> to vector<8x1xf32>
    %82 = tpu.reciprocal %81 : vector<8x1xf32> -> vector<8x1xf32>
    %83 = vector.broadcast %82 : vector<8x1xf32> to vector<8x8xf32>
    %84 = arith.mulf %79, %83 : vector<8x8xf32>
    %cst_51 = arith.constant dense<0.000000e+00> : vector<8x4xf32>
    %85 = tpu.matmul %84, %70, %cst_51 {dimension_numbers = #tpu.dot_dimension_numbers<[1], [0], [0], [1], [0, 0, 1, 1], [], []>} : vector<8x8xf32>, vector<8x4xf32>, vector<8x4xf32> -> vector<8x4xf32>
    %c0_52 = arith.constant 0 : index
    %c12_53 = arith.constant 12 : index
    %86 = vector.load %arg26[%c0_52, %c12_53] : memref<8x32xf32, #tpu.memory_space<vmem>>, vector<8x4xf32>
    tpu.vector_store %arg26[%c0_52, %c12_53], %85 {strides = array<i32>} : memref<8x32xf32, #tpu.memory_space<vmem>>, vector<8x4xf32>,
    %c0_54 = arith.constant 0 : index
    %c16 = arith.constant 16 : index
    %87 = vector.load %arg25[%c0_54, %c16] : memref<8x96xf32, #tpu.memory_space<vmem>>, vector<8x4xf32>
    %c0_55 = arith.constant 0 : index
    %c48 = arith.constant 48 : index
    %88 = vector.load %arg25[%c0_55, %c48] : memref<8x96xf32, #tpu.memory_space<vmem>>, vector<8x4xf32>
    %c0_56 = arith.constant 0 : index
    %c80 = arith.constant 80 : index
    %89 = vector.load %arg25[%c0_56, %c80] : memref<8x96xf32, #tpu.memory_space<vmem>>, vector<8x4xf32>
    %cst_57 = arith.constant dense<0.000000e+00> : vector<8x8xf32>
    %90 = tpu.matmul %87, %88, %cst_57 {dimension_numbers = #tpu.dot_dimension_numbers<[1], [1], [0], [0], [0, 0, 1, 0], [], []>} : vector<8x4xf32>, vector<8x4xf32>, vector<8x8xf32> -> vector<8x8xf32>
    %cst_58 = arith.constant 5.000000e-01 : f32
    %91 = vector.broadcast %cst_58 : f32 to vector<8x8xf32>
    %92 = arith.mulf %90, %91 : vector<8x8xf32>
    %93 = arith.addf %92, %4 : vector<8x8xf32>
    %cst_59 = arith.constant dense<0xFF800000> : vector<8xf32>
    %94 = vector.multi_reduction <maximumf>, %93, %cst_59 [1] : vector<8x8xf32> to vector<8xf32>
    %95 = vector.shape_cast %94 : vector<8xf32> to vector<8x1xf32>
    %96 = vector.broadcast %95 : vector<8x1xf32> to vector<8x8xf32>
    %97 = arith.subf %93, %96 : vector<8x8xf32>
    %98 = math.exp %97 : vector<8x8xf32>
    %cst_60 = arith.constant dense<0.000000e+00> : vector<8xf32>
    %99 = vector.multi_reduction <add>, %98, %cst_60 [1] : vector<8x8xf32> to vector<8xf32>
    %100 = vector.shape_cast %99 : vector<8xf32> to vector<8x1xf32>
    %101 = tpu.reciprocal %100 : vector<8x1xf32> -> vector<8x1xf32>
    %102 = vector.broadcast %101 : vector<8x1xf32> to vector<8x8xf32>
    %103 = arith.mulf %98, %102 : vector<8x8xf32>
    %cst_61 = arith.constant dense<0.000000e+00> : vector<8x4xf32>
    %104 = tpu.matmul %103, %89, %cst_61 {dimension_numbers = #tpu.dot_dimension_numbers<[1], [0], [0], [1], [0, 0, 1, 1], [], []>} : vector<8x8xf32>, vector<8x4xf32>, vector<8x4xf32> -> vector<8x4xf32>
    %c0_62 = arith.constant 0 : index
    %c16_63 = arith.constant 16 : index
    %105 = vector.load %arg26[%c0_62, %c16_63] : memref<8x32xf32, #tpu.memory_space<vmem>>, vector<8x4xf32>
    tpu.vector_store %arg26[%c0_62, %c16_63], %104 {strides = array<i32>} : memref<8x32xf32, #tpu.memory_space<vmem>>, vector<8x4xf32>,
    %c0_64 = arith.constant 0 : index
    %c20 = arith.constant 20 : index
    %106 = vector.load %arg25[%c0_64, %c20] : memref<8x96xf32, #tpu.memory_space<vmem>>, vector<8x4xf32>
    %c0_65 = arith.constant 0 : index
    %c52 = arith.constant 52 : index
    %107 = vector.load %arg25[%c0_65, %c52] : memref<8x96xf32, #tpu.memory_space<vmem>>, vector<8x4xf32>
    %c0_66 = arith.constant 0 : index
    %c84 = arith.constant 84 : index
    %108 = vector.load %arg25[%c0_66, %c84] : memref<8x96xf32, #tpu.memory_space<vmem>>, vector<8x4xf32>
    %cst_67 = arith.constant dense<0.000000e+00> : vector<8x8xf32>
    %109 = tpu.matmul %106, %107, %cst_67 {dimension_numbers = #tpu.dot_dimension_numbers<[1], [1], [0], [0], [0, 0, 1, 0], [], []>} : vector<8x4xf32>, vector<8x4xf32>, vector<8x8xf32> -> vector<8x8xf32>
    %cst_68 = arith.constant 5.000000e-01 : f32
    %110 = vector.broadcast %cst_68 : f32 to vector<8x8xf32>
    %111 = arith.mulf %109, %110 : vector<8x8xf32>
    %112 = arith.addf %111, %4 : vector<8x8xf32>
    %cst_69 = arith.constant dense<0xFF800000> : vector<8xf32>
    %113 = vector.multi_reduction <maximumf>, %112, %cst_69 [1] : vector<8x8xf32> to vector<8xf32>
    %114 = vector.shape_cast %113 : vector<8xf32> to vector<8x1xf32>
    %115 = vector.broadcast %114 : vector<8x1xf32> to vector<8x8xf32>
    %116 = arith.subf %112, %115 : vector<8x8xf32>
    %117 = math.exp %116 : vector<8x8xf32>
    %cst_70 = arith.constant dense<0.000000e+00> : vector<8xf32>
    %118 = vector.multi_reduction <add>, %117, %cst_70 [1] : vector<8x8xf32> to vector<8xf32>
    %119 = vector.shape_cast %118 : vector<8xf32> to vector<8x1xf32>
    %120 = tpu.reciprocal %119 : vector<8x1xf32> -> vector<8x1xf32>
    %121 = vector.broadcast %120 : vector<8x1xf32> to vector<8x8xf32>
    %122 = arith.mulf %117, %121 : vector<8x8xf32>
    %cst_71 = arith.constant dense<0.000000e+00> : vector<8x4xf32>
    %123 = tpu.matmul %122, %108, %cst_71 {dimension_numbers = #tpu.dot_dimension_numbers<[1], [0], [0], [1], [0, 0, 1, 1], [], []>} : vector<8x8xf32>, vector<8x4xf32>, vector<8x4xf32> -> vector<8x4xf32>
    %c0_72 = arith.constant 0 : index
    %c20_73 = arith.constant 20 : index
    %124 = vector.load %arg26[%c0_72, %c20_73] : memref<8x32xf32, #tpu.memory_space<vmem>>, vector<8x4xf32>
    tpu.vector_store %arg26[%c0_72, %c20_73], %123 {strides = array<i32>} : memref<8x32xf32, #tpu.memory_space<vmem>>, vector<8x4xf32>,
    %c0_74 = arith.constant 0 : index
    %c24 = arith.constant 24 : index
    %125 = vector.load %arg25[%c0_74, %c24] : memref<8x96xf32, #tpu.memory_space<vmem>>, vector<8x4xf32>
    %c0_75 = arith.constant 0 : index
    %c56 = arith.constant 56 : index
    %126 = vector.load %arg25[%c0_75, %c56] : memref<8x96xf32, #tpu.memory_space<vmem>>, vector<8x4xf32>
    %c0_76 = arith.constant 0 : index
    %c88 = arith.constant 88 : index
    %127 = vector.load %arg25[%c0_76, %c88] : memref<8x96xf32, #tpu.memory_space<vmem>>, vector<8x4xf32>
    %cst_77 = arith.constant dense<0.000000e+00> : vector<8x8xf32>
    %128 = tpu.matmul %125, %126, %cst_77 {dimension_numbers = #tpu.dot_dimension_numbers<[1], [1], [0], [0], [0, 0, 1, 0], [], []>} : vector<8x4xf32>, vector<8x4xf32>, vector<8x8xf32> -> vector<8x8xf32>
    %cst_78 = arith.constant 5.000000e-01 : f32
    %129 = vector.broadcast %cst_78 : f32 to vector<8x8xf32>
    %130 = arith.mulf %128, %129 : vector<8x8xf32>
    %131 = arith.addf %130, %4 : vector<8x8xf32>
    %cst_79 = arith.constant dense<0xFF800000> : vector<8xf32>
    %132 = vector.multi_reduction <maximumf>, %131, %cst_79 [1] : vector<8x8xf32> to vector<8xf32>
    %133 = vector.shape_cast %132 : vector<8xf32> to vector<8x1xf32>
    %134 = vector.broadcast %133 : vector<8x1xf32> to vector<8x8xf32>
    %135 = arith.subf %131, %134 : vector<8x8xf32>
    %136 = math.exp %135 : vector<8x8xf32>
    %cst_80 = arith.constant dense<0.000000e+00> : vector<8xf32>
    %137 = vector.multi_reduction <add>, %136, %cst_80 [1] : vector<8x8xf32> to vector<8xf32>
    %138 = vector.shape_cast %137 : vector<8xf32> to vector<8x1xf32>
    %139 = tpu.reciprocal %138 : vector<8x1xf32> -> vector<8x1xf32>
    %140 = vector.broadcast %139 : vector<8x1xf32> to vector<8x8xf32>
    %141 = arith.mulf %136, %140 : vector<8x8xf32>
    %cst_81 = arith.constant dense<0.000000e+00> : vector<8x4xf32>
    %142 = tpu.matmul %141, %127, %cst_81 {dimension_numbers = #tpu.dot_dimension_numbers<[1], [0], [0], [1], [0, 0, 1, 1], [], []>} : vector<8x8xf32>, vector<8x4xf32>, vector<8x4xf32> -> vector<8x4xf32>
    %c0_82 = arith.constant 0 : index
    %c24_83 = arith.constant 24 : index
    %143 = vector.load %arg26[%c0_82, %c24_83] : memref<8x32xf32, #tpu.memory_space<vmem>>, vector<8x4xf32>
    tpu.vector_store %arg26[%c0_82, %c24_83], %142 {strides = array<i32>} : memref<8x32xf32, #tpu.memory_space<vmem>>, vector<8x4xf32>,
    %c0_84 = arith.constant 0 : index
    %c28 = arith.constant 28 : index
    %144 = vector.load %arg25[%c0_84, %c28] : memref<8x96xf32, #tpu.memory_space<vmem>>, vector<8x4xf32>
    %c0_85 = arith.constant 0 : index
    %c60 = arith.constant 60 : index
    %145 = vector.load %arg25[%c0_85, %c60] : memref<8x96xf32, #tpu.memory_space<vmem>>, vector<8x4xf32>
    %c0_86 = arith.constant 0 : index
    %c92 = arith.constant 92 : index
    %146 = vector.load %arg25[%c0_86, %c92] : memref<8x96xf32, #tpu.memory_space<vmem>>, vector<8x4xf32>
    %cst_87 = arith.constant dense<0.000000e+00> : vector<8x8xf32>
    %147 = tpu.matmul %144, %145, %cst_87 {dimension_numbers = #tpu.dot_dimension_numbers<[1], [1], [0], [0], [0, 0, 1, 0], [], []>} : vector<8x4xf32>, vector<8x4xf32>, vector<8x8xf32> -> vector<8x8xf32>
    %cst_88 = arith.constant 5.000000e-01 : f32
    %148 = vector.broadcast %cst_88 : f32 to vector<8x8xf32>
    %149 = arith.mulf %147, %148 : vector<8x8xf32>
    %150 = arith.addf %149, %4 : vector<8x8xf32>
    %cst_89 = arith.constant dense<0xFF800000> : vector<8xf32>
    %151 = vector.multi_reduction <maximumf>, %150, %cst_89 [1] : vector<8x8xf32> to vector<8xf32>
    %152 = vector.shape_cast %151 : vector<8xf32> to vector<8x1xf32>
    %153 = vector.broadcast %152 : vector<8x1xf32> to vector<8x8xf32>
    %154 = arith.subf %150, %153 : vector<8x8xf32>
    %155 = math.exp %154 : vector<8x8xf32>
    %cst_90 = arith.constant dense<0.000000e+00> : vector<8xf32>
    %156 = vector.multi_reduction <add>, %155, %cst_90 [1] : vector<8x8xf32> to vector<8xf32>
    %157 = vector.shape_cast %156 : vector<8xf32> to vector<8x1xf32>
    %158 = tpu.reciprocal %157 : vector<8x1xf32> -> vector<8x1xf32>
    %159 = vector.broadcast %158 : vector<8x1xf32> to vector<8x8xf32>
    %160 = arith.mulf %155, %159 : vector<8x8xf32>
    %cst_91 = arith.constant dense<0.000000e+00> : vector<8x4xf32>
    %161 = tpu.matmul %160, %146, %cst_91 {dimension_numbers = #tpu.dot_dimension_numbers<[1], [0], [0], [1], [0, 0, 1, 1], [], []>} : vector<8x8xf32>, vector<8x4xf32>, vector<8x4xf32> -> vector<8x4xf32>
    %c0_92 = arith.constant 0 : index
    %c28_93 = arith.constant 28 : index
    %162 = vector.load %arg26[%c0_92, %c28_93] : memref<8x32xf32, #tpu.memory_space<vmem>>, vector<8x4xf32>
    tpu.vector_store %arg26[%c0_92, %c28_93], %161 {strides = array<i32>} : memref<8x32xf32, #tpu.memory_space<vmem>>, vector<8x4xf32>,
    %c0_94 = arith.constant 0 : index
    %c0_95 = arith.constant 0 : index
    %163 = vector.load %arg26[%c0_94, %c0_95] : memref<8x32xf32, #tpu.memory_space<vmem>>, vector<8x32xf32>
    %c0_96 = arith.constant 0 : index
    %c0_97 = arith.constant 0 : index
    %164 = vector.load %arg6[%c0_96, %c0_97] : memref<32x32xf32, #tpu.memory_space<vmem>>, vector<32x32xf32>
    %cst_98 = arith.constant dense<0.000000e+00> : vector<8x32xf32>
    %165 = tpu.matmul %163, %164, %cst_98 {dimension_numbers = #tpu.dot_dimension_numbers<[1], [0], [0], [1], [0, 0, 1, 1], [], []>} : vector<8x32xf32>, vector<32x32xf32>, vector<8x32xf32> -> vector<8x32xf32>
    %c0_99 = arith.constant 0 : index
    %c0_100 = arith.constant 0 : index
    %166 = vector.load %arg7[%c0_99, %c0_100] : memref<1x32xf32, #tpu.memory_space<vmem>>, vector<1x32xf32>
    %167 = vector.broadcast %166 : vector<1x32xf32> to vector<8x32xf32>
    %168 = arith.addf %165, %167 : vector<8x32xf32>
    %169 = arith.addf %1, %168 : vector<8x32xf32>
    %cst_101 = arith.constant dense<0.000000e+00> : vector<8xf32>
    %170 = vector.multi_reduction <add>, %169, %cst_101 [1] : vector<8x32xf32> to vector<8xf32>
    %171 = vector.shape_cast %170 : vector<8xf32> to vector<8x1xf32>
    %cst_102 = arith.constant 3.200000e+01 : f32
    %172 = vector.broadcast %cst_102 : f32 to vector<8x1xf32>
    %173 = arith.divf %171, %172 : vector<8x1xf32>
    %174 = vector.broadcast %173 : vector<8x1xf32> to vector<8x32xf32>
    %175 = arith.subf %169, %174 : vector<8x32xf32>
    %176 = arith.mulf %175, %175 : vector<8x32xf32>
    %cst_103 = arith.constant dense<0.000000e+00> : vector<8xf32>
    %177 = vector.multi_reduction <add>, %176, %cst_103 [1] : vector<8x32xf32> to vector<8xf32>
    %178 = vector.shape_cast %177 : vector<8xf32> to vector<8x1xf32>
    %cst_104 = arith.constant 3.200000e+01 : f32
    %179 = vector.broadcast %cst_104 : f32 to vector<8x1xf32>
    %180 = arith.divf %178, %179 : vector<8x1xf32>
    %181 = vector.broadcast %173 : vector<8x1xf32> to vector<8x32xf32>
    %182 = arith.subf %169, %181 : vector<8x32xf32>
    %cst_105 = arith.constant 9.99999974E-6 : f32
    %183 = vector.broadcast %cst_105 : f32 to vector<8x1xf32>
    %184 = arith.addf %180, %183 : vector<8x1xf32>
    %185 = math.rsqrt %184 : vector<8x1xf32>
    %186 = vector.broadcast %185 : vector<8x1xf32> to vector<8x32xf32>
    %187 = arith.mulf %182, %186 : vector<8x32xf32>
    %c0_106 = arith.constant 0 : index
    %c0_107 = arith.constant 0 : index
    %188 = vector.load %arg8[%c0_106, %c0_107] : memref<1x32xf32, #tpu.memory_space<vmem>>, vector<1x32xf32>
    %189 = vector.broadcast %188 : vector<1x32xf32> to vector<8x32xf32>
    %190 = arith.mulf %187, %189 : vector<8x32xf32>
    %c0_108 = arith.constant 0 : index
    %c0_109 = arith.constant 0 : index
    %191 = vector.load %arg9[%c0_108, %c0_109] : memref<1x32xf32, #tpu.memory_space<vmem>>, vector<1x32xf32>
    %192 = vector.broadcast %191 : vector<1x32xf32> to vector<8x32xf32>
    %193 = arith.addf %190, %192 : vector<8x32xf32>
    %c0_110 = arith.constant 0 : index
    %c0_111 = arith.constant 0 : index
    %194 = vector.load %arg10[%c0_110, %c0_111] : memref<32x64xf32, #tpu.memory_space<vmem>>, vector<32x64xf32>
    %cst_112 = arith.constant dense<0.000000e+00> : vector<8x64xf32>
    %195 = tpu.matmul %3, %194, %cst_112 {dimension_numbers = #tpu.dot_dimension_numbers<[1], [0], [0], [1], [0, 0, 1, 1], [], []>} : vector<8x32xf32>, vector<32x64xf32>, vector<8x64xf32> -> vector<8x64xf32>
    %c0_113 = arith.constant 0 : index
    %c0_114 = arith.constant 0 : index
    %196 = vector.load %arg11[%c0_113, %c0_114] : memref<1x64xf32, #tpu.memory_space<vmem>>, vector<1x64xf32>
    %197 = vector.broadcast %196 : vector<1x64xf32> to vector<8x64xf32>
    %198 = arith.addf %195, %197 : vector<8x64xf32>
    %c0_115 = arith.constant 0 : index
    %c0_116 = arith.constant 0 : index
    %199 = vector.load %arg25[%c0_115, %c0_116] : memref<8x96xf32, #tpu.memory_space<vmem>>, vector<8x64xf32>
    tpu.vector_store %arg25[%c0_115, %c0_116], %198 {strides = array<i32>} : memref<8x96xf32, #tpu.memory_space<vmem>>, vector<8x64xf32>,
    %c0_117 = arith.constant 0 : index
    %c0_118 = arith.constant 0 : index
    %200 = vector.load %arg12[%c0_117, %c0_118] : memref<32x32xf32, #tpu.memory_space<vmem>>, vector<32x32xf32>
    %cst_119 = arith.constant dense<0.000000e+00> : vector<8x32xf32>
    %201 = tpu.matmul %193, %200, %cst_119 {dimension_numbers = #tpu.dot_dimension_numbers<[1], [0], [0], [1], [0, 0, 1, 1], [], []>} : vector<8x32xf32>, vector<32x32xf32>, vector<8x32xf32> -> vector<8x32xf32>
    %c0_120 = arith.constant 0 : index
    %c0_121 = arith.constant 0 : index
    %202 = vector.load %arg13[%c0_120, %c0_121] : memref<1x32xf32, #tpu.memory_space<vmem>>, vector<1x32xf32>
    %203 = vector.broadcast %202 : vector<1x32xf32> to vector<8x32xf32>
    %204 = arith.addf %201, %203 : vector<8x32xf32>
    %c0_122 = arith.constant 0 : index
    %c64_123 = arith.constant 64 : index
    %205 = vector.load %arg25[%c0_122, %c64_123] : memref<8x96xf32, #tpu.memory_space<vmem>>, vector<8x32xf32>
    tpu.vector_store %arg25[%c0_122, %c64_123], %204 {strides = array<i32>} : memref<8x96xf32, #tpu.memory_space<vmem>>, vector<8x32xf32>,
    %c0_124 = arith.constant 0 : index
    %c0_125 = arith.constant 0 : index
    %206 = vector.load %arg25[%c0_124, %c0_125] : memref<8x96xf32, #tpu.memory_space<vmem>>, vector<8x4xf32>
    %c0_126 = arith.constant 0 : index
    %c32_127 = arith.constant 32 : index
    %207 = vector.load %arg25[%c0_126, %c32_127] : memref<8x96xf32, #tpu.memory_space<vmem>>, vector<8x4xf32>
    %c0_128 = arith.constant 0 : index
    %c64_129 = arith.constant 64 : index
    %208 = vector.load %arg25[%c0_128, %c64_129] : memref<8x96xf32, #tpu.memory_space<vmem>>, vector<8x4xf32>
    %cst_130 = arith.constant dense<0.000000e+00> : vector<8x8xf32>
    %209 = tpu.matmul %206, %207, %cst_130 {dimension_numbers = #tpu.dot_dimension_numbers<[1], [1], [0], [0], [0, 0, 1, 0], [], []>} : vector<8x4xf32>, vector<8x4xf32>, vector<8x8xf32> -> vector<8x8xf32>
    %cst_131 = arith.constant 5.000000e-01 : f32
    %210 = vector.broadcast %cst_131 : f32 to vector<8x8xf32>
    %211 = arith.mulf %209, %210 : vector<8x8xf32>
    %cst_132 = arith.constant dense<0xFF800000> : vector<8xf32>
    %212 = vector.multi_reduction <maximumf>, %211, %cst_132 [1] : vector<8x8xf32> to vector<8xf32>
    %213 = vector.shape_cast %212 : vector<8xf32> to vector<8x1xf32>
    %214 = vector.broadcast %213 : vector<8x1xf32> to vector<8x8xf32>
    %215 = arith.subf %211, %214 : vector<8x8xf32>
    %216 = math.exp %215 : vector<8x8xf32>
    %cst_133 = arith.constant dense<0.000000e+00> : vector<8xf32>
    %217 = vector.multi_reduction <add>, %216, %cst_133 [1] : vector<8x8xf32> to vector<8xf32>
    %218 = vector.shape_cast %217 : vector<8xf32> to vector<8x1xf32>
    %219 = tpu.reciprocal %218 : vector<8x1xf32> -> vector<8x1xf32>
    %220 = vector.broadcast %219 : vector<8x1xf32> to vector<8x8xf32>
    %221 = arith.mulf %216, %220 : vector<8x8xf32>
    %cst_134 = arith.constant dense<0.000000e+00> : vector<8x4xf32>
    %222 = tpu.matmul %221, %208, %cst_134 {dimension_numbers = #tpu.dot_dimension_numbers<[1], [0], [0], [1], [0, 0, 1, 1], [], []>} : vector<8x8xf32>, vector<8x4xf32>, vector<8x4xf32> -> vector<8x4xf32>
    %c0_135 = arith.constant 0 : index
    %c0_136 = arith.constant 0 : index
    %223 = vector.load %arg26[%c0_135, %c0_136] : memref<8x32xf32, #tpu.memory_space<vmem>>, vector<8x4xf32>
    tpu.vector_store %arg26[%c0_135, %c0_136], %222 {strides = array<i32>} : memref<8x32xf32, #tpu.memory_space<vmem>>, vector<8x4xf32>,
    %c0_137 = arith.constant 0 : index
    %c4_138 = arith.constant 4 : index
    %224 = vector.load %arg25[%c0_137, %c4_138] : memref<8x96xf32, #tpu.memory_space<vmem>>, vector<8x4xf32>
    %c0_139 = arith.constant 0 : index
    %c36_140 = arith.constant 36 : index
    %225 = vector.load %arg25[%c0_139, %c36_140] : memref<8x96xf32, #tpu.memory_space<vmem>>, vector<8x4xf32>
    %c0_141 = arith.constant 0 : index
    %c68_142 = arith.constant 68 : index
    %226 = vector.load %arg25[%c0_141, %c68_142] : memref<8x96xf32, #tpu.memory_space<vmem>>, vector<8x4xf32>
    %cst_143 = arith.constant dense<0.000000e+00> : vector<8x8xf32>
    %227 = tpu.matmul %224, %225, %cst_143 {dimension_numbers = #tpu.dot_dimension_numbers<[1], [1], [0], [0], [0, 0, 1, 0], [], []>} : vector<8x4xf32>, vector<8x4xf32>, vector<8x8xf32> -> vector<8x8xf32>
    %cst_144 = arith.constant 5.000000e-01 : f32
    %228 = vector.broadcast %cst_144 : f32 to vector<8x8xf32>
    %229 = arith.mulf %227, %228 : vector<8x8xf32>
    %cst_145 = arith.constant dense<0xFF800000> : vector<8xf32>
    %230 = vector.multi_reduction <maximumf>, %229, %cst_145 [1] : vector<8x8xf32> to vector<8xf32>
    %231 = vector.shape_cast %230 : vector<8xf32> to vector<8x1xf32>
    %232 = vector.broadcast %231 : vector<8x1xf32> to vector<8x8xf32>
    %233 = arith.subf %229, %232 : vector<8x8xf32>
    %234 = math.exp %233 : vector<8x8xf32>
    %cst_146 = arith.constant dense<0.000000e+00> : vector<8xf32>
    %235 = vector.multi_reduction <add>, %234, %cst_146 [1] : vector<8x8xf32> to vector<8xf32>
    %236 = vector.shape_cast %235 : vector<8xf32> to vector<8x1xf32>
    %237 = tpu.reciprocal %236 : vector<8x1xf32> -> vector<8x1xf32>
    %238 = vector.broadcast %237 : vector<8x1xf32> to vector<8x8xf32>
    %239 = arith.mulf %234, %238 : vector<8x8xf32>
    %cst_147 = arith.constant dense<0.000000e+00> : vector<8x4xf32>
    %240 = tpu.matmul %239, %226, %cst_147 {dimension_numbers = #tpu.dot_dimension_numbers<[1], [0], [0], [1], [0, 0, 1, 1], [], []>} : vector<8x8xf32>, vector<8x4xf32>, vector<8x4xf32> -> vector<8x4xf32>
    %c0_148 = arith.constant 0 : index
    %c4_149 = arith.constant 4 : index
    %241 = vector.load %arg26[%c0_148, %c4_149] : memref<8x32xf32, #tpu.memory_space<vmem>>, vector<8x4xf32>
    tpu.vector_store %arg26[%c0_148, %c4_149], %240 {strides = array<i32>} : memref<8x32xf32, #tpu.memory_space<vmem>>, vector<8x4xf32>,
    %c0_150 = arith.constant 0 : index
    %c8_151 = arith.constant 8 : index
    %242 = vector.load %arg25[%c0_150, %c8_151] : memref<8x96xf32, #tpu.memory_space<vmem>>, vector<8x4xf32>
    %c0_152 = arith.constant 0 : index
    %c40_153 = arith.constant 40 : index
    %243 = vector.load %arg25[%c0_152, %c40_153] : memref<8x96xf32, #tpu.memory_space<vmem>>, vector<8x4xf32>
    %c0_154 = arith.constant 0 : index
    %c72_155 = arith.constant 72 : index
    %244 = vector.load %arg25[%c0_154, %c72_155] : memref<8x96xf32, #tpu.memory_space<vmem>>, vector<8x4xf32>
    %cst_156 = arith.constant dense<0.000000e+00> : vector<8x8xf32>
    %245 = tpu.matmul %242, %243, %cst_156 {dimension_numbers = #tpu.dot_dimension_numbers<[1], [1], [0], [0], [0, 0, 1, 0], [], []>} : vector<8x4xf32>, vector<8x4xf32>, vector<8x8xf32> -> vector<8x8xf32>
    %cst_157 = arith.constant 5.000000e-01 : f32
    %246 = vector.broadcast %cst_157 : f32 to vector<8x8xf32>
    %247 = arith.mulf %245, %246 : vector<8x8xf32>
    %cst_158 = arith.constant dense<0xFF800000> : vector<8xf32>
    %248 = vector.multi_reduction <maximumf>, %247, %cst_158 [1] : vector<8x8xf32> to vector<8xf32>
    %249 = vector.shape_cast %248 : vector<8xf32> to vector<8x1xf32>
    %250 = vector.broadcast %249 : vector<8x1xf32> to vector<8x8xf32>
    %251 = arith.subf %247, %250 : vector<8x8xf32>
    %252 = math.exp %251 : vector<8x8xf32>
    %cst_159 = arith.constant dense<0.000000e+00> : vector<8xf32>
    %253 = vector.multi_reduction <add>, %252, %cst_159 [1] : vector<8x8xf32> to vector<8xf32>
    %254 = vector.shape_cast %253 : vector<8xf32> to vector<8x1xf32>
    %255 = tpu.reciprocal %254 : vector<8x1xf32> -> vector<8x1xf32>
    %256 = vector.broadcast %255 : vector<8x1xf32> to vector<8x8xf32>
    %257 = arith.mulf %252, %256 : vector<8x8xf32>
    %cst_160 = arith.constant dense<0.000000e+00> : vector<8x4xf32>
    %258 = tpu.matmul %257, %244, %cst_160 {dimension_numbers = #tpu.dot_dimension_numbers<[1], [0], [0], [1], [0, 0, 1, 1], [], []>} : vector<8x8xf32>, vector<8x4xf32>, vector<8x4xf32> -> vector<8x4xf32>
    %c0_161 = arith.constant 0 : index
    %c8_162 = arith.constant 8 : index
    %259 = vector.load %arg26[%c0_161, %c8_162] : memref<8x32xf32, #tpu.memory_space<vmem>>, vector<8x4xf32>
    tpu.vector_store %arg26[%c0_161, %c8_162], %258 {strides = array<i32>} : memref<8x32xf32, #tpu.memory_space<vmem>>, vector<8x4xf32>,
    %c0_163 = arith.constant 0 : index
    %c12_164 = arith.constant 12 : index
    %260 = vector.load %arg25[%c0_163, %c12_164] : memref<8x96xf32, #tpu.memory_space<vmem>>, vector<8x4xf32>
    %c0_165 = arith.constant 0 : index
    %c44_166 = arith.constant 44 : index
    %261 = vector.load %arg25[%c0_165, %c44_166] : memref<8x96xf32, #tpu.memory_space<vmem>>, vector<8x4xf32>
    %c0_167 = arith.constant 0 : index
    %c76_168 = arith.constant 76 : index
    %262 = vector.load %arg25[%c0_167, %c76_168] : memref<8x96xf32, #tpu.memory_space<vmem>>, vector<8x4xf32>
    %cst_169 = arith.constant dense<0.000000e+00> : vector<8x8xf32>
    %263 = tpu.matmul %260, %261, %cst_169 {dimension_numbers = #tpu.dot_dimension_numbers<[1], [1], [0], [0], [0, 0, 1, 0], [], []>} : vector<8x4xf32>, vector<8x4xf32>, vector<8x8xf32> -> vector<8x8xf32>
    %cst_170 = arith.constant 5.000000e-01 : f32
    %264 = vector.broadcast %cst_170 : f32 to vector<8x8xf32>
    %265 = arith.mulf %263, %264 : vector<8x8xf32>
    %cst_171 = arith.constant dense<0xFF800000> : vector<8xf32>
    %266 = vector.multi_reduction <maximumf>, %265, %cst_171 [1] : vector<8x8xf32> to vector<8xf32>
    %267 = vector.shape_cast %266 : vector<8xf32> to vector<8x1xf32>
    %268 = vector.broadcast %267 : vector<8x1xf32> to vector<8x8xf32>
    %269 = arith.subf %265, %268 : vector<8x8xf32>
    %270 = math.exp %269 : vector<8x8xf32>
    %cst_172 = arith.constant dense<0.000000e+00> : vector<8xf32>
    %271 = vector.multi_reduction <add>, %270, %cst_172 [1] : vector<8x8xf32> to vector<8xf32>
    %272 = vector.shape_cast %271 : vector<8xf32> to vector<8x1xf32>
    %273 = tpu.reciprocal %272 : vector<8x1xf32> -> vector<8x1xf32>
    %274 = vector.broadcast %273 : vector<8x1xf32> to vector<8x8xf32>
    %275 = arith.mulf %270, %274 : vector<8x8xf32>
    %cst_173 = arith.constant dense<0.000000e+00> : vector<8x4xf32>
    %276 = tpu.matmul %275, %262, %cst_173 {dimension_numbers = #tpu.dot_dimension_numbers<[1], [0], [0], [1], [0, 0, 1, 1], [], []>} : vector<8x8xf32>, vector<8x4xf32>, vector<8x4xf32> -> vector<8x4xf32>
    %c0_174 = arith.constant 0 : index
    %c12_175 = arith.constant 12 : index
    %277 = vector.load %arg26[%c0_174, %c12_175] : memref<8x32xf32, #tpu.memory_space<vmem>>, vector<8x4xf32>
    tpu.vector_store %arg26[%c0_174, %c12_175], %276 {strides = array<i32>} : memref<8x32xf32, #tpu.memory_space<vmem>>, vector<8x4xf32>,
    %c0_176 = arith.constant 0 : index
    %c16_177 = arith.constant 16 : index
    %278 = vector.load %arg25[%c0_176, %c16_177] : memref<8x96xf32, #tpu.memory_space<vmem>>, vector<8x4xf32>
    %c0_178 = arith.constant 0 : index
    %c48_179 = arith.constant 48 : index
    %279 = vector.load %arg25[%c0_178, %c48_179] : memref<8x96xf32, #tpu.memory_space<vmem>>, vector<8x4xf32>
    %c0_180 = arith.constant 0 : index
    %c80_181 = arith.constant 80 : index
    %280 = vector.load %arg25[%c0_180, %c80_181] : memref<8x96xf32, #tpu.memory_space<vmem>>, vector<8x4xf32>
    %cst_182 = arith.constant dense<0.000000e+00> : vector<8x8xf32>
    %281 = tpu.matmul %278, %279, %cst_182 {dimension_numbers = #tpu.dot_dimension_numbers<[1], [1], [0], [0], [0, 0, 1, 0], [], []>} : vector<8x4xf32>, vector<8x4xf32>, vector<8x8xf32> -> vector<8x8xf32>
    %cst_183 = arith.constant 5.000000e-01 : f32
    %282 = vector.broadcast %cst_183 : f32 to vector<8x8xf32>
    %283 = arith.mulf %281, %282 : vector<8x8xf32>
    %cst_184 = arith.constant dense<0xFF800000> : vector<8xf32>
    %284 = vector.multi_reduction <maximumf>, %283, %cst_184 [1] : vector<8x8xf32> to vector<8xf32>
    %285 = vector.shape_cast %284 : vector<8xf32> to vector<8x1xf32>
    %286 = vector.broadcast %285 : vector<8x1xf32> to vector<8x8xf32>
    %287 = arith.subf %283, %286 : vector<8x8xf32>
    %288 = math.exp %287 : vector<8x8xf32>
    %cst_185 = arith.constant dense<0.000000e+00> : vector<8xf32>
    %289 = vector.multi_reduction <add>, %288, %cst_185 [1] : vector<8x8xf32> to vector<8xf32>
    %290 = vector.shape_cast %289 : vector<8xf32> to vector<8x1xf32>
    %291 = tpu.reciprocal %290 : vector<8x1xf32> -> vector<8x1xf32>
    %292 = vector.broadcast %291 : vector<8x1xf32> to vector<8x8xf32>
    %293 = arith.mulf %288, %292 : vector<8x8xf32>
    %cst_186 = arith.constant dense<0.000000e+00> : vector<8x4xf32>
    %294 = tpu.matmul %293, %280, %cst_186 {dimension_numbers = #tpu.dot_dimension_numbers<[1], [0], [0], [1], [0, 0, 1, 1], [], []>} : vector<8x8xf32>, vector<8x4xf32>, vector<8x4xf32> -> vector<8x4xf32>
    %c0_187 = arith.constant 0 : index
    %c16_188 = arith.constant 16 : index
    %295 = vector.load %arg26[%c0_187, %c16_188] : memref<8x32xf32, #tpu.memory_space<vmem>>, vector<8x4xf32>
    tpu.vector_store %arg26[%c0_187, %c16_188], %294 {strides = array<i32>} : memref<8x32xf32, #tpu.memory_space<vmem>>, vector<8x4xf32>,
    %c0_189 = arith.constant 0 : index
    %c20_190 = arith.constant 20 : index
    %296 = vector.load %arg25[%c0_189, %c20_190] : memref<8x96xf32, #tpu.memory_space<vmem>>, vector<8x4xf32>
    %c0_191 = arith.constant 0 : index
    %c52_192 = arith.constant 52 : index
    %297 = vector.load %arg25[%c0_191, %c52_192] : memref<8x96xf32, #tpu.memory_space<vmem>>, vector<8x4xf32>
    %c0_193 = arith.constant 0 : index
    %c84_194 = arith.constant 84 : index
    %298 = vector.load %arg25[%c0_193, %c84_194] : memref<8x96xf32, #tpu.memory_space<vmem>>, vector<8x4xf32>
    %cst_195 = arith.constant dense<0.000000e+00> : vector<8x8xf32>
    %299 = tpu.matmul %296, %297, %cst_195 {dimension_numbers = #tpu.dot_dimension_numbers<[1], [1], [0], [0], [0, 0, 1, 0], [], []>} : vector<8x4xf32>, vector<8x4xf32>, vector<8x8xf32> -> vector<8x8xf32>
    %cst_196 = arith.constant 5.000000e-01 : f32
    %300 = vector.broadcast %cst_196 : f32 to vector<8x8xf32>
    %301 = arith.mulf %299, %300 : vector<8x8xf32>
    %cst_197 = arith.constant dense<0xFF800000> : vector<8xf32>
    %302 = vector.multi_reduction <maximumf>, %301, %cst_197 [1] : vector<8x8xf32> to vector<8xf32>
    %303 = vector.shape_cast %302 : vector<8xf32> to vector<8x1xf32>
    %304 = vector.broadcast %303 : vector<8x1xf32> to vector<8x8xf32>
    %305 = arith.subf %301, %304 : vector<8x8xf32>
    %306 = math.exp %305 : vector<8x8xf32>
    %cst_198 = arith.constant dense<0.000000e+00> : vector<8xf32>
    %307 = vector.multi_reduction <add>, %306, %cst_198 [1] : vector<8x8xf32> to vector<8xf32>
    %308 = vector.shape_cast %307 : vector<8xf32> to vector<8x1xf32>
    %309 = tpu.reciprocal %308 : vector<8x1xf32> -> vector<8x1xf32>
    %310 = vector.broadcast %309 : vector<8x1xf32> to vector<8x8xf32>
    %311 = arith.mulf %306, %310 : vector<8x8xf32>
    %cst_199 = arith.constant dense<0.000000e+00> : vector<8x4xf32>
    %312 = tpu.matmul %311, %298, %cst_199 {dimension_numbers = #tpu.dot_dimension_numbers<[1], [0], [0], [1], [0, 0, 1, 1], [], []>} : vector<8x8xf32>, vector<8x4xf32>, vector<8x4xf32> -> vector<8x4xf32>
    %c0_200 = arith.constant 0 : index
    %c20_201 = arith.constant 20 : index
    %313 = vector.load %arg26[%c0_200, %c20_201] : memref<8x32xf32, #tpu.memory_space<vmem>>, vector<8x4xf32>
    tpu.vector_store %arg26[%c0_200, %c20_201], %312 {strides = array<i32>} : memref<8x32xf32, #tpu.memory_space<vmem>>, vector<8x4xf32>,
    %c0_202 = arith.constant 0 : index
    %c24_203 = arith.constant 24 : index
    %314 = vector.load %arg25[%c0_202, %c24_203] : memref<8x96xf32, #tpu.memory_space<vmem>>, vector<8x4xf32>
    %c0_204 = arith.constant 0 : index
    %c56_205 = arith.constant 56 : index
    %315 = vector.load %arg25[%c0_204, %c56_205] : memref<8x96xf32, #tpu.memory_space<vmem>>, vector<8x4xf32>
    %c0_206 = arith.constant 0 : index
    %c88_207 = arith.constant 88 : index
    %316 = vector.load %arg25[%c0_206, %c88_207] : memref<8x96xf32, #tpu.memory_space<vmem>>, vector<8x4xf32>
    %cst_208 = arith.constant dense<0.000000e+00> : vector<8x8xf32>
    %317 = tpu.matmul %314, %315, %cst_208 {dimension_numbers = #tpu.dot_dimension_numbers<[1], [1], [0], [0], [0, 0, 1, 0], [], []>} : vector<8x4xf32>, vector<8x4xf32>, vector<8x8xf32> -> vector<8x8xf32>
    %cst_209 = arith.constant 5.000000e-01 : f32
    %318 = vector.broadcast %cst_209 : f32 to vector<8x8xf32>
    %319 = arith.mulf %317, %318 : vector<8x8xf32>
    %cst_210 = arith.constant dense<0xFF800000> : vector<8xf32>
    %320 = vector.multi_reduction <maximumf>, %319, %cst_210 [1] : vector<8x8xf32> to vector<8xf32>
    %321 = vector.shape_cast %320 : vector<8xf32> to vector<8x1xf32>
    %322 = vector.broadcast %321 : vector<8x1xf32> to vector<8x8xf32>
    %323 = arith.subf %319, %322 : vector<8x8xf32>
    %324 = math.exp %323 : vector<8x8xf32>
    %cst_211 = arith.constant dense<0.000000e+00> : vector<8xf32>
    %325 = vector.multi_reduction <add>, %324, %cst_211 [1] : vector<8x8xf32> to vector<8xf32>
    %326 = vector.shape_cast %325 : vector<8xf32> to vector<8x1xf32>
    %327 = tpu.reciprocal %326 : vector<8x1xf32> -> vector<8x1xf32>
    %328 = vector.broadcast %327 : vector<8x1xf32> to vector<8x8xf32>
    %329 = arith.mulf %324, %328 : vector<8x8xf32>
    %cst_212 = arith.constant dense<0.000000e+00> : vector<8x4xf32>
    %330 = tpu.matmul %329, %316, %cst_212 {dimension_numbers = #tpu.dot_dimension_numbers<[1], [0], [0], [1], [0, 0, 1, 1], [], []>} : vector<8x8xf32>, vector<8x4xf32>, vector<8x4xf32> -> vector<8x4xf32>
    %c0_213 = arith.constant 0 : index
    %c24_214 = arith.constant 24 : index
    %331 = vector.load %arg26[%c0_213, %c24_214] : memref<8x32xf32, #tpu.memory_space<vmem>>, vector<8x4xf32>
    tpu.vector_store %arg26[%c0_213, %c24_214], %330 {strides = array<i32>} : memref<8x32xf32, #tpu.memory_space<vmem>>, vector<8x4xf32>,
    %c0_215 = arith.constant 0 : index
    %c28_216 = arith.constant 28 : index
    %332 = vector.load %arg25[%c0_215, %c28_216] : memref<8x96xf32, #tpu.memory_space<vmem>>, vector<8x4xf32>
    %c0_217 = arith.constant 0 : index
    %c60_218 = arith.constant 60 : index
    %333 = vector.load %arg25[%c0_217, %c60_218] : memref<8x96xf32, #tpu.memory_space<vmem>>, vector<8x4xf32>
    %c0_219 = arith.constant 0 : index
    %c92_220 = arith.constant 92 : index
    %334 = vector.load %arg25[%c0_219, %c92_220] : memref<8x96xf32, #tpu.memory_space<vmem>>, vector<8x4xf32>
    %cst_221 = arith.constant dense<0.000000e+00> : vector<8x8xf32>
    %335 = tpu.matmul %332, %333, %cst_221 {dimension_numbers = #tpu.dot_dimension_numbers<[1], [1], [0], [0], [0, 0, 1, 0], [], []>} : vector<8x4xf32>, vector<8x4xf32>, vector<8x8xf32> -> vector<8x8xf32>
    %cst_222 = arith.constant 5.000000e-01 : f32
    %336 = vector.broadcast %cst_222 : f32 to vector<8x8xf32>
    %337 = arith.mulf %335, %336 : vector<8x8xf32>
    %cst_223 = arith.constant dense<0xFF800000> : vector<8xf32>
    %338 = vector.multi_reduction <maximumf>, %337, %cst_223 [1] : vector<8x8xf32> to vector<8xf32>
    %339 = vector.shape_cast %338 : vector<8xf32> to vector<8x1xf32>
    %340 = vector.broadcast %339 : vector<8x1xf32> to vector<8x8xf32>
    %341 = arith.subf %337, %340 : vector<8x8xf32>
    %342 = math.exp %341 : vector<8x8xf32>
    %cst_224 = arith.constant dense<0.000000e+00> : vector<8xf32>
    %343 = vector.multi_reduction <add>, %342, %cst_224 [1] : vector<8x8xf32> to vector<8xf32>
    %344 = vector.shape_cast %343 : vector<8xf32> to vector<8x1xf32>
    %345 = tpu.reciprocal %344 : vector<8x1xf32> -> vector<8x1xf32>
    %346 = vector.broadcast %345 : vector<8x1xf32> to vector<8x8xf32>
    %347 = arith.mulf %342, %346 : vector<8x8xf32>
    %cst_225 = arith.constant dense<0.000000e+00> : vector<8x4xf32>
    %348 = tpu.matmul %347, %334, %cst_225 {dimension_numbers = #tpu.dot_dimension_numbers<[1], [0], [0], [1], [0, 0, 1, 1], [], []>} : vector<8x8xf32>, vector<8x4xf32>, vector<8x4xf32> -> vector<8x4xf32>
    %c0_226 = arith.constant 0 : index
    %c28_227 = arith.constant 28 : index
    %349 = vector.load %arg26[%c0_226, %c28_227] : memref<8x32xf32, #tpu.memory_space<vmem>>, vector<8x4xf32>
    tpu.vector_store %arg26[%c0_226, %c28_227], %348 {strides = array<i32>} : memref<8x32xf32, #tpu.memory_space<vmem>>, vector<8x4xf32>,
    %c0_228 = arith.constant 0 : index
    %c0_229 = arith.constant 0 : index
    %350 = vector.load %arg26[%c0_228, %c0_229] : memref<8x32xf32, #tpu.memory_space<vmem>>, vector<8x32xf32>
    %c0_230 = arith.constant 0 : index
    %c0_231 = arith.constant 0 : index
    %351 = vector.load %arg14[%c0_230, %c0_231] : memref<32x32xf32, #tpu.memory_space<vmem>>, vector<32x32xf32>
    %cst_232 = arith.constant dense<0.000000e+00> : vector<8x32xf32>
    %352 = tpu.matmul %350, %351, %cst_232 {dimension_numbers = #tpu.dot_dimension_numbers<[1], [0], [0], [1], [0, 0, 1, 1], [], []>} : vector<8x32xf32>, vector<32x32xf32>, vector<8x32xf32> -> vector<8x32xf32>
    %c0_233 = arith.constant 0 : index
    %c0_234 = arith.constant 0 : index
    %353 = vector.load %arg15[%c0_233, %c0_234] : memref<1x32xf32, #tpu.memory_space<vmem>>, vector<1x32xf32>
    %354 = vector.broadcast %353 : vector<1x32xf32> to vector<8x32xf32>
    %355 = arith.addf %352, %354 : vector<8x32xf32>
    %356 = arith.addf %193, %355 : vector<8x32xf32>
    %cst_235 = arith.constant dense<0.000000e+00> : vector<8xf32>
    %357 = vector.multi_reduction <add>, %356, %cst_235 [1] : vector<8x32xf32> to vector<8xf32>
    %358 = vector.shape_cast %357 : vector<8xf32> to vector<8x1xf32>
    %cst_236 = arith.constant 3.200000e+01 : f32
    %359 = vector.broadcast %cst_236 : f32 to vector<8x1xf32>
    %360 = arith.divf %358, %359 : vector<8x1xf32>
    %361 = vector.broadcast %360 : vector<8x1xf32> to vector<8x32xf32>
    %362 = arith.subf %356, %361 : vector<8x32xf32>
    %363 = arith.mulf %362, %362 : vector<8x32xf32>
    %cst_237 = arith.constant dense<0.000000e+00> : vector<8xf32>
    %364 = vector.multi_reduction <add>, %363, %cst_237 [1] : vector<8x32xf32> to vector<8xf32>
    %365 = vector.shape_cast %364 : vector<8xf32> to vector<8x1xf32>
    %cst_238 = arith.constant 3.200000e+01 : f32
    %366 = vector.broadcast %cst_238 : f32 to vector<8x1xf32>
    %367 = arith.divf %365, %366 : vector<8x1xf32>
    %368 = vector.broadcast %360 : vector<8x1xf32> to vector<8x32xf32>
    %369 = arith.subf %356, %368 : vector<8x32xf32>
    %cst_239 = arith.constant 9.99999974E-6 : f32
    %370 = vector.broadcast %cst_239 : f32 to vector<8x1xf32>
    %371 = arith.addf %367, %370 : vector<8x1xf32>
    %372 = math.rsqrt %371 : vector<8x1xf32>
    %373 = vector.broadcast %372 : vector<8x1xf32> to vector<8x32xf32>
    %374 = arith.mulf %369, %373 : vector<8x32xf32>
    %c0_240 = arith.constant 0 : index
    %c0_241 = arith.constant 0 : index
    %375 = vector.load %arg16[%c0_240, %c0_241] : memref<1x32xf32, #tpu.memory_space<vmem>>, vector<1x32xf32>
    %376 = vector.broadcast %375 : vector<1x32xf32> to vector<8x32xf32>
    %377 = arith.mulf %374, %376 : vector<8x32xf32>
    %c0_242 = arith.constant 0 : index
    %c0_243 = arith.constant 0 : index
    %378 = vector.load %arg17[%c0_242, %c0_243] : memref<1x32xf32, #tpu.memory_space<vmem>>, vector<1x32xf32>
    %379 = vector.broadcast %378 : vector<1x32xf32> to vector<8x32xf32>
    %380 = arith.addf %377, %379 : vector<8x32xf32>
    %c0_244 = arith.constant 0 : index
    %c0_245 = arith.constant 0 : index
    %381 = vector.load %arg18[%c0_244, %c0_245] : memref<32x2048xf32, #tpu.memory_space<vmem>>, vector<32x2048xf32>
    %cst_246 = arith.constant dense<0.000000e+00> : vector<8x2048xf32>
    %382 = tpu.matmul %380, %381, %cst_246 {dimension_numbers = #tpu.dot_dimension_numbers<[1], [0], [0], [1], [0, 0, 1, 1], [], []>} : vector<8x32xf32>, vector<32x2048xf32>, vector<8x2048xf32> -> vector<8x2048xf32>
    %c0_247 = arith.constant 0 : index
    %c0_248 = arith.constant 0 : index
    %383 = vector.load %arg19[%c0_247, %c0_248] : memref<1x2048xf32, #tpu.memory_space<vmem>>, vector<1x2048xf32>
    %384 = vector.broadcast %383 : vector<1x2048xf32> to vector<8x2048xf32>
    %385 = arith.addf %382, %384 : vector<8x2048xf32>
    %cst_249 = arith.constant 0.000000e+00 : f32
    %386 = vector.broadcast %cst_249 : f32 to vector<8x2048xf32>
    %387 = arith.maximumf %385, %386 : vector<8x2048xf32>
    %c0_250 = arith.constant 0 : index
    %c0_251 = arith.constant 0 : index
    %388 = vector.load %arg20[%c0_250, %c0_251] : memref<2048x32xf32, #tpu.memory_space<vmem>>, vector<2048x32xf32>
    %cst_252 = arith.constant dense<0.000000e+00> : vector<8x32xf32>
    %389 = tpu.matmul %387, %388, %cst_252 {dimension_numbers = #tpu.dot_dimension_numbers<[1], [0], [0], [1], [0, 0, 1, 1], [], []>} : vector<8x2048xf32>, vector<2048x32xf32>, vector<8x32xf32> -> vector<8x32xf32>
    %c0_253 = arith.constant 0 : index
    %c0_254 = arith.constant 0 : index
    %390 = vector.load %arg21[%c0_253, %c0_254] : memref<1x32xf32, #tpu.memory_space<vmem>>, vector<1x32xf32>
    %391 = vector.broadcast %390 : vector<1x32xf32> to vector<8x32xf32>
    %392 = arith.addf %389, %391 : vector<8x32xf32>
    %393 = arith.addf %380, %392 : vector<8x32xf32>
    %cst_255 = arith.constant dense<0.000000e+00> : vector<8xf32>
    %394 = vector.multi_reduction <add>, %393, %cst_255 [1] : vector<8x32xf32> to vector<8xf32>
    %395 = vector.shape_cast %394 : vector<8xf32> to vector<8x1xf32>
    %cst_256 = arith.constant 3.200000e+01 : f32
    %396 = vector.broadcast %cst_256 : f32 to vector<8x1xf32>
    %397 = arith.divf %395, %396 : vector<8x1xf32>
    %398 = vector.broadcast %397 : vector<8x1xf32> to vector<8x32xf32>
    %399 = arith.subf %393, %398 : vector<8x32xf32>
    %400 = arith.mulf %399, %399 : vector<8x32xf32>
    %cst_257 = arith.constant dense<0.000000e+00> : vector<8xf32>
    %401 = vector.multi_reduction <add>, %400, %cst_257 [1] : vector<8x32xf32> to vector<8xf32>
    %402 = vector.shape_cast %401 : vector<8xf32> to vector<8x1xf32>
    %cst_258 = arith.constant 3.200000e+01 : f32
    %403 = vector.broadcast %cst_258 : f32 to vector<8x1xf32>
    %404 = arith.divf %402, %403 : vector<8x1xf32>
    %405 = vector.broadcast %397 : vector<8x1xf32> to vector<8x32xf32>
    %406 = arith.subf %393, %405 : vector<8x32xf32>
    %cst_259 = arith.constant 9.99999974E-6 : f32
    %407 = vector.broadcast %cst_259 : f32 to vector<8x1xf32>
    %408 = arith.addf %404, %407 : vector<8x1xf32>
    %409 = math.rsqrt %408 : vector<8x1xf32>
    %410 = vector.broadcast %409 : vector<8x1xf32> to vector<8x32xf32>
    %411 = arith.mulf %406, %410 : vector<8x32xf32>
    %c0_260 = arith.constant 0 : index
    %c0_261 = arith.constant 0 : index
    %412 = vector.load %arg22[%c0_260, %c0_261] : memref<1x32xf32, #tpu.memory_space<vmem>>, vector<1x32xf32>
    %413 = vector.broadcast %412 : vector<1x32xf32> to vector<8x32xf32>
    %414 = arith.mulf %411, %413 : vector<8x32xf32>
    %c0_262 = arith.constant 0 : index
    %c0_263 = arith.constant 0 : index
    %415 = vector.load %arg23[%c0_262, %c0_263] : memref<1x32xf32, #tpu.memory_space<vmem>>, vector<1x32xf32>
    %416 = vector.broadcast %415 : vector<1x32xf32> to vector<8x32xf32>
    %417 = arith.addf %414, %416 : vector<8x32xf32>
    %c0_264 = arith.constant 0 : index
    %c0_265 = arith.constant 0 : index
    %c0_266 = arith.constant 0 : index
    %418 = vector.load %arg24[%c0_264, %c0_265, %c0_266] : memref<1x8x32xf32, #tpu.memory_space<vmem>>, vector<1x8x32xf32>
    %419 = vector.shape_cast %418 : vector<1x8x32xf32> to vector<8x32xf32>
    %420 = vector.shape_cast %417 : vector<8x32xf32> to vector<1x8x32xf32>
    tpu.vector_store %arg24[%c0_264, %c0_265, %c0_266], %420 {strides = array<i32>} : memref<1x8x32xf32, #tpu.memory_space<vmem>>, vector<1x8x32xf32>,
    return
  }
  func.func @transform_0(%arg0: i32) -> (i32, i32, i32) {
    %c0_i32 = arith.constant 0 : i32
    %c0_i32_0 = arith.constant 0 : i32
    %c0_i32_1 = arith.constant 0 : i32
    return %arg0, %c0_i32, %c0_i32_0 : i32, i32, i32
  }
  func.func @transform_1(%arg0: i32) -> (i32, i32, i32) {
    %c0_i32 = arith.constant 0 : i32
    %c0_i32_0 = arith.constant 0 : i32
    %c0_i32_1 = arith.constant 0 : i32
    return %arg0, %c0_i32, %c0_i32_0 : i32, i32, i32
  }
  func.func @transform_2(%arg0: i32) -> (i32, i32) {
    %c0_i32 = arith.constant 0 : i32
    %c0_i32_0 = arith.constant 0 : i32
    %c0_i32_1 = arith.constant 0 : i32
    return %c0_i32, %c0_i32_0 : i32, i32
  }
  func.func @transform_3(%arg0: i32) -> (i32, i32) {
    %c0_i32 = arith.constant 0 : i32
    %c0_i32_0 = arith.constant 0 : i32
    %c0_i32_1 = arith.constant 0 : i32
    return %c0_i32, %c0_i32_0 : i32, i32
  }
  func.func @transform_4(%arg0: i32) -> (i32, i32) {
    %c0_i32 = arith.constant 0 : i32
    %c0_i32_0 = arith.constant 0 : i32
    %c0_i32_1 = arith.constant 0 : i32
    return %c0_i32, %c0_i32_0 : i32, i32
  }
  func.func @transform_5(%arg0: i32) -> (i32, i32) {
    %c0_i32 = arith.constant 0 : i32
    %c0_i32_0 = arith.constant 0 : i32
    %c0_i32_1 = arith.constant 0 : i32
    return %c0_i32, %c0_i32_0 : i32, i32
  }
  func.func @transform_6(%arg0: i32) -> (i32, i32) {
    %c0_i32 = arith.constant 0 : i32
    %c0_i32_0 = arith.constant 0 : i32
    %c0_i32_1 = arith.constant 0 : i32
    return %c0_i32, %c0_i32_0 : i32, i32
  }
  func.func @transform_7(%arg0: i32) -> (i32, i32) {
    %c0_i32 = arith.constant 0 : i32
    %c0_i32_0 = arith.constant 0 : i32
    %c0_i32_1 = arith.constant 0 : i32
    return %c0_i32, %c0_i32_0 : i32, i32
  }
  func.func @transform_8(%arg0: i32) -> (i32, i32) {
    %c0_i32 = arith.constant 0 : i32
    %c0_i32_0 = arith.constant 0 : i32
    %c0_i32_1 = arith.constant 0 : i32
    return %c0_i32, %c0_i32_0 : i32, i32
  }
  func.func @transform_9(%arg0: i32) -> (i32, i32) {
    %c0_i32 = arith.constant 0 : i32
    %c0_i32_0 = arith.constant 0 : i32
    %c0_i32_1 = arith.constant 0 : i32
    return %c0_i32, %c0_i32_0 : i32, i32
  }
  func.func @transform_10(%arg0: i32) -> (i32, i32) {
    %c0_i32 = arith.constant 0 : i32
    %c0_i32_0 = arith.constant 0 : i32
    %c0_i32_1 = arith.constant 0 : i32
    return %c0_i32, %c0_i32_0 : i32, i32
  }
  func.func @transform_11(%arg0: i32) -> (i32, i32) {
    %c0_i32 = arith.constant 0 : i32
    %c0_i32_0 = arith.constant 0 : i32
    %c0_i32_1 = arith.constant 0 : i32
    return %c0_i32, %c0_i32_0 : i32, i32
  }
  func.func @transform_12(%arg0: i32) -> (i32, i32) {
    %c0_i32 = arith.constant 0 : i32
    %c0_i32_0 = arith.constant 0 : i32
    %c0_i32_1 = arith.constant 0 : i32
    return %c0_i32, %c0_i32_0 : i32, i32
  }
  func.func @transform_13(%arg0: i32) -> (i32, i32) {
    %c0_i32 = arith.constant 0 : i32
    %c0_i32_0 = arith.constant 0 : i32
    %c0_i32_1 = arith.constant 0 : i32
    return %c0_i32, %c0_i32_0 : i32, i32
  }
  func.func @transform_14(%arg0: i32) -> (i32, i32) {
    %c0_i32 = arith.constant 0 : i32
    %c0_i32_0 = arith.constant 0 : i32
    %c0_i32_1 = arith.constant 0 : i32
    return %c0_i32, %c0_i32_0 : i32, i32
  }
  func.func @transform_15(%arg0: i32) -> (i32, i32) {
    %c0_i32 = arith.constant 0 : i32
    %c0_i32_0 = arith.constant 0 : i32
    %c0_i32_1 = arith.constant 0 : i32
    return %c0_i32, %c0_i32_0 : i32, i32
  }
  func.func @transform_16(%arg0: i32) -> (i32, i32) {
    %c0_i32 = arith.constant 0 : i32
    %c0_i32_0 = arith.constant 0 : i32
    %c0_i32_1 = arith.constant 0 : i32
    return %c0_i32, %c0_i32_0 : i32, i32
  }
  func.func @transform_17(%arg0: i32) -> (i32, i32) {
    %c0_i32 = arith.constant 0 : i32
    %c0_i32_0 = arith.constant 0 : i32
    %c0_i32_1 = arith.constant 0 : i32
    return %c0_i32, %c0_i32_0 : i32, i32
  }
  func.func @transform_18(%arg0: i32) -> (i32, i32) {
    %c0_i32 = arith.constant 0 : i32
    %c0_i32_0 = arith.constant 0 : i32
    %c0_i32_1 = arith.constant 0 : i32
    return %c0_i32, %c0_i32_0 : i32, i32
  }
  func.func @transform_19(%arg0: i32) -> (i32, i32) {
    %c0_i32 = arith.constant 0 : i32
    %c0_i32_0 = arith.constant 0 : i32
    %c0_i32_1 = arith.constant 0 : i32
    return %c0_i32, %c0_i32_0 : i32, i32
  }
  func.func @transform_20(%arg0: i32) -> (i32, i32) {
    %c0_i32 = arith.constant 0 : i32
    %c0_i32_0 = arith.constant 0 : i32
    %c0_i32_1 = arith.constant 0 : i32
    return %c0_i32, %c0_i32_0 : i32, i32
  }
  func.func @transform_21(%arg0: i32) -> (i32, i32) {
    %c0_i32 = arith.constant 0 : i32
    %c0_i32_0 = arith.constant 0 : i32
    %c0_i32_1 = arith.constant 0 : i32
    return %c0_i32, %c0_i32_0 : i32, i32
  }
  func.func @transform_22(%arg0: i32) -> (i32, i32) {
    %c0_i32 = arith.constant 0 : i32
    %c0_i32_0 = arith.constant 0 : i32
    %c0_i32_1 = arith.constant 0 : i32
    return %c0_i32, %c0_i32_0 : i32, i32
  }
  func.func @transform_23(%arg0: i32) -> (i32, i32, i32) {
    %c0_i32 = arith.constant 0 : i32
    %c0_i32_0 = arith.constant 0 : i32
    %c0_i32_1 = arith.constant 0 : i32
    return %arg0, %c0_i32, %c0_i32_0 : i32, i32, i32
  }
}

</mosaic_0001>

<bundles_post_ra>
// kernel: tpu_custom_call.1
= control target key start
LH: loop header
LB: loop body
LE: loop exit
PB: predicated region body
PF: predicated region fallthrough
CT: control target
= control target key end

     0   :  { %s8742_s0 = inlined_call_operand.vmem [shape: f32[2,8,32], index: 0, kind: input, shape index: {}]   ;;  %s8743_s1 = inlined_call_operand.vmem [shape: f32[2,8,32], index: 1, kind: input, shape index: {}]   ;;  %s8744_s2 = inlined_call_operand.vmem [shape: f32[8,8], index: 2, kind: input, shape index: {}]   ;;  %s8745_s3 = inlined_call_operand.vmem [shape: f32[32,96], index: 3, kind: input, shape index: {}]   ;;  %s8746_s4 = inlined_call_operand.vmem [shape: f32[1,96], index: 4, kind: input, shape index: {}]   ;;  %s8747_s5 = inlined_call_operand.vmem [shape: f32[32,32], index: 5, kind: input, shape index: {}]   ;;  %s8748_s6 = inlined_call_operand.vmem [shape: f32[1,32], index: 6, kind: input, shape index: {}]   ;;  %s8749_s7 = inlined_call_operand.vmem [shape: f32[1,32], index: 7, kind: input, shape index: {}]   ;;  %s8750_s8 = inlined_call_operand.vmem [shape: f32[1,32], index: 8, kind: input, shape index: {}]   ;;  %s8751_s9 = inlined_call_operand.vmem [shape: f32[32,64], index: 9, kind: input, shape index: {}]   ;;  %s8752_s10 = inlined_call_operand.vmem [shape: f32[1,64], index: 10, kind: input, shape index: {}]   ;;  %s8753_s11 = inlined_call_operand.vmem [shape: f32[32,32], index: 11, kind: input, shape index: {}]   ;;  %s8754_s12 = inlined_call_operand.vmem [shape: f32[1,32], index: 12, kind: input, shape index: {}]   ;;  %s8755_s13 = inlined_call_operand.vmem [shape: f32[32,32], index: 13, kind: input, shape index: {}]   ;;  %s8756_s14 = inlined_call_operand.vmem [shape: f32[1,32], index: 14, kind: input, shape index: {}]   ;;  %s8757_s15 = inlined_call_operand.vmem [shape: f32[1,32], index: 15, kind: input, shape index: {}]   ;;  %s8758_s16 = inlined_call_operand.vmem [shape: f32[1,32], index: 16, kind: input, shape index: {}]   ;;  %s8759_s17 = inlined_call_operand.vmem [shape: f32[32,2048], index: 17, kind: input, shape index: {}]   ;;  %s8760_s18 = inlined_call_operand.vmem [shape: f32[1,2048], index: 18, kind: input, shape index: {}]   ;;  %s8761_s19 = inlined_call_operand.vmem [shape: f32[2048,32], index: 19, kind: input, shape index: {}]   ;;  %s8762_s20 = inlined_call_operand.vmem [shape: f32[1,32], index: 20, kind: input, shape index: {}]   ;;  %s8763_s21 = inlined_call_operand.vmem [shape: f32[1,32], index: 21, kind: input, shape index: {}]   ;;  %s8764_s22 = inlined_call_operand.vmem [shape: f32[1,32], index: 22, kind: input, shape index: {}]   ;;  %s8765_s23 = inlined_call_operand.hbm [shape: f32[2,8,32], index: 23, kind: output, shape index: {}]  }
   0x1   :  { %8807 = sst [smem:[#allocation12_spill]] %s8742_s0 }
   0x2   :  { %8808 = sst [smem:[#allocation13_spill]] %s8743_s1 }
   0x3   :  { %8809 = sst [smem:[#allocation14_spill]] %s8744_s2 }
   0x4   :  { %8810 = sst [smem:[#allocation15_spill]] %s8745_s3 }
   0x5   :  { %8811 = sst [smem:[#allocation16_spill]] %s8746_s4 }
   0x6   :  { %8812 = sst [smem:[#allocation17_spill]] %s8747_s5 }
   0x7   :  { %8813 = sst [smem:[#allocation18_spill]] %s8748_s6 }
   0x8   :  { %8814 = sst [smem:[#allocation19_spill]] %s8749_s7 }
   0x9   :  { %8815 = sst [smem:[#allocation20_spill]] %s8753_s11 }
   0xa   :  { %28 = vsyncpa [#allocation5], 0 }
   0xb   :  { %30 = vsyncpa [#allocation5 + $0x1], 0  ;;  %s7045_s4 = smov 0   ;;  %s7047_s30 = smov 0  }
   0xc   :  { %s7049_s24 = smov 0   ;;  %s7051_s25 = smov 0  }
   0xd LB: > { %8816 = sst [smem:[#allocation7_spill]] %s6877_s4  ;;  %s7066_s5 = sadd.s32 4294967295, %s6889_s25   ;;  %s6889_s25 = sphi %s7051_s25, %s8865_s25   ;;  %s6885_s24 = sphi %s7049_s24, %s8867_s24   ;;  %s6881_s30 = sphi %s7047_s30, %s8869_s30   ;;  %s6877_s4 = sphi %s7045_s4, %s8868_s4  }
   0xe   : > { %8817 = sst [smem:[#allocation8_spill]] %s6885_s24  ;;  %s5667_s1 = sadd.s32 4294967294, %s6889_s25  }
   0xf   : > { %s7070_s26 = sadd.s32 1, %s6889_s25   ;;  %s536_s2 = sadd.s32 1, %s6885_s24 }
  0x10   : > { %8818 = sst [smem:[#allocation9_spill]] %s7070_s26  ;;  %s533_s6 = ssub.s32 %s6889_s25, %s7070_s26 }
  0x11   : > { %p546_p0 = scmp.ne.s32.totalorder %s6885_s24, %s6881_s30  ;;  %p534_p1 = scmp.eq.s32.totalorder %s533_s6, 0 }
  0x12   : > { %p547_p2 = scmp.eq.s32.totalorder %s7066_s5, 1  ;;  %p552_p3 = scmp.ne.s32.totalorder %s6881_s30, %s6877_s4 }
  0x13   : > { %p553_p4 = scmp.eq.s32.totalorder %s5667_s1, 1  ;;  %p5670_p7 = scmp.ge.s32.totalorder %s6889_s25, 1 }
  0x14   : > { %s7081_s27 = scalar_select %p534_p1, %s6885_s24, %s536_s2  }
  0x15   : > { %p7083_p5 = por %p547_p2, %p546_p0  ;;  %p7087_p6 = por %p553_p4, %p552_p3 }
  0x16   : > { %8819 = sst [smem:[#allocation10_spill]] %s7081_s27  ;;  %p648_p8 = scmp.lt.s32.totalorder %s6889_s25, 3 }
  0x17   : > { %s8821_s28 = scalar_select %p7087_p6, 1, 0 }
  0x18   : > { %p649_p9 = pnand %p5670_p7, %p648_p8 }
  0x19   : > { %8822 = sst [smem:[#allocation11_spill]] %s8821_s28  ;;  %s8823_s0 = sld [smem:[#allocation15_spill]] (!%p649_p9)  ;;  %v6891_v3 = vmov (!%p649_p9), 0.0|0.0   ;;  %vm6892_vm0 = vmmov (!%p649_p9), 0   ;;  %v6893_v6 = vmov (!%p649_p9), 0.0   ;;  %vm737_vm1 = vcmask (!%p649_p9), 261120  }
  0x1a   : > { %652 = sbr.rel (%p649_p9) target bundleno = 5128 (0x1408), region = 112  ;;  %6335 = vmatprep.subr.bf16.mxu0 (!%p649_p9), %v6891_v3  ;;  %6128 = vmatprep.mubr.msk.f32.mxu0 (!%p649_p9), %vm6892_vm0, %v6893_v6  ;;  %p715_p10 = scmp.lt.s32.totalorder (!%p649_p9), %s7066_s5, 1  ;;  %vm811_vm2 = vcmask (!%p649_p9), 785408   ;;  %vm817_vm3 = vcmask (!%p649_p9), 31744   ;;  %vm894_vm4 = vcmask (!%p649_p9), 64512   ;;  %vm1156_vm5 = vcmask (!%p649_p9), 64544  }
  0x1b   : > { %6131 = vmatprep.subr.mxu1 (!%p649_p9), %v6893_v6  ;;  %6133 = vmatprep.mubr.msk.f32.mxu1 (!%p649_p9), %vm6892_vm0, %v6893_v6  ;;  %s8824_s3 = sld [smem:[#allocation12_spill]] (!%p649_p9)  ;;  %s8794_s26 = smov (!%p649_p9), 64   ;;  %vm1331_vm6 = vcmask (!%p649_p9), 97344   ;;  %vm1506_vm7 = vcmask (!%p649_p9), 130144   ;;  %vm1681_vm8 = vcmask (!%p649_p9), 162944   ;;  %vm1856_vm9 = vcmask (!%p649_p9), 195744  }
  0x1c   : > { %s8776_s29 = smov (!%p649_p9), 96   ;;  %s8773_s2 = smov (!%p649_p9), 120   ;;  %vm2031_vm10 = vcmask (!%p649_p9), 228544   ;;  %vm2206_vm11 = vcmask (!%p649_p9), 261344   ;;  %vm2408_vm12 = vcmask (!%p649_p9), 523264   ;;  %vm2498_vm13 = vcmask (!%p649_p9), 785920  }
  0x1d   : > { %s8772_s6 = smov (!%p649_p9), 116   ;;  %s8803_s28 = smov (!%p649_p9), 24  }
  0x1e   : > { %s8802_s4 = smov (!%p649_p9), 28   ;;  %s8829_s11 = sld [smem:[#allocation20_spill]] (!%p649_p9) }
  0x1f   : > { %v726_v0 = vld [vmem:[%s8823_s0] sm:$0xff] (!%p649_p9)  ;;  %v727_v1 = vld [vmem:[%s8823_s0 + $0x8] sm:$0xff] (!%p649_p9)  ;;  %v728_v2 = vld [vmem:[%s8823_s0 + $0x10] sm:$0xff] (!%p649_p9) }
  0x20   : > { %v6336_v4 = vpack.c.bf16 (!%p649_p9), %v727_v1, %v726_v0  ;;  %v729_v5 = vld [vmem:[%s8823_s0 + $0x18] sm:$0xff] (!%p649_p9)  ;;  %s8825_s0 = sld [smem:[#allocation16_spill]] (!%p649_p9) }
  0x21   : > { %v6339_v7 = vpack.c.bf16 %v729_v5, %v728_v2  ;;  %s7113_s27 = scalar_select %p715_p10, %s7066_s5, 1 }
  0x22   : > { %6337 = vmatpush3.bf16.msra.mxu0 %v6336_v4 }
  0x23   : > { %6338 = vmatprep.subr.bf16.mxu0 %v6891_v3  ;;  %s8796_s24 = sshll.u32 %s7113_s27, 3 }
  0x24   : > { %s718_s1 = scalar_lea.vmem %s8824_s3, %s8796_s24  ;;  %s8780_s3 = smov 92  }
  0x25   : > { %v7122_v8 = vld [vmem:[%s718_s1] sm:$0xff]  ;;  %s8775_s1 = smov 88   ;;  %s8804_s24 = smov 20  }
  0x26   : > { %6340 = vmatpush3.bf16.msra.mxu0 %v6339_v7  ;;  %v5674_v9 = vld [vmem:[%s8825_s0] ss:$0 sm:$0xff]  ;;  %s8774_s0 = smov 124  }
  0x27   : > { %6151 = vmatprep.subr.mxu0 %v6893_v6 }
  0x29   : > { %6129 = vmatmul.mubr.msk.f32.vlgmr.msra.gmra.mrb[0].mxu0 %vm737_vm1, %v7122_v8 }
  0x2a   : > { %6153 = vmatprep.mubr.msk.f32.mxu0 %vm6892_vm0, %v6893_v6 }
  0xfc   : > { %v807_v10 = vpop.f32.mrb[0].mxu0 }
  0xfd   : > { %v808_v11 = vadd.f32 %v5674_v9, %v807_v10  ;;  %v6130_v12 = vpop.f32.mrb[1].mxu0 }
  0xff   : > { %812 = vst.msk [vmem:[#allocation2] sm:$0xff] %vm811_vm2, %v808_v11 }
 0x106   : > { %v7132_v13 = vld [vmem:[#allocation2] sm:$0xff] }
 0x107   : > { %906 = vrot.lane.b32.xlu1 %v7132_v13, %s8794_s26  ;;  %815 = vrot.lane.b32.xlu0 %v7132_v13, %s8776_s29  ;;  %s8778_s29 = smov 72   ;;  %s8832_s26 = sld [smem:[#allocation19_spill]] }
 0x10b   : > { %987 = vrot.lane.b32.xlu1 %v7132_v13, %s8780_s3  ;;  %s8781_s3 = smov 100  }
 0x10f   : > { %985 = vrot.lane.b32.xlu1 %v7132_v13, %s8774_s0  ;;  %s8826_s0 = sld [smem:[#allocation14_spill]] }
 0x113   : > { %1162 = vrot.lane.b32.xlu1 %v7132_v13, %s8775_s1  ;;  %s8779_s1 = smov 84  }
 0x115   : > { %v7167_v21 = vld [vmem:[%s8826_s0] sm:$0xff]  ;;  %s8777_s0 = smov 68  }
 0x117   : > { %1160 = vrot.lane.b32.xlu1 %v7132_v13, %s8773_s2  ;;  %s8786_s2 = smov 80  }
 0x11b   : > { %1335 = vrot.lane.b32.xlu1 %v7132_v13, %s8772_s6  ;;  %s8784_s6 = smov 112  }
 0x179   : > { %v907_v14 = vpop.permute.xlu1 %906  ;;  %v816_v15 = vpop.permute.xlu0 %815 }
 0x17a   : > { %6132 = vmatpush3.xpose.msk.msra.mxu1 %vm817_vm3, %v816_v15 }
 0x17b   : > { %6136 = vmatprep.subr.mxu1 %v6893_v6 }
 0x17d   : > { %v7150_v16 = vpop.permute.xlu1 %987  ;;  %6134 = vmatmul.mubr.msk.f32.vlgmr.msra.gmra.mrb[0].mxu1 %vm817_vm3, %v7132_v13 }
 0x17e   : > { %6137 = vmatpush3.msra.mxu1 %v907_v14  ;;  %6138 = vmatprep.mubr.msk.f32.mxu1 %vm6892_vm0, %v6893_v6 }
 0x17f   : > { %6141 = vmatprep.subr.mxu1 %v6893_v6 }
 0x181   : > { %v7157_v17 = vpop.permute.xlu1 %985 }
 0x185   : > { %v1163_v18 = vpop.permute.xlu1 %1162 }
 0x186   : > { %6152 = vmatpush3.xpose.msk.msra.mxu0 %vm817_vm3, %v1163_v18 }
 0x187   : > { %6161 = vmatprep.subr.mxu0 %v6893_v6 }
 0x189   : > { %v1161_v19 = vpop.permute.xlu1 %1160 }
 0x18a   : > { %6154 = vmatmul.mubr.msk.f32.vlgmr.msra.gmra.mrb[2].mxu0 %vm817_vm3, %v1161_v19 }
 0x18b   : > { %6163 = vmatprep.mubr.msk.f32.mxu0 %vm6892_vm0, %v6893_v6 }
 0x18d   : > { %v1336_v32 = vpop.permute.xlu1 %1335 }
 0x250   : > { %v888_v20 = vpop.f32.mrb[0].mxu1 }
 0x251   : > { %v892_v22 = vmul.f32 0.5, %v888_v20  ;;  %v6135_v23 = vpop.f32.mrb[1].mxu1 }
 0x253   : > { %v893_v24 = vadd.f32 %v892_v22, %v7167_v21 }
 0x255   : > { %v895_v25 = vsel %vm894_vm4, %v893_v24, -inf }
 0x256   : > { %896 = vmax.xlane.f32.xlu0 %v895_v25 }
 0x25d   : > { %v1234_v26 = vpop.f32.mrb[2].mxu0 }
 0x25e   : > { %v6155_v27 = vpop.f32.mrb[3].mxu0  ;;  %v1238_v35 = vmul.f32 0.5, %v1234_v26 }
 0x260   : > { %v1239_v36 = vadd.f32 %v1238_v35, %v7167_v21 }
 0x262   : > { %v1240_v37 = vsel %vm894_vm4, %v1239_v36, -inf }
 0x26c   : > { %1337 = vrot.lane.b32.xlu0 %v7132_v13, %s8779_s1  ;;  %s8782_s1 = smov 104  }
 0x270   : > { %1862 = vrot.lane.b32.xlu0 %v7132_v13, %s8778_s29  ;;  %s8783_s29 = smov 108  }
 0x274   : > { %2037 = vrot.lane.b32.xlu0 %v7132_v13, %s8777_s0  ;;  %s8785_s0 = smov 76  }
 0x2e3   : > { %v897_v28 = vpop.xlane.xlu0 %896 }
 0x2e4   : > { %v898_v29 = vsub.f32 %v893_v24, %v897_v28 }
 0x2e6   : > { %v899_v30 = vmul.f32 1.442695, %v898_v29 }
 0x2e7   : > { %v1338_v31 = vpop.permute.xlu0 %1337 }
 0x2e8   : > { %6757 = vpow2.f32 %v899_v30  ;;  %6162 = vmatpush3.xpose.msk.msra.mxu0 %vm817_vm3, %v1338_v31 }
 0x2e9   : > { %6171 = vmatprep.subr.mxu0 %v6893_v6 }
 0x2eb   : > { %6164 = vmatmul.mubr.msk.f32.vlgmr.msra.gmra.mrb[4].mxu0 %vm817_vm3, %v1336_v32  ;;  %v1863_v44 = vpop.permute.xlu0 %1862 }
 0x2ec   : > { %6173 = vmatprep.mubr.msk.f32.mxu0 %vm6892_vm0, %v6893_v6 }
 0x2ef   : > { %v2038_v47 = vpop.permute.xlu0 %2037 }
 0x2f2   : > { %v6758_v33 = vpop.eup %6757 }
 0x2f3   : > { %v901_v34 = vsel %vm894_vm4, %v6758_v33, 0.0 }
 0x2f4   : > { %902 = vadd.xlane.f32.xlu1 %v901_v34 }
 0x305   : > { %1512 = vrot.lane.b32.xlu1 %v7132_v13, %s8786_s2  ;;  %s8791_s2 = smov 44  }
 0x309   : > { %1510 = vrot.lane.b32.xlu1 %v7132_v13, %s8784_s6  ;;  %s8792_s6 = smov 56  }
 0x30d   : > { %1687 = vrot.lane.b32.xlu1 %v7132_v13, %s8785_s0  ;;  %s8788_s0 = smov 40  }
 0x311   : > { %1685 = vrot.lane.b32.xlu1 %v7132_v13, %s8783_s29  ;;  %s8790_s29 = smov 48  }
 0x315   : > { %1860 = vrot.lane.b32.xlu1 %v7132_v13, %s8782_s1  ;;  %s8793_s1 = smov 52  }
 0x319   : > { %2035 = vrot.lane.b32.xlu1 %v7132_v13, %s8781_s3  ;;  %s8787_s3 = smov 60  }
 0x33d   : > { %1241 = vmax.xlane.f32.xlu1 %v1240_v37 }
 0x381   : > { %v903_v38 = vpop.xlane.xlu1 %902 }
 0x382   : > { %6759 = vrcp.f32 %v903_v38 }
 0x385   : > { %v1513_v39 = vpop.permute.xlu1 %1512 }
 0x386   : > { %6172 = vmatpush3.xpose.msk.msra.mxu0 %vm817_vm3, %v1513_v39 }
 0x387   : > { %6181 = vmatprep.subr.mxu0 %v6893_v6 }
 0x389   : > { %v1511_v40 = vpop.permute.xlu1 %1510 }
 0x38a   : > { %6174 = vmatmul.mubr.msk.f32.vlgmr.msra.gmra.mrb[6].mxu0 %vm817_vm3, %v1511_v40 }
 0x38b   : > { %6183 = vmatprep.mubr.msk.f32.mxu0 %vm6892_vm0, %v6893_v6 }
 0x38c   : > { %v6760_v41 = vpop.eup %6759 }
 0x38d   : > { %v905_v42 = vmul.f32 %v6760_v41, %v6758_v33  ;;  %v1688_v43 = vpop.permute.xlu1 %1687 }
 0x38e   : > { %6182 = vmatpush3.xpose.msk.msra.mxu0 %vm817_vm3, %v1688_v43 }
 0x38f   : > { %6139 = vmatmul.mubr.msk.f32.vlgmr.msra.gmra.mrb[2].mxu1 %vm894_vm4, %v905_v42  ;;  %6191 = vmatprep.subr.mxu0 %v6893_v6 }
 0x390   : > { %6142 = vmatpush3.xpose.msk.msra.mxu1 %vm817_vm3, %v7150_v16  ;;  %6143 = vmatprep.mubr.msk.f32.mxu1 %vm6892_vm0, %v6893_v6 }
 0x391   : > { %v1686_v45 = vpop.permute.xlu1 %1685  ;;  %6146 = vmatprep.subr.mxu1 %v6893_v6 }
 0x392   : > { %6184 = vmatmul.mubr.msk.f32.vlgmr.msra.gmra.mrb[8].mxu0 %vm817_vm3, %v1686_v45 }
 0x393   : > { %6192 = vmatpush3.xpose.msk.msra.mxu0 %vm817_vm3, %v1863_v44  ;;  %6144 = vmatmul.mubr.msk.f32.vlgmr.msra.gmra.mrb[4].mxu1 %vm817_vm3, %v7157_v17 }
 0x394   : > { %6193 = vmatprep.mubr.msk.f32.mxu0 %vm6892_vm0, %v6893_v6  ;;  %6201 = vmatprep.subr.mxu0 %v6893_v6 }
 0x395   : > { %v1861_v46 = vpop.permute.xlu1 %1860  ;;  %6148 = vmatprep.mubr.msk.f32.mxu1 %vm6892_vm0, %v6893_v6 }
 0x396   : > { %6194 = vmatmul.mubr.msk.f32.vlgmr.msra.gmra.mrb[10].mxu0 %vm817_vm3, %v1861_v46 }
 0x397   : > { %6202 = vmatpush3.xpose.msk.msra.mxu0 %vm817_vm3, %v2038_v47  ;;  %6203 = vmatprep.mubr.msk.f32.mxu0 %vm6892_vm0, %v6893_v6 }
 0x398   : > { %6341 = vmatprep.subr.bf16.mxu0 %v6891_v3 }
 0x399   : > { %v2036_v48 = vpop.permute.xlu1 %2035 }
 0x39a   : > { %6204 = vmatmul.mubr.msk.f32.vlgmr.msra.gmra.mrb[12].mxu0 %vm817_vm3, %v2036_v48 }
 0x39b   : > { %6219 = vmatprep.mubr.msk.f32.mxu0 %vm6892_vm0, %v6893_v6 }
 0x3be   : > { %v1409_v49 = vpop.f32.mrb[4].mxu0 }
 0x3bf   : > { %v6165_v50 = vpop.f32.mrb[5].mxu0  ;;  %v1413_v62 = vmul.f32 0.5, %v1409_v49 }
 0x3c1   : > { %v1414_v11 = vadd.f32 %v1413_v62, %v7167_v21 }
 0x3c3   : > { %v1415_v17 = vsel %vm894_vm4, %v1414_v11, -inf }
 0x3ca   : > { %v1242_v52 = vpop.xlane.xlu1 %1241 }
 0x3cb   : > { %v1243_v54 = vsub.f32 %v1239_v36, %v1242_v52 }
 0x3cd   : > { %v1244_v57 = vmul.f32 1.442695, %v1243_v54 }
 0x3cf   : > { %6761 = vpow2.f32 %v1244_v57 }
 0x3d9   : > { %v7237_v22 = vpop.eup %6761 }
 0x3da   : > { %v1246_v25 = vsel %vm894_vm4, %v7237_v22, 0.0 }
 0x45d   : > { %v1584_v51 = vpop.f32.mrb[6].mxu0 }
 0x45e   : > { %v6175_v53 = vpop.f32.mrb[7].mxu0  ;;  %v1588_v9 = vmul.f32 0.5, %v1584_v51 }
 0x460   : > { %v1589_v18 = vadd.f32 %v1588_v9, %v7167_v21 }
 0x462   : > { %v978_v55 = vpop.f32.mrb[2].mxu1  ;;  %v1590_v23 = vsel %vm894_vm4, %v1589_v18, -inf }
 0x463   : > { %982 = vst.msk [vmem:[#allocation3] sm:$0xff] %vm817_vm3, %v978_v55  ;;  %v6140_v56 = vpop.f32.mrb[3].mxu1 }
 0x465   : > { %v1759_v58 = vpop.f32.mrb[8].mxu0 }
 0x466   : > { %v1763_v59 = vmul.f32 0.5, %v1759_v58  ;;  %v1059_v60 = vpop.f32.mrb[4].mxu1  ;;  %v6185_v61 = vpop.f32.mrb[9].mxu0 }
 0x467   : > { %v1063_v63 = vmul.f32 0.5, %v1059_v60  ;;  %v6145_v0 = vpop.f32.mrb[5].mxu1 }
 0x468   : > { %v1764_v1 = vadd.f32 %v1763_v59, %v7167_v21 }
 0x469   : > { %v1934_v2 = vpop.f32.mrb[10].mxu0  ;;  %v1064_v4 = vadd.f32 %v1063_v63, %v7167_v21 }
 0x46a   : > { %v6195_v5 = vpop.f32.mrb[11].mxu0  ;;  %v1765_v7 = vsel %vm894_vm4, %v1764_v1, -inf  ;;  %v1938_v16 = vmul.f32 0.5, %v1934_v2 }
 0x46b   : > { %1766 = vmax.xlane.f32.xlu1 %v1765_v7  ;;  %v1065_v10 = vsel %vm894_vm4, %v1064_v4, -inf }
 0x46c   : > { %1066 = vmax.xlane.f32.xlu0 %v1065_v10  ;;  %v1939_v24 = vadd.f32 %v1938_v16, %v7167_v21 }
 0x46d   : > { %v2109_v12 = vpop.f32.mrb[12].mxu0 }
 0x46e   : > { %v2113_v14 = vmul.f32 0.5, %v2109_v12  ;;  %v6205_v15 = vpop.f32.mrb[13].mxu0  ;;  %v1940_v26 = vsel %vm894_vm4, %v1939_v24, -inf }
 0x470   : > { %1416 = vmax.xlane.f32.xlu0 %v1415_v17  ;;  %v2114_v19 = vadd.f32 %v2113_v14, %v7167_v21 }
 0x472   : > { %v2115_v20 = vsel %vm894_vm4, %v2114_v19, -inf }
 0x473   : > { %2116 = vmax.xlane.f32.xlu1 %v2115_v20 }
 0x474   : > { %1591 = vmax.xlane.f32.xlu0 %v1590_v23 }
 0x477   : > { %1247 = vadd.xlane.f32.xlu1 %v1246_v25 }
 0x478   : > { %1941 = vmax.xlane.f32.xlu0 %v1940_v26 }
 0x4f8   : > { %v1767_v27 = vpop.xlane.xlu1 %1766 }
 0x4f9   : > { %v1067_v28 = vpop.xlane.xlu0 %1066  ;;  %v1768_v29 = vsub.f32 %v1764_v1, %v1767_v27 }
 0x4fa   : > { %v1068_v37 = vsub.f32 %v1064_v4, %v1067_v28 }
 0x4fb   : > { %v1769_v32 = vmul.f32 1.442695, %v1768_v29 }
 0x4fc   : > { %v1069_v42 = vmul.f32 1.442695, %v1068_v37 }
 0x4fd   : > { %v1417_v30 = vpop.xlane.xlu0 %1416 }
 0x4fe   : > { %v1418_v31 = vsub.f32 %v1414_v11, %v1417_v30 }
 0x500   : > { %v1419_v33 = vmul.f32 1.442695, %v1418_v31  ;;  %v2117_v34 = vpop.xlane.xlu1 %2116 }
 0x501   : > { %v2118_v35 = vsub.f32 %v2114_v19, %v2117_v34  ;;  %v1592_v36 = vpop.xlane.xlu0 %1591 }
 0x502   : > { %6763 = vpow2.f32 %v1419_v33  ;;  %v1593_v21 = vsub.f32 %v1589_v18, %v1592_v36 }
 0x503   : > { %6765 = vpow2.f32 %v1769_v32  ;;  %v2119_v38 = vmul.f32 1.442695, %v2118_v35 }
 0x504   : > { %v1594_v39 = vmul.f32 1.442695, %v1593_v21  ;;  %v1248_v56 = vpop.xlane.xlu1 %1247 }
 0x505   : > { %v1942_v40 = vpop.xlane.xlu0 %1941 }
 0x506   : > { %6767 = vpow2.f32 %v1594_v39  ;;  %v1943_v41 = vsub.f32 %v1939_v24, %v1942_v40 }
 0x507   : > { %6769 = vpow2.f32 %v2119_v38 }
 0x508   : > { %v1944_v43 = vmul.f32 1.442695, %v1943_v41 }
 0x50a   : > { %6771 = vpow2.f32 %v1944_v43 }
 0x50b   : > { %6773 = vpow2.f32 %v1069_v42 }
 0x50c   : > { %v7244_v44 = vpop.eup %6763 }
 0x50d   : > { %v1421_v45 = vsel %vm894_vm4, %v7244_v44, 0.0  ;;  %v7248_v46 = vpop.eup %6765 }
 0x50e   : > { %1422 = vadd.xlane.f32.xlu0 %v1421_v45  ;;  %v1771_v48 = vsel %vm894_vm4, %v7248_v46, 0.0 }
 0x510   : > { %v7250_v47 = vpop.eup %6767 }
 0x511   : > { %v1596_v49 = vsel %vm894_vm4, %v7250_v47, 0.0  ;;  %v7256_v50 = vpop.eup %6769 }
 0x512   : > { %1772 = vadd.xlane.f32.xlu0 %v1771_v48  ;;  %1597 = vadd.xlane.f32.xlu1 %v1596_v49  ;;  %v2121_v53 = vsel %vm894_vm4, %v7256_v50, 0.0 }
 0x514   : > { %v7258_v51 = vpop.eup %6771 }
 0x515   : > { %v1946_v52 = vsel %vm894_vm4, %v7258_v51, 0.0  ;;  %v6774_v54 = vpop.eup %6773 }
 0x516   : > { %1947 = vadd.xlane.f32.xlu1 %v1946_v52  ;;  %2122 = vadd.xlane.f32.xlu0 %v2121_v53  ;;  %v1071_v55 = vsel %vm894_vm4, %v6774_v54, 0.0 }
 0x51a   : > { %1072 = vadd.xlane.f32.xlu0 %v1071_v55 }
 0x527   : > { %1076 = vrot.lane.b32.xlu1 %v7132_v13, %s8787_s3  ;;  %s8789_s3 = smov 36  }
 0x52b   : > { %1426 = vrot.lane.b32.xlu1 %v7132_v13, %s8793_s1  ;;  %s8827_s1 = sld [smem:[#allocation17_spill]] }
 0x52f   : > { %1601 = vrot.lane.b32.xlu1 %v7132_v13, %s8790_s29  ;;  %s8800_s29 = smov 12  }
 0x530   : > { %1251 = vrot.lane.b32.xlu0 %v7132_v13, %s8792_s6  ;;  %s8835_s6 = smov 96  }
 0x531   : > { %v2209_v31 = vld [vmem:[%s8827_s1] sm:$0xff]  ;;  %v2210_v32 = vld [vmem:[%s8827_s1 + $0x8] sm:$0xff]  ;;  %v2211_v33 = vld [vmem:[%s8827_s1 + $0x10] sm:$0xff] }
 0x532   : > { %v6342_v35 = vpack.c.bf16 %v2210_v32, %v2209_v31  ;;  %v2212_v36 = vld [vmem:[%s8827_s1 + $0x18] sm:$0xff]  ;;  %s8831_s1 = sld [smem:[#allocation13_spill]] }
 0x533   : > { %1951 = vrot.lane.b32.xlu1 %v7132_v13, %s8788_s0  ;;  %s8797_s0 = smov 4   ;;  %v6345_v21 = vpack.c.bf16 %v2212_v36, %v2211_v33 }
 0x534   : > { %1776 = vrot.lane.b32.xlu0 %v7132_v13, %s8791_s2  ;;  %6343 = vmatpush3.bf16.msra.mxu0 %v6342_v35  ;;  %s8834_s2 = smov 92  }
 0x535   : > { %6344 = vmatprep.subr.bf16.mxu0 %v6891_v3 }
 0x538   : > { %2126 = vrot.lane.b32.xlu0 %v7132_v13, %s8789_s3  ;;  %s8799_s3 = smov 8   ;;  %6346 = vmatpush3.bf16.msra.mxu0 %v6345_v21 }
 0x539   : > { %6353 = vmatprep.subr.bf16.mxu0 %v6891_v3 }
 0x59b   : > { %v1423_v57 = vpop.xlane.xlu0 %1422 }
 0x59f   : > { %v1773_v58 = vpop.xlane.xlu0 %1772  ;;  %v1598_v59 = vpop.xlane.xlu1 %1597 }
 0x5a3   : > { %v2123_v60 = vpop.xlane.xlu0 %2122  ;;  %v1948_v61 = vpop.xlane.xlu1 %1947 }
 0x5a7   : > { %v1073_v62 = vpop.xlane.xlu0 %1072  ;;  %v1077_v63 = vpop.permute.xlu1 %1076 }
 0x5a8   : > { %6775 = vrcp.f32 %v1073_v62  ;;  %6147 = vmatpush3.msra.mxu1 %v1077_v63  ;;  %v2410_v62 = vld [vmem:[%s8829_s11] sm:$0xff]  ;;  %v2411_v63 = vld [vmem:[%s8829_s11 + $0x8] sm:$0xff] }
 0x5a9   : > { %6156 = vmatprep.subr.mxu1 %v6893_v6  ;;  %6777 = vrcp.f32 %v1248_v56 }
 0x5aa   : > { %6779 = vrcp.f32 %v1423_v57 }
 0x5ab   : > { %6781 = vrcp.f32 %v1598_v59  ;;  %v1252_v4 = vpop.permute.xlu0 %1251  ;;  %v1427_v5 = vpop.permute.xlu1 %1426 }
 0x5ac   : > { %6783 = vrcp.f32 %v1773_v58 }
 0x5ad   : > { %6785 = vrcp.f32 %v1948_v61 }
 0x5ae   : > { %6787 = vrcp.f32 %v2123_v60 }
 0x5af   : > { %v1602_v11 = vpop.permute.xlu1 %1601  ;;  %v1777_v15 = vpop.permute.xlu0 %1776 }
 0x5b2   : > { %v6776_v0 = vpop.eup %6775 }
 0x5b3   : > { %v1075_v1 = vmul.f32 %v6776_v0, %v6774_v54  ;;  %v6778_v2 = vpop.eup %6777  ;;  %v1952_v18 = vpop.permute.xlu1 %1951  ;;  %v2412_v0 = vld [vmem:[%s8829_s11 + $0x10] sm:$0xff] }
 0x5b4   : > { %v1250_v13 = vmul.f32 %v6778_v2, %v7237_v22  ;;  %v6780_v7 = vpop.eup %6779  ;;  %v2127_v22 = vpop.permute.xlu0 %2126 }
 0x5b5   : > { %6149 = vmatmul.mubr.msk.f32.vlgmr.msra.gmra.mrb[6].mxu1 %vm894_vm4, %v1075_v1  ;;  %v1425_v9 = vmul.f32 %v6780_v7, %v7244_v44  ;;  %v6782_v10 = vpop.eup %6781  ;;  %v2413_v1 = vld [vmem:[%s8829_s11 + $0x18] sm:$0xff] }
 0x5b6   : > { %6157 = vmatpush3.msra.mxu1 %v1252_v4  ;;  %6158 = vmatprep.mubr.msk.f32.mxu1 %vm6892_vm0, %v6893_v6  ;;  %v1600_v12 = vmul.f32 %v6782_v10, %v7250_v47  ;;  %v6784_v14 = vpop.eup %6783  ;;  %v6357_v2 = vpack.c.bf16 %v2413_v1, %v2412_v0  ;;  %v2324_v4 = vld [vmem:[%s8751_s9] sm:$0xff] }
 0x5b7   : > { %6166 = vmatprep.subr.mxu1 %v6893_v6  ;;  %v1775_v16 = vmul.f32 %v6784_v14, %v7248_v46  ;;  %v6786_v17 = vpop.eup %6785 }
 0x5b8   : > { %v1950_v19 = vmul.f32 %v6786_v17, %v7258_v51  ;;  %v6788_v20 = vpop.eup %6787  ;;  %v5702_v17 = vld [vmem:[%s8832_s26] ss:$0 sm:$0xff]  ;;  %s8838_s26 = smov 84  }
 0x5b9   : > { %6159 = vmatmul.mubr.msk.f32.vlgmr.msra.gmra.mrb[8].mxu1 %vm894_vm4, %v1250_v13  ;;  %v2125_v23 = vmul.f32 %v6788_v20, %v7256_v50  ;;  %v2325_v13 = vld [vmem:[%s8751_s9 + $0x8] sm:$0xff] }
 0x5ba   : > { %6167 = vmatpush3.msra.mxu1 %v1427_v5  ;;  %6168 = vmatprep.mubr.msk.f32.mxu1 %vm6892_vm0, %v6893_v6  ;;  %v2326_v5 = vld [vmem:[%s8751_s9 + $0x10] sm:$0xff]  ;;  %v6348_v7 = vpack.c.bf16 %v2325_v13, %v2324_v4 }
 0x5bb   : > { %6176 = vmatprep.subr.mxu1 %v6893_v6 }
 0x5bd   : > { %6169 = vmatmul.mubr.msk.f32.vlgmr.msra.gmra.mrb[10].mxu1 %vm894_vm4, %v1425_v9  ;;  %v2327_v9 = vld [vmem:[%s8751_s9 + $0x18] sm:$0xff] }
 0x5be   : > { %6177 = vmatpush3.msra.mxu1 %v1602_v11  ;;  %6178 = vmatprep.mubr.msk.f32.mxu1 %vm6892_vm0, %v6893_v6  ;;  %v6351_v10 = vpack.c.bf16 %v2327_v9, %v2326_v5 }
 0x5bf   : > { %6186 = vmatprep.subr.mxu1 %v6893_v6 }
 0x5c1   : > { %6179 = vmatmul.mubr.msk.f32.vlgmr.msra.gmra.mrb[12].mxu1 %vm894_vm4, %v1600_v12 }
 0x5c2   : > { %6187 = vmatpush3.msra.mxu1 %v1777_v15  ;;  %6188 = vmatprep.mubr.msk.f32.mxu1 %vm6892_vm0, %v6893_v6 }
 0x5c3   : > { %6196 = vmatprep.subr.mxu1 %v6893_v6 }
 0x5c5   : > { %6189 = vmatmul.mubr.msk.f32.vlgmr.msra.gmra.mrb[14].mxu1 %vm894_vm4, %v1775_v16 }
 0x5c6   : > { %6197 = vmatpush3.msra.mxu1 %v1952_v18  ;;  %6198 = vmatprep.mubr.msk.f32.mxu1 %vm6892_vm0, %v6893_v6 }
 0x5c7   : > { %6206 = vmatprep.subr.mxu1 %v6893_v6 }
 0x5c9   : > { %6199 = vmatmul.mubr.msk.f32.vlgmr.msra.gmra.mrb[16].mxu1 %vm894_vm4, %v1950_v19  ;;  %v5703_v19 = vld [vmem:[%s8750_s8] ss:$0 sm:$0xff] }
 0x5ca   : > { %6207 = vmatpush3.msra.mxu1 %v2127_v22  ;;  %6208 = vmatprep.mubr.msk.f32.mxu1 %vm6892_vm0, %v6893_v6 }
 0x5cb   : > { %6347 = vmatprep.subr.bf16.mxu1 %v6891_v3 }
 0x5cd   : > { %6209 = vmatmul.mubr.msk.f32.vlgmr.msra.gmra.mrb[18].mxu1 %vm894_vm4, %v2125_v23  ;;  %v5704_v23 = vld [vmem:[%s8752_s10] ss:$0 sm:$0xff] }
 0x5ce   : > { %6230 = vmatprep.mubr.msk.f32.mxu1 %vm6892_vm0, %v6893_v6  ;;  %6349 = vmatpush3.bf16.msra.mxu1 %v6348_v7 }
 0x5cf   : > { %6350 = vmatprep.subr.bf16.mxu1 %v6891_v3 }
 0x5d2   : > { %6352 = vmatpush3.bf16.msra.mxu1 %v6351_v10 }
 0x5d3   : > { %6244 = vmatprep.subr.mxu1 %v6893_v6 }
 0x688   : > { %v1148_v24 = vpop.f32.mrb[6].mxu1 }
 0x689   : > { %1153 = vrot.lane.b32.xlu1 %v1148_v24, %s8797_s0  ;;  %v6150_v25 = vpop.f32.mrb[7].mxu1  ;;  %s8828_s0 = sld [smem:[#allocation18_spill]] }
 0x68c   : > { %v1323_v26 = vpop.f32.mrb[8].mxu1 }
 0x68d   : > { %1328 = vrot.lane.b32.xlu0 %v1323_v26, %s8799_s3  ;;  %v6160_v27 = vpop.f32.mrb[9].mxu1  ;;  %s8805_s3 = smov 16  }
 0x68e   : > { %v5706_v27 = vld [vmem:[%s8754_s12] ss:$0 sm:$0xff] }
 0x68f   : > { %v5700_v51 = vld [vmem:[%s8828_s0] ss:$0 sm:$0xff]  ;;  %s8830_s0 = sshll.u32 %s7113_s27, 3  ;;  %s8836_s27 = smov 88  }
 0x690   : > { %v1498_v28 = vpop.f32.mrb[10].mxu1  ;;  %s722_s11 = scalar_lea.vmem %s8831_s1, %s8830_s0  ;;  %s8833_s0 = smov 64  }
 0x691   : > { %1503 = vrot.lane.b32.xlu1 %v1498_v28, %s8800_s29  ;;  %v6170_v29 = vpop.f32.mrb[11].mxu1  ;;  %v724_v11 = vld [vmem:[%s722_s11] sm:$0xff]  ;;  %s8839_s1 = smov 120   ;;  %s8840_s29 = smov 80  }
 0x692   : > { %6231 = vmatmul.mubr.msk.f32.vlgmr.msra.gmra.mrb[20].mxu1 %vm737_vm1, %v724_v11  ;;  %s8841_s11 = smov 116  }
 0x693   : > { %6246 = vmatprep.mubr.msk.f32.mxu1 %vm6892_vm0, %v6893_v6 }
 0x694   : > { %v1673_v30 = vpop.f32.mrb[12].mxu1 }
 0x695   : > { %1678 = vrot.lane.b32.xlu0 %v1673_v30, %s8805_s3  ;;  %v6180_v34 = vpop.f32.mrb[13].mxu1  ;;  %s8837_s3 = smov 124  }
 0x698   : > { %v1848_v37 = vpop.f32.mrb[14].mxu1 }
 0x699   : > { %1853 = vrot.lane.b32.xlu1 %v1848_v37, %s8804_s24  ;;  %v6190_v38 = vpop.f32.mrb[15].mxu1  ;;  %s8843_s24 = smov 112  }
 0x69c   : > { %v2023_v39 = vpop.f32.mrb[16].mxu1 }
 0x69d   : > { %2028 = vrot.lane.b32.xlu0 %v2023_v39, %s8803_s28  ;;  %v6200_v40 = vpop.f32.mrb[17].mxu1  ;;  %s8844_s28 = smov 72  }
 0x6a0   : > { %v2198_v41 = vpop.f32.mrb[18].mxu1 }
 0x6a1   : > { %2203 = vrot.lane.b32.xlu1 %v2198_v41, %s8802_s4  ;;  %v6210_v42 = vpop.f32.mrb[19].mxu1  ;;  %s8842_s4 = smov 76  }
 0x6fb   : > { %v1154_v43 = vpop.permute.xlu1 %1153 }
 0x6fc   : > { %1157 = vst.msk [vmem:[#allocation3] sm:$0xff] %vm1156_vm5, %v1154_v43 }
 0x6ff   : > { %v1329_v44 = vpop.permute.xlu0 %1328 }
 0x700   : > { %1332 = vst.msk [vmem:[#allocation3] sm:$0xff] %vm1331_vm6, %v1329_v44 }
 0x703   : > { %v1504_v45 = vpop.permute.xlu1 %1503 }
 0x704   : > { %1507 = vst.msk [vmem:[#allocation3] sm:$0xff] %vm1506_vm7, %v1504_v45 }
 0x707   : > { %v1679_v46 = vpop.permute.xlu0 %1678 }
 0x708   : > { %1682 = vst.msk [vmem:[#allocation3] sm:$0xff] %vm1681_vm8, %v1679_v46 }
 0x70b   : > { %v1854_v47 = vpop.permute.xlu1 %1853 }
 0x70c   : > { %1857 = vst.msk [vmem:[#allocation3] sm:$0xff] %vm1856_vm9, %v1854_v47 }
 0x70f   : > { %v2029_v48 = vpop.permute.xlu0 %2028 }
 0x710   : > { %2032 = vst.msk [vmem:[#allocation3] sm:$0xff] %vm2031_vm10, %v2029_v48 }
 0x713   : > { %v2204_v49 = vpop.permute.xlu1 %2203 }
 0x714   : > { %2207 = vst.msk [vmem:[#allocation3] sm:$0xff] %vm2206_vm11, %v2204_v49 }
 0x71b   : > { %v2208_v50 = vld [vmem:[#allocation3] sm:$0xff] }
 0x71c   : > { %6220 = vmatmul.mubr.msk.f32.vlgmr.msra.gmra.mrb[14].mxu0 %vm737_vm1, %v2208_v50 }
 0x71d   : > { %6241 = vmatprep.mubr.msk.f32.mxu0 %vm6892_vm0, %v6893_v6 }
 0x765   : > { %v2404_v24 = vpop.f32.mrb[20].mxu1 }
 0x766   : > { %v2405_v25 = vadd.f32 %v5704_v23, %v2404_v24  ;;  %v6232_v26 = vpop.f32.mrb[21].mxu1 }
 0x768   : > { %2409 = vst.msk [vmem:[#allocation2] sm:$0xff] %vm2408_vm12, %v2405_v25 }
 0x7ef   : > { %v2289_v52 = vpop.f32.mrb[14].mxu0 }
 0x7f0   : > { %v2290_v53 = vadd.f32 %v5700_v51, %v2289_v52  ;;  %v6221_v54 = vpop.f32.mrb[15].mxu0 }
 0x7f2   : > { %v2293_v55 = vadd.f32 %v2290_v53, %v7122_v8  ;;  %v6354_v8 = vpack.c.bf16 %v2411_v63, %v2410_v62 }
 0x7f4   : > { %v2294_v56 = vsel %vm737_vm1, %v2293_v55, 0.0  ;;  %6355 = vmatpush3.bf16.msra.mxu0 %v6354_v8 }
 0x7f5   : > { %2295 = vadd.xlane.f32.xlu0 %v2294_v56  ;;  %6356 = vmatprep.subr.bf16.mxu0 %v6891_v3 }
 0x7f8   : > { %6358 = vmatpush3.bf16.msra.mxu0 %v6357_v2 }
 0x7f9   : > { %6254 = vmatprep.subr.mxu0 %v6893_v6 }
 0x882   : > { %v2296_v57 = vpop.xlane.xlu0 %2295 }
 0x883   : > { %v2298_v58 = vmul.f32 0.03125, %v2296_v57 }
 0x885   : > { %v2299_v59 = vsub.f32 %v2293_v55, %v2298_v58 }
 0x887   : > { %v2300_v60 = vmul.f32 %v2299_v59, %v2299_v59 }
 0x889   : > { %v2301_v61 = vsel %vm737_vm1, %v2300_v60, 0.0 }
 0x88a   : > { %2302 = vadd.xlane.f32.xlu1 %v2301_v61 }
 0x917   : > { %v2303_v12 = vpop.xlane.xlu1 %2302 }
 0x918   : > { %v2304_v14 = vmul.f32 0.03125, %v2303_v12 }
 0x91a   : > { %v2305_v15 = vadd.f32 1e-05, %v2304_v14 }
 0x91c   : > { %6789 = vrsqrt.f32 %v2305_v15 }
 0x926   : > { %v6790_v16 = vpop.eup %6789 }
 0x927   : > { %v2307_v18 = vmul.f32 %v6790_v16, %v2299_v59 }
 0x929   : > { %v2315_v20 = vmul.f32 %v5702_v17, %v2307_v18 }
 0x92b   : > { %v7392_v22 = vadd.f32 %v5703_v19, %v2315_v20 }
 0x92d   : > { %6242 = vmatmul.mubr.msk.f32.vlgmr.msra.gmra.mrb[16].mxu0 %vm737_vm1, %v7392_v22 }
 0x92e   : > { %6256 = vmatprep.mubr.msk.f32.mxu0 %vm6892_vm0, %v6893_v6 }
 0xa00   : > { %v2490_v28 = vpop.f32.mrb[16].mxu0 }
 0xa01   : > { %v2491_v29 = vadd.f32 %v5706_v27, %v2490_v28  ;;  %v6243_v30 = vpop.f32.mrb[17].mxu0 }
 0xa03   : > { %2495 = vrot.lane.b32.xlu0 %v2491_v29, %s8833_s0 }
 0xa75   : > { %v2496_v31 = vpop.permute.xlu0 %2495 }
 0xa76   : > { %2499 = vst.msk [vmem:[#allocation2] sm:$0xff] %vm2498_vm13, %v2496_v31 }
 0xa7d   : > { %v7405_v32 = vld [vmem:[#allocation2] sm:$0xff] }
 0xa7e   : > { %2671 = vrot.lane.b32.xlu0 %v7405_v32, %s8834_s2  ;;  %2502 = vrot.lane.b32.xlu1 %v7405_v32, %s8835_s6  ;;  %s8845_s2 = smov 108   ;;  %s8846_s6 = smov 68  }
 0xa82   : > { %2844 = vrot.lane.b32.xlu0 %v7405_v32, %s8836_s27  ;;  %2669 = vrot.lane.b32.xlu1 %v7405_v32, %s8837_s3  ;;  %s8847_s27 = smov 104   ;;  %s8848_s3 = smov 100  }
 0xa86   : > { %3017 = vrot.lane.b32.xlu0 %v7405_v32, %s8838_s26  ;;  %2842 = vrot.lane.b32.xlu1 %v7405_v32, %s8839_s1  ;;  %s8849_s26 = smov 60   ;;  %s8851_s1 = smov 56  }
 0xa8a   : > { %3190 = vrot.lane.b32.xlu0 %v7405_v32, %s8840_s29  ;;  %3015 = vrot.lane.b32.xlu1 %v7405_v32, %s8841_s11  ;;  %s8852_s29 = smov 44   ;;  %s8853_s11 = smov 48  }
 0xa8e   : > { %3363 = vrot.lane.b32.xlu0 %v7405_v32, %s8842_s4  ;;  %3188 = vrot.lane.b32.xlu1 %v7405_v32, %s8843_s24  ;;  %s8854_s4 = smov 36   ;;  %s8855_s24 = smov 40  }
 0xa92   : > { %3536 = vrot.lane.b32.xlu0 %v7405_v32, %s8844_s28  ;;  %3361 = vrot.lane.b32.xlu1 %v7405_v32, %s8845_s2  ;;  %s8856_s28 = smov 4   ;;  %s8857_s2 = smov 8  }
 0xa96   : > { %3709 = vrot.lane.b32.xlu0 %v7405_v32, %s8846_s6  ;;  %3534 = vrot.lane.b32.xlu1 %v7405_v32, %s8847_s27  ;;  %s8858_s6 = smov 12  }
 0xa9a   : > { %2590 = vrot.lane.b32.xlu0 %v7405_v32, %s8833_s0  ;;  %3707 = vrot.lane.b32.xlu1 %v7405_v32, %s8848_s3  ;;  %s8850_s0 = smov 52  }
 0xa9e   : > { %2759 = vrot.lane.b32.xlu1 %v7405_v32, %s8849_s26 }
 0xaf0   : > { %v2672_v33 = vpop.permute.xlu0 %2671  ;;  %v2503_v34 = vpop.permute.xlu1 %2502 }
 0xaf1   : > { %6245 = vmatpush3.xpose.msk.msra.mxu1 %vm817_vm3, %v2503_v34  ;;  %6255 = vmatpush3.xpose.msk.msra.mxu0 %vm817_vm3, %v2672_v33 }
 0xaf2   : > { %6264 = vmatprep.subr.mxu0 %v6893_v6  ;;  %6249 = vmatprep.subr.mxu1 %v6893_v6 }
 0xaf4   : > { %v2845_v35 = vpop.permute.xlu0 %2844  ;;  %6247 = vmatmul.mubr.msk.f32.vlgmr.msra.gmra.mrb[22].mxu1 %vm817_vm3, %v7405_v32  ;;  %v2670_v36 = vpop.permute.xlu1 %2669 }
 0xaf5   : > { %6257 = vmatmul.mubr.msk.f32.vlgmr.msra.gmra.mrb[18].mxu0 %vm817_vm3, %v2670_v36  ;;  %6251 = vmatprep.mubr.msk.f32.mxu1 %vm6892_vm0, %v6893_v6 }
 0xaf6   : > { %6265 = vmatpush3.xpose.msk.msra.mxu0 %vm817_vm3, %v2845_v35  ;;  %6266 = vmatprep.mubr.msk.f32.mxu0 %vm6892_vm0, %v6893_v6 }
 0xaf7   : > { %6274 = vmatprep.subr.mxu0 %v6893_v6 }
 0xaf8   : > { %v3018_v21 = vpop.permute.xlu0 %3017  ;;  %v2843_v37 = vpop.permute.xlu1 %2842 }
 0xaf9   : > { %6267 = vmatmul.mubr.msk.f32.vlgmr.msra.gmra.mrb[20].mxu0 %vm817_vm3, %v2843_v37 }
 0xafa   : > { %6275 = vmatpush3.xpose.msk.msra.mxu0 %vm817_vm3, %v3018_v21  ;;  %6276 = vmatprep.mubr.msk.f32.mxu0 %vm6892_vm0, %v6893_v6 }
 0xafb   : > { %6284 = vmatprep.subr.mxu0 %v6893_v6 }
 0xafc   : > { %v3191_v38 = vpop.permute.xlu0 %3190  ;;  %v3016_v39 = vpop.permute.xlu1 %3015 }
 0xafd   : > { %6277 = vmatmul.mubr.msk.f32.vlgmr.msra.gmra.mrb[22].mxu0 %vm817_vm3, %v3016_v39 }
 0xafe   : > { %6285 = vmatpush3.xpose.msk.msra.mxu0 %vm817_vm3, %v3191_v38  ;;  %6286 = vmatprep.mubr.msk.f32.mxu0 %vm6892_vm0, %v6893_v6 }
 0xaff   : > { %6294 = vmatprep.subr.mxu0 %v6893_v6 }
 0xb00   : > { %v3364_v40 = vpop.permute.xlu0 %3363  ;;  %v3189_v41 = vpop.permute.xlu1 %3188 }
 0xb01   : > { %6287 = vmatmul.mubr.msk.f32.vlgmr.msra.gmra.mrb[24].mxu0 %vm817_vm3, %v3189_v41 }
 0xb02   : > { %6295 = vmatpush3.xpose.msk.msra.mxu0 %vm817_vm3, %v3364_v40  ;;  %6296 = vmatprep.mubr.msk.f32.mxu0 %vm6892_vm0, %v6893_v6 }
 0xb03   : > { %6304 = vmatprep.subr.mxu0 %v6893_v6 }
 0xb04   : > { %v3537_v42 = vpop.permute.xlu0 %3536  ;;  %v3362_v43 = vpop.permute.xlu1 %3361 }
 0xb05   : > { %6297 = vmatmul.mubr.msk.f32.vlgmr.msra.gmra.mrb[26].mxu0 %vm817_vm3, %v3362_v43 }
 0xb06   : > { %6305 = vmatpush3.xpose.msk.msra.mxu0 %vm817_vm3, %v3537_v42  ;;  %6306 = vmatprep.mubr.msk.f32.mxu0 %vm6892_vm0, %v6893_v6 }
 0xb07   : > { %6314 = vmatprep.subr.mxu0 %v6893_v6 }
 0xb08   : > { %v3710_v44 = vpop.permute.xlu0 %3709  ;;  %v3535_v45 = vpop.permute.xlu1 %3534 }
 0xb09   : > { %6307 = vmatmul.mubr.msk.f32.vlgmr.msra.gmra.mrb[28].mxu0 %vm817_vm3, %v3535_v45 }
 0xb0a   : > { %6315 = vmatpush3.xpose.msk.msra.mxu0 %vm817_vm3, %v3710_v44  ;;  %6316 = vmatprep.mubr.msk.f32.mxu0 %vm6892_vm0, %v6893_v6 }
 0xb0b   : > { %6359 = vmatprep.subr.bf16.mxu0 %v6891_v3 }
 0xb0c   : > { %v2591_v46 = vpop.permute.xlu0 %2590  ;;  %v3708_v47 = vpop.permute.xlu1 %3707 }
 0xb0d   : > { %6250 = vmatpush3.msra.mxu1 %v2591_v46  ;;  %6317 = vmatmul.mubr.msk.f32.vlgmr.msra.gmra.mrb[30].mxu0 %vm817_vm3, %v3708_v47 }
 0xb0e   : > { %6259 = vmatprep.subr.mxu1 %v6893_v6  ;;  %6332 = vmatprep.mubr.msk.f32.mxu0 %vm6892_vm0, %v6893_v6 }
 0xb10   : > { %v7495_v18 = vpop.permute.xlu1 %2759 }
 0xbc7   : > { %v2574_v48 = vpop.f32.mrb[22].mxu1 }
 0xbc8   : > { %v2578_v49 = vmul.f32 0.5, %v2574_v48  ;;  %v6248_v50 = vpop.f32.mrb[23].mxu1  ;;  %v2743_v51 = vpop.f32.mrb[18].mxu0 }
 0xbc9   : > { %v2747_v52 = vmul.f32 0.5, %v2743_v51  ;;  %v6258_v53 = vpop.f32.mrb[19].mxu0 }
 0xbca   : > { %v2579_v54 = vsel %vm894_vm4, %v2578_v49, -inf }
 0xbcb   : > { %2580 = vmax.xlane.f32.xlu0 %v2579_v54  ;;  %v2748_v55 = vsel %vm894_vm4, %v2747_v52, -inf }
 0xbcc   : > { %2749 = vmax.xlane.f32.xlu1 %v2748_v55  ;;  %v2916_v56 = vpop.f32.mrb[20].mxu0 }
 0xbcd   : > { %v2920_v57 = vmul.f32 0.5, %v2916_v56  ;;  %v6268_v58 = vpop.f32.mrb[21].mxu0 }
 0xbcf   : > { %v2921_v59 = vsel %vm894_vm4, %v2920_v57, -inf }
 0xbd0   : > { %2922 = vmax.xlane.f32.xlu0 %v2921_v59  ;;  %v3089_v60 = vpop.f32.mrb[22].mxu0 }
 0xbd1   : > { %v3093_v61 = vmul.f32 0.5, %v3089_v60  ;;  %v6278_v62 = vpop.f32.mrb[23].mxu0 }
 0xbd3   : > { %v3094_v63 = vsel %vm894_vm4, %v3093_v61, -inf }
 0xbd4   : > { %3095 = vmax.xlane.f32.xlu0 %v3094_v63  ;;  %v3262_v8 = vpop.f32.mrb[24].mxu0 }
 0xbd5   : > { %v3266_v0 = vmul.f32 0.5, %v3262_v8  ;;  %v6288_v1 = vpop.f32.mrb[25].mxu0 }
 0xbd7   : > { %v3267_v2 = vsel %vm894_vm4, %v3266_v0, -inf }
 0xbd8   : > { %3268 = vmax.xlane.f32.xlu1 %v3267_v2  ;;  %v3435_v4 = vpop.f32.mrb[26].mxu0 }
 0xbd9   : > { %v3439_v13 = vmul.f32 0.5, %v3435_v4  ;;  %v6298_v5 = vpop.f32.mrb[27].mxu0 }
 0xbdb   : > { %v3440_v7 = vsel %vm894_vm4, %v3439_v13, -inf }
 0xbdc   : > { %3441 = vmax.xlane.f32.xlu0 %v3440_v7  ;;  %v3608_v9 = vpop.f32.mrb[28].mxu0 }
 0xbdd   : > { %v3612_v10 = vmul.f32 0.5, %v3608_v9  ;;  %v6308_v11 = vpop.f32.mrb[29].mxu0 }
 0xbdf   : > { %v3613_v12 = vsel %vm894_vm4, %v3612_v10, -inf }
 0xbe0   : > { %3614 = vmax.xlane.f32.xlu1 %v3613_v12  ;;  %v3781_v14 = vpop.f32.mrb[30].mxu0 }
 0xbe1   : > { %v3785_v15 = vmul.f32 0.5, %v3781_v14  ;;  %v6318_v16 = vpop.f32.mrb[31].mxu0 }
 0xbe3   : > { %v3786_v17 = vsel %vm894_vm4, %v3785_v15, -inf }
 0xbe4   : > { %3787 = vmax.xlane.f32.xlu0 %v3786_v17 }
 0xbf1   : > { %3105 = vrot.lane.b32.xlu1 %v7405_v32, %s8850_s0 }
 0xbfa   : > { %2932 = vrot.lane.b32.xlu0 %v7405_v32, %s8851_s1  ;;  %s8859_s1 = smov 16  }
 0xc58   : > { %v2581_v19 = vpop.xlane.xlu0 %2580 }
 0xc59   : > { %v2582_v20 = vsub.f32 %v2578_v49, %v2581_v19  ;;  %v2750_v23 = vpop.xlane.xlu1 %2749 }
 0xc5a   : > { %v2751_v24 = vsub.f32 %v2747_v52, %v2750_v23 }
 0xc5b   : > { %v2583_v25 = vmul.f32 1.442695, %v2582_v20 }
 0xc5c   : > { %v2752_v26 = vmul.f32 1.442695, %v2751_v24 }
 0xc5d   : > { %6791 = vpow2.f32 %v2583_v25  ;;  %v2923_v27 = vpop.xlane.xlu0 %2922 }
 0xc5e   : > { %6793 = vpow2.f32 %v2752_v26  ;;  %v2924_v28 = vsub.f32 %v2920_v57, %v2923_v27 }
 0xc60   : > { %v2925_v29 = vmul.f32 1.442695, %v2924_v28 }
 0xc61   : > { %v3096_v30 = vpop.xlane.xlu0 %3095 }
 0xc62   : > { %6795 = vpow2.f32 %v2925_v29  ;;  %v3097_v31 = vsub.f32 %v3093_v61, %v3096_v30 }
 0xc64   : > { %v3098_v33 = vmul.f32 1.442695, %v3097_v31 }
 0xc65   : > { %v3269_v41 = vpop.xlane.xlu1 %3268 }
 0xc66   : > { %6797 = vpow2.f32 %v3098_v33  ;;  %v3270_v42 = vsub.f32 %v3266_v0, %v3269_v41 }
 0xc67   : > { %v6792_v34 = vpop.eup %6791 }
 0xc68   : > { %v6794_v35 = vpop.eup %6793  ;;  %v2585_v36 = vsel %vm894_vm4, %v6792_v34, 0.0  ;;  %v3271_v46 = vmul.f32 1.442695, %v3270_v42 }
 0xc69   : > { %2586 = vadd.xlane.f32.xlu1 %v2585_v36  ;;  %v2754_v21 = vsel %vm894_vm4, %v6794_v35, 0.0  ;;  %v3442_v43 = vpop.xlane.xlu0 %3441 }
 0xc6a   : > { %2755 = vadd.xlane.f32.xlu0 %v2754_v21  ;;  %v3443_v45 = vsub.f32 %v3439_v13, %v3442_v43  ;;  %6799 = vpow2.f32 %v3271_v46  ;;  %v3881_v43 = vld [vmem:[%s8755_s13 + $0x10] sm:$0xff] }
 0xc6c   : > { %v6796_v37 = vpop.eup %6795  ;;  %v3444_v49 = vmul.f32 1.442695, %v3443_v45 }
 0xc6d   : > { %v2927_v38 = vsel %vm894_vm4, %v6796_v37, 0.0  ;;  %v3615_v44 = vpop.xlane.xlu1 %3614 }
 0xc6e   : > { %2928 = vadd.xlane.f32.xlu1 %v2927_v38  ;;  %v3616_v47 = vsub.f32 %v3612_v10, %v3615_v44  ;;  %6801 = vpow2.f32 %v3444_v49  ;;  %v3882_v44 = vld [vmem:[%s8755_s13 + $0x18] sm:$0xff] }
 0xc6f   : > { %v6363_v45 = vpack.c.bf16 %v3882_v44, %v3881_v43  ;;  %v5735_v43 = vld [vmem:[%s8758_s16] ss:$0 sm:$0xff] }
 0xc70   : > { %v7500_v39 = vpop.eup %6797  ;;  %v3617_v50 = vmul.f32 1.442695, %v3616_v47  ;;  %v3997_v44 = vld [vmem:[%s8759_s17 + $0x20] sm:$0xff] }
 0xc71   : > { %v3100_v40 = vsel %vm894_vm4, %v7500_v39, 0.0  ;;  %v3788_v48 = vpop.xlane.xlu0 %3787  ;;  %v3106_v61 = vpop.permute.xlu1 %3105 }
 0xc72   : > { %3101 = vadd.xlane.f32.xlu0 %v3100_v40  ;;  %v3789_v51 = vsub.f32 %v3785_v15, %v3788_v48  ;;  %6803 = vpow2.f32 %v3617_v50  ;;  %v3880_v40 = vld [vmem:[%s8755_s13 + $0x8] sm:$0xff] }
 0xc74   : > { %v3790_v52 = vmul.f32 1.442695, %v3789_v51  ;;  %v6800_v53 = vpop.eup %6799 }
 0xc75   : > { %v3273_v55 = vsel %vm894_vm4, %v6800_v53, 0.0  ;;  %v2933_v62 = vpop.permute.xlu0 %2932 }
 0xc76   : > { %6805 = vpow2.f32 %v3790_v52 }
 0xc78   : > { %v7508_v54 = vpop.eup %6801 }
 0xc79   : > { %v3446_v58 = vsel %vm894_vm4, %v7508_v54, 0.0 }
 0xc7c   : > { %v7511_v56 = vpop.eup %6803 }
 0xc7d   : > { %v3619_v57 = vsel %vm894_vm4, %v7511_v56, 0.0 }
 0xc7f   : > { %3451 = vrot.lane.b32.xlu1 %v7405_v32, %s8852_s29 }
 0xc80   : > { %v7517_v59 = vpop.eup %6805 }
 0xc81   : > { %v3792_v60 = vsel %vm894_vm4, %v7517_v59, 0.0 }
 0xc88   : > { %3278 = vrot.lane.b32.xlu0 %v7405_v32, %s8853_s11 }
 0xca3   : > { %3274 = vadd.xlane.f32.xlu1 %v3273_v55 }
 0xca7   : > { %3620 = vadd.xlane.f32.xlu1 %v3619_v57  ;;  %3447 = vadd.xlane.f32.xlu0 %v3446_v58 }
 0xcab   : > { %3793 = vadd.xlane.f32.xlu1 %v3792_v60 }
 0xcbc   : > { %3797 = vrot.lane.b32.xlu1 %v7405_v32, %s8854_s4 }
 0xcbd   : > { %3624 = vrot.lane.b32.xlu0 %v7405_v32, %s8855_s24 }
 0xcf6   : > { %v2587_v63 = vpop.xlane.xlu1 %2586 }
 0xcf7   : > { %6807 = vrcp.f32 %v2587_v63  ;;  %v2756_v8 = vpop.xlane.xlu0 %2755 }
 0xcf8   : > { %6809 = vrcp.f32 %v2756_v8 }
 0xcfb   : > { %v2929_v0 = vpop.xlane.xlu1 %2928 }
 0xcfc   : > { %6811 = vrcp.f32 %v2929_v0 }
 0xcff   : > { %v3102_v1 = vpop.xlane.xlu0 %3101  ;;  %v3452_v12 = vpop.permute.xlu1 %3451 }
 0xd00   : > { %6813 = vrcp.f32 %v3102_v1 }
 0xd01   : > { %v6808_v2 = vpop.eup %6807 }
 0xd02   : > { %v2589_v4 = vmul.f32 %v6808_v2, %v6792_v34  ;;  %v6810_v13 = vpop.eup %6809 }
 0xd03   : > { %v2758_v32 = vmul.f32 %v6810_v13, %v6794_v35  ;;  %v3279_v11 = vpop.permute.xlu0 %3278 }
 0xd04   : > { %6252 = vmatmul.mubr.msk.f32.vlgmr.msra.gmra.mrb[24].mxu1 %vm894_vm4, %v2589_v4 }
 0xd05   : > { %6260 = vmatpush3.msra.mxu1 %v7495_v18  ;;  %6261 = vmatprep.mubr.msk.f32.mxu1 %vm6892_vm0, %v6893_v6 }
 0xd06   : > { %6269 = vmatprep.subr.mxu1 %v6893_v6  ;;  %v6812_v5 = vpop.eup %6811 }
 0xd07   : > { %v2931_v7 = vmul.f32 %v6812_v5, %v6796_v37  ;;  %v4010_v5 = vld [vmem:[%s8759_s17 + $0x88] sm:$0xff] }
 0xd08   : > { %6262 = vmatmul.mubr.msk.f32.vlgmr.msra.gmra.mrb[26].mxu1 %vm894_vm4, %v2758_v32  ;;  %v3994_v32 = vld [vmem:[%s8759_s17 + $0x8] sm:$0xff] }
 0xd09   : > { %6270 = vmatpush3.msra.mxu1 %v2933_v62  ;;  %6271 = vmatprep.mubr.msk.f32.mxu1 %vm6892_vm0, %v6893_v6 }
 0xd0a   : > { %6279 = vmatprep.subr.mxu1 %v6893_v6  ;;  %v6814_v9 = vpop.eup %6813 }
 0xd0b   : > { %v3104_v10 = vmul.f32 %v6814_v9, %v7500_v39  ;;  %v3879_v39 = vld [vmem:[%s8755_s13] sm:$0xff]  ;;  %v4012_v9 = vld [vmem:[%s8759_s17 + $0x98] sm:$0xff] }
 0xd0c   : > { %6272 = vmatmul.mubr.msk.f32.vlgmr.msra.gmra.mrb[28].mxu1 %vm894_vm4, %v2931_v7  ;;  %v6360_v42 = vpack.c.bf16 %v3880_v40, %v3879_v39  ;;  %v6365_v7 = vpack.c.bf16 %v4010_v5, %v3994_v32 }
 0xd0d   : > { %6280 = vmatpush3.msra.mxu1 %v3106_v61  ;;  %6281 = vmatprep.mubr.msk.f32.mxu1 %vm6892_vm0, %v6893_v6 }
 0xd0e   : > { %6289 = vmatprep.subr.mxu1 %v6893_v6  ;;  %6361 = vmatpush3.bf16.msra.mxu0 %v6360_v42 }
 0xd0f   : > { %6362 = vmatprep.subr.bf16.mxu0 %v6891_v3 }
 0xd10   : > { %6282 = vmatmul.mubr.msk.f32.vlgmr.msra.gmra.mrb[30].mxu1 %vm894_vm4, %v3104_v10  ;;  %v3993_v10 = vld [vmem:[%s8759_s17] sm:$0xff] }
 0xd11   : > { %6290 = vmatpush3.msra.mxu1 %v3279_v11  ;;  %6291 = vmatprep.mubr.msk.f32.mxu1 %vm6892_vm0, %v6893_v6  ;;  %v4009_v11 = vld [vmem:[%s8759_s17 + $0x80] sm:$0xff] }
 0xd12   : > { %6299 = vmatprep.subr.mxu1 %v6893_v6  ;;  %6364 = vmatpush3.bf16.msra.mxu0 %v6363_v45  ;;  %v4013_v45 = vld [vmem:[%s8759_s17 + $0xa0] sm:$0xff] }
 0xd30   : > { %v3275_v14 = vpop.xlane.xlu1 %3274 }
 0xd31   : > { %6815 = vrcp.f32 %v3275_v14  ;;  %v6367_v14 = vpack.c.bf16 %v4009_v11, %v3993_v10  ;;  %v4050_v10 = vld [vmem:[%s8759_s17 + $0x1c8] sm:$0xff]  ;;  %v4036_v11 = vld [vmem:[%s8759_s17 + $0x158] sm:$0xff] }
 0xd34   : > { %v3621_v15 = vpop.xlane.xlu1 %3620  ;;  %v3448_v16 = vpop.xlane.xlu0 %3447 }
 0xd35   : > { %6817 = vrcp.f32 %v3448_v16  ;;  %v4011_v16 = vld [vmem:[%s8759_s17 + $0x90] sm:$0xff] }
 0xd36   : > { %6819 = vrcp.f32 %v3621_v15  ;;  %v3995_v15 = vld [vmem:[%s8759_s17 + $0x10] sm:$0xff] }
 0xd38   : > { %v3794_v17 = vpop.xlane.xlu1 %3793  ;;  %v3625_v25 = vpop.permute.xlu0 %3624 }
 0xd39   : > { %6821 = vrcp.f32 %v3794_v17  ;;  %v6375_v17 = vpack.c.bf16 %v4011_v16, %v3995_v15  ;;  %v4033_v16 = vld [vmem:[%s8759_s17 + $0x140] sm:$0xff] }
 0xd3b   : > { %v6816_v18 = vpop.eup %6815 }
 0xd3c   : > { %v3277_v19 = vmul.f32 %v6816_v18, %v6800_v53  ;;  %v3798_v28 = vpop.permute.xlu1 %3797  ;;  %v4026_v18 = vld [vmem:[%s8759_s17 + $0x108] sm:$0xff] }
 0xd3e   : > { %6292 = vmatmul.mubr.msk.f32.vlgmr.msra.gmra.mrb[32].mxu1 %vm894_vm4, %v3277_v19  ;;  %v4042_v19 = vld [vmem:[%s8759_s17 + $0x188] sm:$0xff] }
 0xd3f   : > { %6300 = vmatpush3.msra.mxu1 %v3452_v12  ;;  %6301 = vmatprep.mubr.msk.f32.mxu1 %vm6892_vm0, %v6893_v6  ;;  %v6818_v20 = vpop.eup %6817 }
 0xd40   : > { %6309 = vmatprep.subr.mxu1 %v6893_v6  ;;  %v3450_v23 = vmul.f32 %v6818_v20, %v7508_v54  ;;  %v6820_v24 = vpop.eup %6819  ;;  %v4028_v20 = vld [vmem:[%s8759_s17 + $0x118] sm:$0xff] }
 0xd41   : > { %v3623_v26 = vmul.f32 %v6820_v24, %v7511_v56  ;;  %v4044_v24 = vld [vmem:[%s8759_s17 + $0x198] sm:$0xff] }
 0xd42   : > { %6302 = vmatmul.mubr.msk.f32.vlgmr.msra.gmra.mrb[34].mxu1 %vm894_vm4, %v3450_v23  ;;  %v6369_v23 = vpack.c.bf16 %v4042_v19, %v4026_v18 }
 0xd43   : > { %6310 = vmatpush3.msra.mxu1 %v3625_v25  ;;  %6311 = vmatprep.mubr.msk.f32.mxu1 %vm6892_vm0, %v6893_v6  ;;  %v6822_v27 = vpop.eup %6821  ;;  %v4025_v25 = vld [vmem:[%s8759_s17 + $0x100] sm:$0xff] }
 0xd44   : > { %6319 = vmatprep.subr.mxu1 %v6893_v6  ;;  %v3796_v29 = vmul.f32 %v6822_v27, %v7517_v59  ;;  %v5732_v59 = vld [vmem:[%s8756_s14] ss:$0 sm:$0xff]  ;;  %v6377_v27 = vpack.c.bf16 %v4044_v24, %v4028_v20  ;;  %v4035_v20 = vld [vmem:[%s8759_s17 + $0x150] sm:$0xff]  ;;  %v4006_v24 = vld [vmem:[%s8759_s17 + $0x68] sm:$0xff] }
 0xd46   : > { %6312 = vmatmul.mubr.msk.f32.vlgmr.msra.gmra.mrb[36].mxu1 %vm894_vm4, %v3623_v26  ;;  %v4041_v26 = vld [vmem:[%s8759_s17 + $0x180] sm:$0xff] }
 0xd47   : > { %6320 = vmatpush3.msra.mxu1 %v3798_v28  ;;  %6321 = vmatprep.mubr.msk.f32.mxu1 %vm6892_vm0, %v6893_v6  ;;  %v6371_v28 = vpack.c.bf16 %v4041_v26, %v4025_v25  ;;  %v4022_v25 = vld [vmem:[%s8759_s17 + $0xe8] sm:$0xff]  ;;  %v4008_v26 = vld [vmem:[%s8759_s17 + $0x78] sm:$0xff] }
 0xd48   : > { %6366 = vmatprep.subr.bf16.mxu1 %v6365_v7  ;;  %v4019_v7 = vld [vmem:[%s8759_s17 + $0xd0] sm:$0xff] }
 0xd4a   : > { %6322 = vmatmul.mubr.msk.f32.vlgmr.msra.gmra.mrb[38].mxu1 %vm894_vm4, %v3796_v29  ;;  %v4027_v29 = vld [vmem:[%s8759_s17 + $0x110] sm:$0xff] }
 0xd4b   : > { %4208 = vmatprep.mubr.f32.mxu1 %v6893_v6  ;;  %6368 = vmatpush1.bf16.msra.mxu1 %v6367_v14 }
 0xd4c   : > { %6370 = vmatprep.subr.bf16.mxu1 %v6369_v23  ;;  %v4051_v23 = vld [vmem:[%s8759_s17 + $0x1d0] sm:$0xff] }
 0xd4f   : > { %6372 = vmatpush1.bf16.msra.mxu1 %v6371_v28 }
 0xdd7   : > { %v2662_v30 = vpop.f32.mrb[24].mxu1 }
 0xdd8   : > { %2666 = vst.msk [vmem:[#allocation3] sm:$0xff] %vm817_vm3, %v2662_v30  ;;  %v6253_v31 = vpop.f32.mrb[25].mxu1  ;;  %v4043_v30 = vld [vmem:[%s8759_s17 + $0x190] sm:$0xff] }
 0xdd9   : > { %v6379_v31 = vpack.c.bf16 %v4043_v30, %v4027_v29  ;;  %v6411_v29 = vpack.c.bf16 %v4051_v23, %v4035_v20  ;;  %v4005_v30 = vld [vmem:[%s8759_s17 + $0x60] sm:$0xff]  ;;  %v4751_v20 = vld [vmem:[%s8761_s19 + $0xb8] sm:$0xff]  ;;  %v4782_v23 = vld [vmem:[%s8761_s19 + $0x1b0] sm:$0xff] }
 0xddb   : > { %v2831_v33 = vpop.f32.mrb[26].mxu1 }
 0xddc   : > { %2836 = vrot.lane.b32.xlu0 %v2831_v33, %s8856_s28  ;;  %v6263_v34 = vpop.f32.mrb[27].mxu1  ;;  %s8860_s28 = smov 20   ;;  %v3998_v33 = vld [vmem:[%s8759_s17 + $0x28] sm:$0xff] }
 0xddd   : > { %v4014_v34 = vld [vmem:[%s8759_s17 + $0xa8] sm:$0xff] }
 0xddf   : > { %v3004_v35 = vpop.f32.mrb[28].mxu1 }
 0xde0   : > { %3009 = vrot.lane.b32.xlu1 %v3004_v35, %s8857_s2  ;;  %v6273_v36 = vpop.f32.mrb[29].mxu1  ;;  %s8861_s2 = smov 24   ;;  %v4000_v35 = vld [vmem:[%s8759_s17 + $0x38] sm:$0xff] }
 0xde1   : > { %v6381_v36 = vpack.c.bf16 %v4014_v34, %v3998_v33  ;;  %v6413_v33 = vpack.c.bf16 %v4022_v25, %v4006_v24  ;;  %v4783_v24 = vld [vmem:[%s8761_s19 + $0x1b8] sm:$0xff] }
 0xde3   : > { %v3177_v21 = vpop.f32.mrb[30].mxu1  ;;  %6382 = vmatprep.subr.bf16.mxu1 %v6381_v36  ;;  %v4023_v36 = vld [vmem:[%s8759_s17 + $0xf0] sm:$0xff] }
 0xde4   : > { %3182 = vrot.lane.b32.xlu0 %v3177_v21, %s8858_s6  ;;  %v6283_v37 = vpop.f32.mrb[31].mxu1  ;;  %s8862_s6 = smov 28   ;;  %v4016_v21 = vld [vmem:[%s8759_s17 + $0xb8] sm:$0xff] }
 0xde5   : > { %v6389_v37 = vpack.c.bf16 %v4016_v21, %v4000_v35  ;;  %v4007_v35 = vld [vmem:[%s8759_s17 + $0x70] sm:$0xff]  ;;  %v4038_v21 = vld [vmem:[%s8759_s17 + $0x168] sm:$0xff] }
 0xe11   : > { %v3350_v38 = vpop.f32.mrb[32].mxu1 }
 0xe12   : > { %3355 = vrot.lane.b32.xlu1 %v3350_v38, %s8859_s1  ;;  %v6293_v41 = vpop.f32.mrb[33].mxu1  ;;  %s712_s1 = sand.u32 1, %s6881_s30  }
 0xe13   : > { %v5734_v41 = vld [vmem:[%s8757_s15] ss:$0 sm:$0xff]  ;;  %s5671_s29 = sshll.u32 %s712_s1, 3  ;;  %s5583_s11 = scalar_lea.sflag [#allocation5], %s712_s1 }
 0xe15   : > { %v3523_v46 = vpop.f32.mrb[34].mxu1 }
 0xe16   : > { %3528 = vrot.lane.b32.xlu0 %v3523_v46, %s8860_s28  ;;  %v6303_v47 = vpop.f32.mrb[35].mxu1 }
 0xe17   : > { %v3999_v47 = vld [vmem:[%s8759_s17 + $0x30] sm:$0xff] }
 0xe19   : > { %v3696_v48 = vpop.f32.mrb[36].mxu1 }
 0xe1a   : > { %3701 = vrot.lane.b32.xlu1 %v3696_v48, %s8861_s2  ;;  %v6313_v49 = vpop.f32.mrb[37].mxu1  ;;  %v4015_v48 = vld [vmem:[%s8759_s17 + $0xb0] sm:$0xff]  ;;  %s5748_s2 = sshll.u32 %s7066_s5, 7  ;;  %s6924_s5 = smov [#allocation4]  }
 0xe1b   : > { %v4030_v49 = vld [vmem:[%s8759_s17 + $0x128] sm:$0xff]  ;;  %s8699_s0 = scalar_lea.hbm %s8765_s23, %s5748_s2 }
 0xe1d   : > { %v3869_v50 = vpop.f32.mrb[38].mxu1 }
 0xe1e   : > { %3874 = vrot.lane.b32.xlu0 %v3869_v50, %s8862_s6  ;;  %v6323_v51 = vpop.f32.mrb[39].mxu1  ;;  %v4046_v50 = vld [vmem:[%s8759_s17 + $0x1a8] sm:$0xff]  ;;  %s714_s6 = scalar_lea.vmem [#allocation4], %s5671_s29  ;;  %s6831_s29 = sshll.u32 %s6924_s5, 4  ;;  %s6832_s29 = int_to_ptr.vmem [resolvable:$false] %s6831_s29 }
 0xe1f   : > { %v4032_v51 = vld [vmem:[%s8759_s17 + $0x138] sm:$0xff]  ;;  %s5596_s27 = sshll.u32 %s714_s6, 4  ;;  %s6833_s24 = scalar_lea.vmem %s6832_s29, 256  ;;  %s8701_s27 = int_to_ptr.vmem [resolvable:$true] %s5596_s27 }
 0xe20   : > { %s6827_s4 = scalar_lea.vmem %s8701_s27, 128  ;;  %p6834_p0 = scmp.lt.s32.totalorder %s8701_s27, %s6832_s29 }
 0xe21   : > { %p6828_p11 = scmp.ne.s32.totalorder %s8701_s27, %s6827_s4  ;;  %p6835_p1 = scmp.lt.s32.totalorder %s6833_s24, %s6827_s4 }
 0xe23   : > { %p6829_p12 = pnand %p6828_p11, %p7083_p5  ;;  %p6836_p2 = por %p6835_p1, %p6834_p0 }
 0xe25   : > { %p6830_p13 = pneg %p6829_p12 }
 0xe27   : > { %p6837_p3 = pnand %p6836_p2, %p6830_p13 }
 0xe4e   : > { %v2837_v52 = vpop.permute.xlu0 %2836 }
 0xe4f   : > { %2839 = vst.msk [vmem:[#allocation3] sm:$0xff] %vm1156_vm5, %v2837_v52  ;;  %v4048_v52 = vld [vmem:[%s8759_s17 + $0x1b8] sm:$0xff] }
 0xe52   : > { %v3010_v53 = vpop.permute.xlu1 %3009 }
 0xe53   : > { %3012 = vst.msk [vmem:[#allocation3] sm:$0xff] %vm1331_vm6, %v3010_v53 }
 0xe56   : > { %v3183_v3 = vpop.permute.xlu0 %3182 }
 0xe57   : > { %3185 = vst.msk [vmem:[#allocation3] sm:$0xff] %vm1506_vm7, %v3183_v3  ;;  %v6383_v3 = vpack.c.bf16 %v4013_v45, %v3997_v44 }
 0xe84   : > { %v3356_v54 = vpop.permute.xlu1 %3355 }
 0xe85   : > { %3358 = vst.msk [vmem:[#allocation3] sm:$0xff] %vm1681_vm8, %v3356_v54  ;;  %v6391_v54 = vpack.c.bf16 %v4015_v48, %v3999_v47  ;;  %v4055_v47 = vld [vmem:[%s8759_s17 + $0x1f0] sm:$0xff]  ;;  %v4744_v48 = vld [vmem:[%s8761_s19 + $0x80] sm:$0xff] }
 0xe88   : > { %v3529_v55 = vpop.permute.xlu0 %3528 }
 0xe89   : > { %3531 = vst.msk [vmem:[#allocation3] sm:$0xff] %vm1856_vm9, %v3529_v55  ;;  %v4029_v55 = vld [vmem:[%s8759_s17 + $0x120] sm:$0xff] }
 0xe8c   : > { %v3702_v56 = vpop.permute.xlu1 %3701 }
 0xe8d   : > { %3704 = vst.msk [vmem:[#allocation3] sm:$0xff] %vm2031_vm10, %v3702_v56  ;;  %v4045_v56 = vld [vmem:[%s8759_s17 + $0x1a0] sm:$0xff] }
 0xe90   : > { %v3875_v57 = vpop.permute.xlu0 %3874 }
 0xe91   : > { %3877 = vst.msk [vmem:[#allocation3] sm:$0xff] %vm2206_vm11, %v3875_v57 }
 0xe98   : > { %v3878_v58 = vld [vmem:[#allocation3] sm:$0xff] }
 0xe99   : > { %6333 = vmatmul.mubr.msk.f32.vlgmr.msra.gmra.mrb[32].mxu0 %vm737_vm1, %v3878_v58  ;;  %v6385_v58 = vpack.c.bf16 %v4046_v50, %v4030_v49  ;;  %v4745_v49 = vld [vmem:[%s8761_s19 + $0x88] sm:$0xff]  ;;  %v4776_v50 = vld [vmem:[%s8761_s19 + $0x180] sm:$0xff] }
 0xe9a   : > { %4279 = vmatprep.mubr.f32.mxu0 %v6893_v6 }
 0xf6c   : > { %v3959_v60 = vpop.f32.mrb[32].mxu0 }
 0xf6d   : > { %v3960_v61 = vadd.f32 %v5732_v59, %v3959_v60  ;;  %v6334_v62 = vpop.f32.mrb[33].mxu0  ;;  %v6393_v59 = vpack.c.bf16 %v4048_v52, %v4032_v51  ;;  %v4031_v60 = vld [vmem:[%s8759_s17 + $0x130] sm:$0xff]  ;;  %v4777_v51 = vld [vmem:[%s8761_s19 + $0x188] sm:$0xff] }
 0xf6e   : > { %v4002_v62 = vld [vmem:[%s8759_s17 + $0x48] sm:$0xff] }
 0xf6f   : > { %v3963_v63 = vadd.f32 %v3960_v61, %v7392_v22  ;;  %v3996_v22 = vld [vmem:[%s8759_s17 + $0x18] sm:$0xff]  ;;  %v4047_v61 = vld [vmem:[%s8759_s17 + $0x1b0] sm:$0xff] }
 0xf70   : > { %v6373_v12 = vpack.c.bf16 %v4012_v9, %v3996_v22  ;;  %v4003_v22 = vld [vmem:[%s8759_s17 + $0x50] sm:$0xff]  ;;  %v4034_v9 = vld [vmem:[%s8759_s17 + $0x148] sm:$0xff] }
 0xf71   : > { %v3964_v8 = vsel %vm737_vm1, %v3963_v63, 0.0  ;;  %v6407_v15 = vpack.c.bf16 %v4019_v7, %v4003_v22  ;;  %v6401_v18 = vpack.c.bf16 %v4050_v10, %v4034_v9  ;;  %v4749_v22 = vld [vmem:[%s8761_s19 + $0xa8] sm:$0xff]  ;;  %v4780_v7 = vld [vmem:[%s8761_s19 + $0x1a0] sm:$0xff] }
 0xf72   : > { %3965 = vadd.xlane.f32.xlu1 %v3964_v8  ;;  %6374 = vmatprep.subr.bf16.mxu0 %v6373_v12  ;;  %v4004_v8 = vld [vmem:[%s8759_s17 + $0x58] sm:$0xff]  ;;  %v4781_v9 = vld [vmem:[%s8761_s19 + $0x1a8] sm:$0xff] }
 0xf73   : > { %6376 = vmatpush1.bf16.msra.mxu0 %v6375_v17  ;;  %v4052_v12 = vld [vmem:[%s8759_s17 + $0x1d8] sm:$0xff]  ;;  %v4049_v17 = vld [vmem:[%s8759_s17 + $0x1c0] sm:$0xff] }
 0xf74   : > { %6378 = vmatprep.subr.bf16.mxu0 %v6377_v27  ;;  %v6409_v19 = vpack.c.bf16 %v4052_v12, %v4036_v11  ;;  %v4024_v27 = vld [vmem:[%s8759_s17 + $0xf8] sm:$0xff]  ;;  %v6403_v28 = vpack.c.bf16 %v4049_v17, %v4033_v16  ;;  %v4732_v12 = vld [vmem:[%s8761_s19 + $0x20] sm:$0xff]  ;;  %v6469_v16 = vpack.c.bf16 %v4781_v9, %v4780_v7 }
 0xf75   : > { %v6421_v34 = vpack.c.bf16 %v4024_v27, %v4008_v26  ;;  %v4764_v17 = vld [vmem:[%s8761_s19 + $0x120] sm:$0xff]  ;;  %v4734_v27 = vld [vmem:[%s8761_s19 + $0x30] sm:$0xff]  ;;  %v4791_v9 = vld [vmem:[%s8761_s19 + $0x1f8] sm:$0xff] }
 0xf77   : > { %6380 = vmatpush1.bf16.msra.mxu0 %v6379_v31  ;;  %v4021_v31 = vld [vmem:[%s8759_s17 + $0xe0] sm:$0xff] }
 0xf78   : > { %6390 = vmatprep.subr.bf16.mxu0 %v6389_v37  ;;  %v4054_v37 = vld [vmem:[%s8759_s17 + $0x1e8] sm:$0xff] }
 0xf79   : > { %v6417_v44 = vpack.c.bf16 %v4054_v37, %v4038_v21  ;;  %v4785_v21 = vld [vmem:[%s8761_s19 + $0x1c8] sm:$0xff] }
 0xfff   : > { %v3966_v0 = vpop.xlane.xlu1 %3965 }
0x1000   : > { %v3967_v1 = vmul.f32 0.03125, %v3966_v0  ;;  %v4020_v0 = vld [vmem:[%s8759_s17 + $0xd8] sm:$0xff] }
0x1001   : > { %v6405_v5 = vpack.c.bf16 %v4020_v0, %v4004_v8 }
0x1002   : > { %v3968_v2 = vsub.f32 %v3963_v63, %v3967_v1  ;;  %v4018_v63 = vld [vmem:[%s8759_s17 + $0xc8] sm:$0xff]  ;;  %v6387_v1 = vpack.c.bf16 %v4045_v56, %v4029_v55  ;;  %v6429_v55 = vpack.c.bf16 %v4745_v49, %v4744_v48  ;;  %v6461_v56 = vpack.c.bf16 %v4777_v51, %v4776_v50  ;;  %v4787_v48 = vld [vmem:[%s8761_s19 + $0x1d8] sm:$0xff]  ;;  %v4738_v51 = vld [vmem:[%s8761_s19 + $0x50] sm:$0xff] }
0x1003   : > { %v6397_v32 = vpack.c.bf16 %v4018_v63, %v4002_v62  ;;  %v4778_v62 = vld [vmem:[%s8761_s19 + $0x190] sm:$0xff]  ;;  %v4779_v63 = vld [vmem:[%s8761_s19 + $0x198] sm:$0xff] }
0x1004   : > { %v3969_v4 = vmul.f32 %v3968_v2, %v3968_v2 }
0x1006   : > { %v3970_v13 = vsel %vm737_vm1, %v3969_v4, 0.0  ;;  %v4001_v4 = vld [vmem:[%s8759_s17 + $0x40] sm:$0xff] }
0x1007   : > { %3971 = vadd.xlane.f32.xlu0 %v3970_v13  ;;  %v4017_v13 = vld [vmem:[%s8759_s17 + $0xc0] sm:$0xff] }
0x1008   : > { %v6399_v14 = vpack.c.bf16 %v4017_v13, %v4001_v4  ;;  %v6465_v4 = vpack.c.bf16 %v4779_v63, %v4778_v62  ;;  %v4762_v13 = vld [vmem:[%s8761_s19 + $0x110] sm:$0xff]  ;;  %v4740_v63 = vld [vmem:[%s8761_s19 + $0x60] sm:$0xff] }
0x1094   : > { %v3972_v38 = vpop.xlane.xlu0 %3971 }
0x1095   : > { %v3973_v39 = vmul.f32 0.03125, %v3972_v38  ;;  %v4040_v38 = vld [vmem:[%s8759_s17 + $0x178] sm:$0xff] }
0x1097   : > { %v3974_v40 = vadd.f32 1e-05, %v3973_v39  ;;  %v4056_v39 = vld [vmem:[%s8759_s17 + $0x1f8] sm:$0xff] }
0x1098   : > { %v6425_v45 = vpack.c.bf16 %v4056_v39, %v4040_v38  ;;  %v4736_v39 = vld [vmem:[%s8761_s19 + $0x40] sm:$0xff] }
0x1099   : > { %6823 = vrsqrt.f32 %v3974_v40  ;;  %v6415_v40 = vpack.c.bf16 %v4021_v31, %v4005_v30  ;;  %v6473_v30 = vpack.c.bf16 %v4783_v24, %v4782_v23  ;;  %v4766_v31 = vld [vmem:[%s8761_s19 + $0x130] sm:$0xff]  ;;  %v4841_v24 = vld [vmem:[%s8761_s19 + $0x388] sm:$0xff] }
0x10a3   : > { %v6824_v42 = vpop.eup %6823 }
0x10a4   : > { %v3976_v46 = vmul.f32 %v6824_v42, %v3968_v2  ;;  %v6395_v2 = vpack.c.bf16 %v4047_v61, %v4031_v60  ;;  %v4037_v42 = vld [vmem:[%s8759_s17 + $0x160] sm:$0xff]  ;;  %v4746_v60 = vld [vmem:[%s8761_s19 + $0x90] sm:$0xff]  ;;  %v4747_v61 = vld [vmem:[%s8761_s19 + $0x98] sm:$0xff] }
0x10a6   : > { %v3984_v53 = vmul.f32 %v5734_v41, %v3976_v46  ;;  %v6423_v41 = vpack.c.bf16 %v4023_v36, %v4007_v35  ;;  %v4039_v46 = vld [vmem:[%s8759_s17 + $0x170] sm:$0xff]  ;;  %v4753_v35 = vld [vmem:[%s8761_s19 + $0xc8] sm:$0xff]  ;;  %v4784_v36 = vld [vmem:[%s8761_s19 + $0x1c0] sm:$0xff] }
0x10a8   : > { %v7691_v57 = vadd.f32 %v5735_v43, %v3984_v53  ;;  %v4053_v43 = vld [vmem:[%s8759_s17 + $0x1e0] sm:$0xff]  ;;  %v6427_v53 = vpack.c.bf16 %v4055_v47, %v4039_v46  ;;  %v4755_v46 = vld [vmem:[%s8761_s19 + $0xd8] sm:$0xff]  ;;  %v4786_v47 = vld [vmem:[%s8761_s19 + $0x1d0] sm:$0xff] }
0x10a9   : > { %v6419_v52 = vpack.c.bf16 %v4053_v43, %v4037_v42  ;;  %v6477_v42 = vpack.c.bf16 %v4785_v21, %v4784_v36  ;;  %v4768_v43 = vld [vmem:[%s8761_s19 + $0x140] sm:$0xff] }
0x10aa   : > { %5736 = vmatmul.mubr.msk.f32.vlgmr.msra.gmra.mrb[40].mxu1 %vm737_vm1, %v7691_v57  ;;  %5737 = vmatmul.mubr.msk.f32.vlgmr.msra.gmra.mrb[34].mxu0 %vm737_vm1, %v7691_v57 }
0x10ab   : > { %6384 = vmatpush1.bf16.msra.mxu1 %v6383_v3  ;;  %6392 = vmatpush1.bf16.msra.mxu0 %v6391_v54  ;;  %v4728_v3 = vld [vmem:[%s8761_s19] sm:$0xff]  ;;  %v4729_v54 = vld [vmem:[%s8761_s19 + $0x8] sm:$0xff] }
0x10ac   : > { %6386 = vmatprep.subr.bf16.mxu1 %v6385_v58  ;;  %6394 = vmatprep.subr.bf16.mxu0 %v6393_v59  ;;  %v4760_v58 = vld [vmem:[%s8761_s19 + $0x100] sm:$0xff]  ;;  %v4761_v59 = vld [vmem:[%s8761_s19 + $0x108] sm:$0xff]  ;;  %v6431_v8 = vpack.c.bf16 %v4729_v54, %v4728_v3  ;;  %v6481_v3 = vpack.c.bf16 %v4787_v48, %v4786_v47  ;;  %v4770_v54 = vld [vmem:[%s8761_s19 + $0x150] sm:$0xff] }
0x10ad   : > { %4350 = vmatprep.mubr.f32.mxu1 %v6893_v6  ;;  %4421 = vmatprep.mubr.f32.mxu0 %v6893_v6  ;;  %v6463_v0 = vpack.c.bf16 %v4761_v59, %v4760_v58  ;;  %v4757_v58 = vld [vmem:[%s8761_s19 + $0xe8] sm:$0xff]  ;;  %v4788_v59 = vld [vmem:[%s8761_s19 + $0x1e0] sm:$0xff] }
0x10ae   : > { %v4824_v48 = vld [vmem:[%s8761_s19 + $0x300] sm:$0xff] }
0x10af   : > { %6388 = vmatpush1.bf16.msra.mxu1 %v6387_v1  ;;  %6396 = vmatpush1.bf16.msra.mxu0 %v6395_v2  ;;  %v4731_v1 = vld [vmem:[%s8761_s19 + $0x18] sm:$0xff]  ;;  %v6433_v2 = vpack.c.bf16 %v4747_v61, %v4746_v60  ;;  %v4789_v60 = vld [vmem:[%s8761_s19 + $0x1e8] sm:$0xff] }
0x10b0   : > { %6398 = vmatprep.subr.bf16.mxu1 %v6397_v32  ;;  %6406 = vmatprep.subr.bf16.mxu0 %v6405_v5  ;;  %v4763_v32 = vld [vmem:[%s8761_s19 + $0x118] sm:$0xff]  ;;  %v4748_v5 = vld [vmem:[%s8761_s19 + $0xa0] sm:$0xff] }
0x10b1   : > { %v6467_v11 = vpack.c.bf16 %v4763_v32, %v4762_v13  ;;  %v4758_v32 = vld [vmem:[%s8761_s19 + $0xf0] sm:$0xff] }
0x10b2   : > { %5738 = vmatmul.mubr.msk.f32.vlgmr.msra.gmra.mrb[42].mxu1 %vm737_vm1, %v7691_v57  ;;  %5739 = vmatmul.mubr.msk.f32.vlgmr.msra.gmra.mrb[36].mxu0 %vm737_vm1, %v7691_v57 }
0x10b3   : > { %6400 = vmatpush1.bf16.msra.mxu1 %v6399_v14  ;;  %6408 = vmatpush1.bf16.msra.mxu0 %v6407_v15  ;;  %v4733_v14 = vld [vmem:[%s8761_s19 + $0x28] sm:$0xff]  ;;  %v6437_v15 = vpack.c.bf16 %v4749_v22, %v4748_v5  ;;  %v4759_v5 = vld [vmem:[%s8761_s19 + $0xf8] sm:$0xff]  ;;  %v4790_v22 = vld [vmem:[%s8761_s19 + $0x1f0] sm:$0xff] }
0x10b4   : > { %6402 = vmatprep.subr.bf16.mxu1 %v6401_v18  ;;  %6410 = vmatprep.subr.bf16.mxu0 %v6409_v19  ;;  %v4765_v18 = vld [vmem:[%s8761_s19 + $0x128] sm:$0xff]  ;;  %v4750_v19 = vld [vmem:[%s8761_s19 + $0xb0] sm:$0xff]  ;;  %v6439_v25 = vpack.c.bf16 %v4733_v14, %v4732_v12  ;;  %v6457_v7 = vpack.c.bf16 %v4759_v5, %v4758_v32  ;;  %v6489_v12 = vpack.c.bf16 %v4791_v9, %v4790_v22 }
0x10b5   : > { %4492 = vmatprep.mubr.f32.mxu1 %v6893_v6  ;;  %4563 = vmatprep.mubr.f32.mxu0 %v6893_v6  ;;  %v6471_v26 = vpack.c.bf16 %v4765_v18, %v4764_v17  ;;  %v4808_v18 = vld [vmem:[%s8761_s19 + $0x280] sm:$0xff]  ;;  %v4813_v22 = vld [vmem:[%s8761_s19 + $0x2a8] sm:$0xff] }
0x10b6   : > { %v4845_v9 = vld [vmem:[%s8761_s19 + $0x3a8] sm:$0xff] }
0x10b7   : > { %6404 = vmatpush1.bf16.msra.mxu1 %v6403_v28  ;;  %6412 = vmatpush1.bf16.msra.mxu0 %v6411_v29  ;;  %v4735_v28 = vld [vmem:[%s8761_s19 + $0x38] sm:$0xff]  ;;  %v6441_v29 = vpack.c.bf16 %v4751_v20, %v4750_v19  ;;  %v4809_v19 = vld [vmem:[%s8761_s19 + $0x288] sm:$0xff]  ;;  %v4840_v20 = vld [vmem:[%s8761_s19 + $0x380] sm:$0xff] }
0x10b8   : > { %6414 = vmatprep.subr.bf16.mxu1 %v6413_v33  ;;  %6422 = vmatprep.subr.bf16.mxu0 %v6421_v34  ;;  %v4767_v33 = vld [vmem:[%s8761_s19 + $0x138] sm:$0xff]  ;;  %v4752_v34 = vld [vmem:[%s8761_s19 + $0xc0] sm:$0xff]  ;;  %v6443_v37 = vpack.c.bf16 %v4735_v28, %v4734_v27  ;;  %v6493_v23 = vpack.c.bf16 %v4809_v19, %v4808_v18 }
0x10b9   : > { %v6475_v38 = vpack.c.bf16 %v4767_v33, %v4766_v31 }
0x10ba   : > { %5740 = vmatmul.mubr.msk.f32.vlgmr.msra.gmra.mrb[44].mxu1 %vm737_vm1, %v7691_v57  ;;  %5741 = vmatmul.mubr.msk.f32.vlgmr.msra.gmra.mrb[38].mxu0 %vm737_vm1, %v7691_v57 }
0x10bb   : > { %6416 = vmatpush1.bf16.msra.mxu1 %v6415_v40  ;;  %6424 = vmatpush1.bf16.msra.mxu0 %v6423_v41  ;;  %v4737_v40 = vld [vmem:[%s8761_s19 + $0x48] sm:$0xff]  ;;  %v6445_v41 = vpack.c.bf16 %v4753_v35, %v4752_v34  ;;  %v8039_v34 = vld [vmem:[%s8760_s18] sm:$0xff] }
0x10bc   : > { %6418 = vmatprep.subr.bf16.mxu1 %v6417_v44  ;;  %6426 = vmatprep.subr.bf16.mxu0 %v6425_v45  ;;  %v4769_v44 = vld [vmem:[%s8761_s19 + $0x148] sm:$0xff]  ;;  %v4754_v45 = vld [vmem:[%s8761_s19 + $0xd0] sm:$0xff]  ;;  %v6447_v49 = vpack.c.bf16 %v4737_v40, %v4736_v39 }
0x10bd   : > { %4634 = vmatprep.mubr.f32.mxu1 %v6893_v6  ;;  %4705 = vmatprep.mubr.f32.mxu0 %v6893_v6  ;;  %v4730_v6 = vld [vmem:[%s8761_s19 + $0x10] sm:$0xff]  ;;  %v6479_v50 = vpack.c.bf16 %v4769_v44, %v4768_v43  ;;  %v4793_v43 = vld [vmem:[%s8761_s19 + $0x208] sm:$0xff] }
0x10be   : > { %v6435_v10 = vpack.c.bf16 %v4731_v1, %v4730_v6  ;;  %v4741_v6 = vld [vmem:[%s8761_s19 + $0x68] sm:$0xff]  ;;  %v4772_v1 = vld [vmem:[%s8761_s19 + $0x160] sm:$0xff] }
0x10bf   : > { %6420 = vmatpush1.bf16.msra.mxu1 %v6419_v52  ;;  %6428 = vmatpush1.bf16.msra.mxu0 %v6427_v53  ;;  %v4739_v52 = vld [vmem:[%s8761_s19 + $0x58] sm:$0xff]  ;;  %v6449_v53 = vpack.c.bf16 %v4755_v46, %v4754_v45 }
0x10c0   : > { %6430 = vmatprep.subr.bf16.mxu1 %v6429_v55  ;;  %6462 = vmatprep.subr.bf16.mxu0 %v6461_v56  ;;  %v4771_v55 = vld [vmem:[%s8761_s19 + $0x158] sm:$0xff]  ;;  %v4756_v56 = vld [vmem:[%s8761_s19 + $0xe0] sm:$0xff]  ;;  %v6451_v61 = vpack.c.bf16 %v4739_v52, %v4738_v51 }
0x10c1   : > { %v6483_v62 = vpack.c.bf16 %v4771_v55, %v4770_v54  ;;  %v4811_v54 = vld [vmem:[%s8761_s19 + $0x298] sm:$0xff]  ;;  %v4842_v55 = vld [vmem:[%s8761_s19 + $0x390] sm:$0xff] }
0x10c2   : > { %5742 = vmatmul.mubr.msk.f32.vlgmr.msra.gmra.mrb[46].mxu1 %vm737_vm1, %v7691_v57  ;;  %5743 = vmatmul.mubr.msk.f32.vlgmr.msra.gmra.mrb[40].mxu0 %vm737_vm1, %v7691_v57 }
0x10c3   : > { %6432 = vmatpush3.bf16.msra.mxu1 %v6431_v8  ;;  %6464 = vmatpush3.bf16.msra.mxu0 %v6463_v0  ;;  %v6453_v8 = vpack.c.bf16 %v4757_v58, %v4756_v56  ;;  %v6485_v0 = vpack.c.bf16 %v4789_v60, %v4788_v59  ;;  %v4843_v56 = vld [vmem:[%s8761_s19 + $0x398] sm:$0xff] }
0x10c4   : > { %6434 = vmatprep.subr.bf16.mxu1 %v6433_v2  ;;  %6466 = vmatprep.subr.bf16.mxu0 %v6465_v4  ;;  %v4773_v2 = vld [vmem:[%s8761_s19 + $0x168] sm:$0xff]  ;;  %v6455_v4 = vpack.c.bf16 %v4741_v6, %v4740_v63  ;;  %v4795_v63 = vld [vmem:[%s8761_s19 + $0x218] sm:$0xff] }
0x10c5   : > { %v6487_v13 = vpack.c.bf16 %v4773_v2, %v4772_v1  ;;  %v6529_v1 = vpack.c.bf16 %v4843_v56, %v4842_v55  ;;  %v4826_v2 = vld [vmem:[%s8761_s19 + $0x310] sm:$0xff] }
0x10c7   : > { %6436 = vmatpush3.bf16.msra.mxu1 %v6435_v10  ;;  %6468 = vmatpush3.bf16.msra.mxu0 %v6467_v11  ;;  %v4742_v10 = vld [vmem:[%s8761_s19 + $0x70] sm:$0xff]  ;;  %v4743_v11 = vld [vmem:[%s8761_s19 + $0x78] sm:$0xff] }
0x10c8   : > { %6438 = vmatprep.subr.bf16.mxu1 %v6437_v15  ;;  %6470 = vmatprep.subr.bf16.mxu0 %v6469_v16  ;;  %v6459_v14 = vpack.c.bf16 %v4743_v11, %v4742_v10  ;;  %v4774_v15 = vld [vmem:[%s8761_s19 + $0x170] sm:$0xff]  ;;  %v4775_v16 = vld [vmem:[%s8761_s19 + $0x178] sm:$0xff] }
0x10c9   : > { %v6491_v17 = vpack.c.bf16 %v4775_v16, %v4774_v15  ;;  %v4796_v15 = vld [vmem:[%s8761_s19 + $0x220] sm:$0xff]  ;;  %v4797_v16 = vld [vmem:[%s8761_s19 + $0x228] sm:$0xff] }
0x10cb   : > { %6440 = vmatpush3.bf16.msra.mxu1 %v6439_v25  ;;  %6472 = vmatpush3.bf16.msra.mxu0 %v6471_v26  ;;  %v6525_v25 = vpack.c.bf16 %v4841_v24, %v4840_v20  ;;  %v4061_v26 = vlaneseq  ;;  %v4829_v24 = vld [vmem:[%s8761_s19 + $0x328] sm:$0xff] }
0x10cc   : > { %6442 = vmatprep.subr.bf16.mxu1 %v6441_v29  ;;  %6474 = vmatprep.subr.bf16.mxu0 %v6473_v30  ;;  %v8027_v29 = vld [vmem:[%s8760_s18 + $0x8] sm:$0xff] }
0x10cd   : > { %v8021_v27 = vshrl.u32 %v4061_v26, 7 }
0x10cf   : > { %6444 = vmatpush3.bf16.msra.mxu1 %v6443_v37  ;;  %6476 = vmatpush3.bf16.msra.mxu0 %v6475_v38  ;;  %v4087_v28 = vsub.s32 6, %v8021_v27  ;;  %v4063_v31 = vsub.s32 0, %v8021_v27  ;;  %v4071_v33 = vsub.s32 2, %v8021_v27  ;;  %v4067_v35 = vsub.s32 1, %v8021_v27 }
0x10d0   : > { %6446 = vmatprep.subr.bf16.mxu1 %v6445_v41  ;;  %6478 = vmatprep.subr.bf16.mxu0 %v6477_v42  ;;  %v4075_v36 = vsub.s32 3, %v8021_v27  ;;  %v4792_v42 = vld [vmem:[%s8761_s19 + $0x200] sm:$0xff] }
0x10d1   : > { %v8032_v30 = vrot.slane %v8027_v29, %v4087_v28  ;;  %v4064_v21 = vrot.slane %v8039_v34, %v4063_v31  ;;  %v4072_v37 = vrot.slane %v8039_v34, %v4071_v33  ;;  %v4068_v38 = vrot.slane %v8039_v34, %v4067_v35 }
0x10d2   : > { %v4076_v39 = vrot.slane %v8039_v34, %v4075_v36  ;;  %v6495_v60 = vpack.c.bf16 %v4793_v43, %v4792_v42  ;;  %v4096_v43 = vrot.slane %v8027_v29, %v4063_v31 }
0x10d3   : > { %6448 = vmatpush3.bf16.msra.mxu1 %v6447_v49  ;;  %6480 = vmatpush3.bf16.msra.mxu0 %v6479_v50  ;;  %v4825_v49 = vld [vmem:[%s8761_s19 + $0x308] sm:$0xff]  ;;  %v4810_v50 = vld [vmem:[%s8761_s19 + $0x290] sm:$0xff] }
0x10d4   : > { %6450 = vmatprep.subr.bf16.mxu1 %v6449_v53  ;;  %6482 = vmatprep.subr.bf16.mxu0 %v6481_v3  ;;  %v4083_v53 = vsub.s32 5, %v8021_v27  ;;  %v4091_v3 = vsub.s32 7, %v8021_v27  ;;  %v6497_v6 = vpack.c.bf16 %v4811_v54, %v4810_v50  ;;  %v4831_v50 = vld [vmem:[%s8761_s19 + $0x338] sm:$0xff]  ;;  %v4849_v54 = vld [vmem:[%s8761_s19 + $0x3c8] sm:$0xff] }
0x10d6   : > { %v4084_v32 = vrot.slane %v8039_v34, %v4083_v53  ;;  %v4092_v5 = vrot.slane %v8039_v34, %v4091_v3 }
0x10d7   : > { %6452 = vmatpush3.bf16.msra.mxu1 %v6451_v61  ;;  %6484 = vmatpush3.bf16.msra.mxu0 %v6483_v62  ;;  %v6527_v61 = vpack.c.bf16 %v4825_v49, %v4824_v48  ;;  %v4794_v62 = vld [vmem:[%s8761_s19 + $0x210] sm:$0xff]  ;;  %v4104_v48 = vrot.slane %v8027_v29, %v4071_v33  ;;  %v4848_v33 = vld [vmem:[%s8761_s19 + $0x3c0] sm:$0xff] }
0x10d8   : > { %6454 = vmatprep.subr.bf16.mxu1 %v6453_v8  ;;  %6486 = vmatprep.subr.bf16.mxu0 %v6485_v0 }
0x10db   : > { %6456 = vmatpush3.bf16.msra.mxu1 %v6455_v4  ;;  %6488 = vmatpush3.bf16.msra.mxu0 %v6487_v13  ;;  %v4827_v4 = vld [vmem:[%s8761_s19 + $0x318] sm:$0xff]  ;;  %v4812_v13 = vld [vmem:[%s8761_s19 + $0x2a0] sm:$0xff] }
0x10dc   : > { %6458 = vmatprep.subr.bf16.mxu1 %v6457_v7  ;;  %6490 = vmatprep.subr.bf16.mxu0 %v6489_v12  ;;  %v4844_v7 = vld [vmem:[%s8761_s19 + $0x3a0] sm:$0xff]  ;;  %v6499_v12 = vpack.c.bf16 %v4795_v63, %v4794_v62  ;;  %v6501_v19 = vpack.c.bf16 %v4813_v22, %v4812_v13  ;;  %v4801_v62 = vld [vmem:[%s8761_s19 + $0x248] sm:$0xff]  ;;  %v4818_v13 = vld [vmem:[%s8761_s19 + $0x2d0] sm:$0xff] }
0x10dd   : > { %v6533_v20 = vpack.c.bf16 %v4845_v9, %v4844_v7  ;;  %v4851_v22 = vld [vmem:[%s8761_s19 + $0x3d8] sm:$0xff]  ;;  %v4079_v7 = vsub.s32 4, %v8021_v27  ;;  %v4952_v27 = vld [vmem:[%s8761_s19 + $0x700] sm:$0xff] }
0x10df   : > { %6460 = vmatpush3.bf16.msra.mxu1 %v6459_v14  ;;  %6492 = vmatpush3.bf16.msra.mxu0 %v6491_v17  ;;  %v6531_v14 = vpack.c.bf16 %v4827_v4, %v4826_v2  ;;  %v4832_v2 = vld [vmem:[%s8761_s19 + $0x340] sm:$0xff]  ;;  %v4833_v4 = vld [vmem:[%s8761_s19 + $0x348] sm:$0xff] }
0x10e0   : > { %6494 = vmatprep.subr.bf16.mxu1 %v6493_v23  ;;  %6526 = vmatprep.subr.bf16.mxu0 %v6525_v25  ;;  %v4828_v23 = vld [vmem:[%s8761_s19 + $0x320] sm:$0xff]  ;;  %v4814_v25 = vld [vmem:[%s8761_s19 + $0x2b0] sm:$0xff] }
0x117d   : > { %v4210_v40 = vpop.f32.mrb[40].mxu1  ;;  %v4281_v41 = vpop.f32.mrb[34].mxu0 }
0x117e   : > { %v4211_v44 = vadd.f32 %v4210_v40, %v4064_v21  ;;  %v4282_v45 = vadd.f32 %v4281_v41, %v4072_v37  ;;  %v4212_v46 = vpop.f32.mrb[41].mxu1  ;;  %v4283_v47 = vpop.f32.mrb[35].mxu0  ;;  %v4815_v37 = vld [vmem:[%s8761_s19 + $0x2b8] sm:$0xff]  ;;  %v6503_v40 = vpack.c.bf16 %v4797_v16, %v4796_v15  ;;  %v4834_v16 = vld [vmem:[%s8761_s19 + $0x350] sm:$0xff] }
0x117f   : > { %v4213_v51 = vadd.f32 %v4212_v46, %v4068_v38  ;;  %v4284_v52 = vadd.f32 %v4283_v47, %v4076_v39  ;;  %v4846_v38 = vld [vmem:[%s8761_s19 + $0x3b0] sm:$0xff]  ;;  %v4847_v39 = vld [vmem:[%s8761_s19 + $0x3b8] sm:$0xff]  ;;  %v6505_v31 = vpack.c.bf16 %v4815_v37, %v4814_v25  ;;  %v4852_v25 = vld [vmem:[%s8761_s19 + $0x3e0] sm:$0xff] }
0x1180   : > { %v4712_v8 = vmax.f32 %v4211_v44, 0.0  ;;  %v4714_v0 = vmax.f32 %v4282_v45, 0.0  ;;  %v6535_v44 = vpack.c.bf16 %v4829_v24, %v4828_v23  ;;  %v4798_v45 = vld [vmem:[%s8761_s19 + $0x230] sm:$0xff]  ;;  %v4799_v46 = vld [vmem:[%s8761_s19 + $0x238] sm:$0xff]  ;;  %v6537_v49 = vpack.c.bf16 %v4847_v39, %v4846_v38  ;;  %v4820_v23 = vld [vmem:[%s8761_s19 + $0x2e0] sm:$0xff] }
0x1181   : > { %v4713_v58 = vmax.f32 %v4213_v51, 0.0  ;;  %v4715_v59 = vmax.f32 %v4284_v52, 0.0  ;;  %v4830_v47 = vld [vmem:[%s8761_s19 + $0x330] sm:$0xff]  ;;  %v4816_v51 = vld [vmem:[%s8761_s19 + $0x2c0] sm:$0xff]  ;;  %v4817_v52 = vld [vmem:[%s8761_s19 + $0x2c8] sm:$0xff] }
0x1182   : > { %v4803_v15 = vld [vmem:[%s8761_s19 + $0x258] sm:$0xff]  ;;  %v4821_v24 = vld [vmem:[%s8761_s19 + $0x2e8] sm:$0xff] }
0x1183   : > { %5055 = vmatprep.mubr.f32.mxu1 %v4713_v58  ;;  %5125 = vmatprep.mubr.f32.mxu0 %v4715_v59  ;;  %v6507_v58 = vpack.c.bf16 %v4799_v46, %v4798_v45  ;;  %v6539_v59 = vpack.c.bf16 %v4831_v50, %v4830_v47  ;;  %v4854_v50 = vld [vmem:[%s8761_s19 + $0x3f0] sm:$0xff] }
0x1184   : > { %5056 = vmatmul.mubr.f32.vlgmr.msra.gmra.mrb[48].mxu1 %v4712_v8  ;;  %5126 = vmatmul.mubr.f32.vlgmr.msra.gmra.mrb[42].mxu0 %v4714_v0 }
0x1185   : > { %v8111_v10 = vpop.f32.mrb[42].mxu1  ;;  %v8113_v11 = vpop.f32.mrb[36].mxu0  ;;  %6496 = vmatpush3.bf16.msra.mxu1 %v6495_v60  ;;  %6528 = vmatpush3.bf16.msra.mxu0 %v6527_v61  ;;  %v6509_v60 = vpack.c.bf16 %v4817_v52, %v4816_v51  ;;  %v4800_v61 = vld [vmem:[%s8761_s19 + $0x240] sm:$0xff]  ;;  %v4855_v51 = vld [vmem:[%s8761_s19 + $0x3f8] sm:$0xff]  ;;  %v4080_v52 = vrot.slane %v8039_v34, %v4079_v7 }
0x1186   : > { %v4354_v17 = vpop.f32.mrb[43].mxu1  ;;  %v4425_v18 = vpop.f32.mrb[37].mxu0  ;;  %6498 = vmatprep.subr.bf16.mxu1 %v6497_v6  ;;  %6530 = vmatprep.subr.bf16.mxu0 %v6529_v1  ;;  %v6541_v1 = vpack.c.bf16 %v4849_v54, %v4848_v33  ;;  %v6511_v9 = vpack.c.bf16 %v4801_v62, %v4800_v61  ;;  %v6553_v61 = vpack.c.bf16 %v4855_v51, %v4854_v50  ;;  %v4839_v62 = vld [vmem:[%s8761_s19 + $0x378] sm:$0xff]  ;;  %v4860_v50 = vld [vmem:[%s8761_s19 + $0x420] sm:$0xff]  ;;  %v4861_v51 = vld [vmem:[%s8761_s19 + $0x428] sm:$0xff] }
0x1187   : > { %v4355_v26 = vadd.f32 %v4354_v17, %v4084_v32  ;;  %v4426_v21 = vadd.f32 %v4425_v18, %v4092_v5  ;;  %v4819_v32 = vld [vmem:[%s8761_s19 + $0x2d8] sm:$0xff]  ;;  %v4850_v5 = vld [vmem:[%s8761_s19 + $0x3d0] sm:$0xff]  ;;  %v4112_v17 = vrot.slane %v8027_v29, %v4079_v7  ;;  %v4353_v7 = vadd.f32 %v8111_v10, %v4080_v52  ;;  %v4889_v10 = vld [vmem:[%s8761_s19 + $0x508] sm:$0xff] }
0x1188   : > { %v6513_v18 = vpack.c.bf16 %v4819_v32, %v4818_v13  ;;  %v4108_v13 = vrot.slane %v8027_v29, %v4075_v36  ;;  %v4857_v36 = vld [vmem:[%s8761_s19 + $0x408] sm:$0xff]  ;;  %v4892_v52 = vld [vmem:[%s8761_s19 + $0x520] sm:$0xff] }
0x1189   : > { %v4717_v41 = vmax.f32 %v4355_v26, 0.0  ;;  %v4719_v42 = vmax.f32 %v4426_v21, 0.0  ;;  %6500 = vmatpush3.bf16.msra.mxu1 %v6499_v12  ;;  %6532 = vmatpush3.bf16.msra.mxu0 %v6531_v14  ;;  %v6543_v12 = vpack.c.bf16 %v4833_v4, %v4832_v2  ;;  %v4802_v14 = vld [vmem:[%s8761_s19 + $0x250] sm:$0xff]  ;;  %v4853_v26 = vld [vmem:[%s8761_s19 + $0x3e8] sm:$0xff] }
0x118a   : > { %6502 = vmatprep.subr.bf16.mxu1 %v6501_v19  ;;  %6534 = vmatprep.subr.bf16.mxu0 %v6533_v20  ;;  %v6545_v19 = vpack.c.bf16 %v4851_v22, %v4850_v5  ;;  %v4835_v20 = vld [vmem:[%s8761_s19 + $0x358] sm:$0xff]  ;;  %v6515_v38 = vpack.c.bf16 %v4803_v15, %v4802_v14  ;;  %v6549_v47 = vpack.c.bf16 %v4853_v26, %v4852_v25  ;;  %v4873_v2 = vld [vmem:[%s8761_s19 + $0x488] sm:$0xff]  ;;  %v4888_v15 = vld [vmem:[%s8761_s19 + $0x500] sm:$0xff] }
0x118b   : > { %5195 = vmatprep.mubr.f32.mxu1 %v4717_v41  ;;  %5265 = vmatprep.mubr.f32.mxu0 %v4719_v42  ;;  %v6547_v39 = vpack.c.bf16 %v4835_v20, %v4834_v16  ;;  %v4804_v41 = vld [vmem:[%s8761_s19 + $0x260] sm:$0xff]  ;;  %v4805_v42 = vld [vmem:[%s8761_s19 + $0x268] sm:$0xff]  ;;  %v4716_v20 = vmax.f32 %v4353_v7, 0.0  ;;  %v4859_v25 = vld [vmem:[%s8761_s19 + $0x418] sm:$0xff] }
0x118c   : > { %v6519_v33 = vpack.c.bf16 %v4805_v42, %v4804_v41  ;;  %v4905_v4 = vld [vmem:[%s8761_s19 + $0x588] sm:$0xff]  ;;  %v4890_v26 = vld [vmem:[%s8761_s19 + $0x510] sm:$0xff] }
0x118d   : > { %v4494_v55 = vpop.f32.mrb[44].mxu1  ;;  %v4565_v56 = vpop.f32.mrb[38].mxu0  ;;  %6504 = vmatpush3.bf16.msra.mxu1 %v6503_v40  ;;  %6536 = vmatpush3.bf16.msra.mxu0 %v6535_v44  ;;  %v6517_v40 = vpack.c.bf16 %v4821_v24, %v4820_v23  ;;  %v4858_v24 = vld [vmem:[%s8761_s19 + $0x410] sm:$0xff]  ;;  %v4877_v41 = vld [vmem:[%s8761_s19 + $0x4a8] sm:$0xff] }
0x118e   : > { %v8175_v63 = vadd.f32 %v4494_v55, %v4096_v43  ;;  %v8177_v8 = vadd.f32 %v4565_v56, %v4104_v48  ;;  %v8179_v0 = vpop.f32.mrb[45].mxu1  ;;  %v8181_v6 = vpop.f32.mrb[39].mxu0  ;;  %6506 = vmatprep.subr.bf16.mxu1 %v6505_v31  ;;  %6538 = vmatprep.subr.bf16.mxu0 %v6537_v49  ;;  %v4836_v48 = vld [vmem:[%s8761_s19 + $0x360] sm:$0xff]  ;;  %v4837_v31 = vld [vmem:[%s8761_s19 + $0x368] sm:$0xff]  ;;  %v4823_v49 = vld [vmem:[%s8761_s19 + $0x2f8] sm:$0xff] }
0x118f   : > { %v6551_v54 = vpack.c.bf16 %v4837_v31, %v4836_v48  ;;  %v4806_v55 = vld [vmem:[%s8761_s19 + $0x270] sm:$0xff]  ;;  %v4807_v56 = vld [vmem:[%s8761_s19 + $0x278] sm:$0xff]  ;;  %v4568_v16 = vadd.f32 %v8181_v6, %v4108_v13  ;;  %v6591_v6 = vpack.c.bf16 %v4889_v10, %v4888_v15  ;;  %v4909_v48 = vld [vmem:[%s8761_s19 + $0x5a8] sm:$0xff]  ;;  %v6563_v31 = vpack.c.bf16 %v4859_v25, %v4858_v24 }
0x1190   : > { %v6523_v32 = vpack.c.bf16 %v4807_v56, %v4806_v55  ;;  %v4878_v55 = vld [vmem:[%s8761_s19 + $0x4b0] sm:$0xff]  ;;  %v4879_v56 = vld [vmem:[%s8761_s19 + $0x4b8] sm:$0xff]  ;;  %v4880_v13 = vld [vmem:[%s8761_s19 + $0x4c0] sm:$0xff] }
0x1191   : > { %6508 = vmatpush3.bf16.msra.mxu1 %v6507_v58  ;;  %6540 = vmatpush3.bf16.msra.mxu0 %v6539_v59  ;;  %v4838_v58 = vld [vmem:[%s8761_s19 + $0x370] sm:$0xff]  ;;  %v4088_v59 = vrot.slane %v8039_v34, %v4087_v28  ;;  %v4100_v28 = vrot.slane %v8027_v29, %v4067_v35  ;;  %v4904_v34 = vld [vmem:[%s8761_s19 + $0x580] sm:$0xff]  ;;  %v4723_v42 = vmax.f32 %v4568_v16, 0.0  ;;  %v4897_v10 = vld [vmem:[%s8761_s19 + $0x548] sm:$0xff] }
0x1192   : > { %6510 = vmatprep.subr.bf16.mxu1 %v6509_v60  ;;  %6542 = vmatprep.subr.bf16.mxu0 %v6541_v1  ;;  %v4872_v1 = vld [vmem:[%s8761_s19 + $0x480] sm:$0xff]  ;;  %v6555_v5 = vpack.c.bf16 %v4839_v62, %v4838_v58  ;;  %v4910_v58 = vld [vmem:[%s8761_s19 + $0x5b0] sm:$0xff]  ;;  %v6569_v62 = vpack.c.bf16 %v4879_v56, %v4878_v55  ;;  %v4883_v16 = vld [vmem:[%s8761_s19 + $0x4d8] sm:$0xff] }
0x1193   : > { %v6557_v22 = vpack.c.bf16 %v4873_v2, %v4872_v1  ;;  %v4424_v35 = vadd.f32 %v8113_v11, %v4088_v59  ;;  %v4497_v14 = vadd.f32 %v8179_v0, %v4100_v28  ;;  %v4874_v11 = vld [vmem:[%s8761_s19 + $0x490] sm:$0xff]  ;;  %v4911_v59 = vld [vmem:[%s8761_s19 + $0x5b8] sm:$0xff] }
0x1194   : > { %v4906_v0 = vld [vmem:[%s8761_s19 + $0x590] sm:$0xff]  ;;  %v4863_v2 = vld [vmem:[%s8761_s19 + $0x438] sm:$0xff] }
0x1195   : > { %v4636_v21 = vpop.f32.mrb[46].mxu1  ;;  %v4707_v37 = vpop.f32.mrb[40].mxu0  ;;  %6512 = vmatpush3.bf16.msra.mxu1 %v6511_v9  ;;  %6544 = vmatpush3.bf16.msra.mxu0 %v6543_v12  ;;  %v6589_v9 = vpack.c.bf16 %v4905_v4, %v4904_v34  ;;  %v4856_v12 = vld [vmem:[%s8761_s19 + $0x400] sm:$0xff]  ;;  %v4718_v23 = vmax.f32 %v4424_v35, 0.0  ;;  %v4862_v1 = vld [vmem:[%s8761_s19 + $0x430] sm:$0xff]  ;;  %v6601_v34 = vpack.c.bf16 %v4911_v59, %v4910_v58  ;;  %v4895_v4 = vld [vmem:[%s8761_s19 + $0x538] sm:$0xff] }
0x1196   : > { %v8233_v43 = vadd.f32 %v4636_v21, %v4112_v17  ;;  %v8236_v44 = vadd.f32 %v4707_v37, %v8032_v30  ;;  %v8238_v45 = vpop.f32.mrb[47].mxu1  ;;  %v8240_v46 = vpop.f32.mrb[41].mxu0  ;;  %6514 = vmatprep.subr.bf16.mxu1 %v6513_v18  ;;  %6546 = vmatprep.subr.bf16.mxu0 %v6545_v19  ;;  %v4822_v30 = vld [vmem:[%s8761_s19 + $0x2f0] sm:$0xff]  ;;  %v4875_v17 = vld [vmem:[%s8761_s19 + $0x498] sm:$0xff]  ;;  %v6559_v19 = vpack.c.bf16 %v4857_v36, %v4856_v12  ;;  %v4721_v21 = vmax.f32 %v4497_v14, 0.0  ;;  %v4864_v12 = vld [vmem:[%s8761_s19 + $0x440] sm:$0xff] }
0x1197   : > { %v6521_v60 = vpack.c.bf16 %v4823_v49, %v4822_v30  ;;  %v4907_v18 = vld [vmem:[%s8761_s19 + $0x598] sm:$0xff]  ;;  %v6561_v37 = vpack.c.bf16 %v4875_v17, %v4874_v11  ;;  %v4894_v28 = vld [vmem:[%s8761_s19 + $0x530] sm:$0xff]  ;;  %v6571_v7 = vpack.c.bf16 %v4863_v2, %v4862_v1  ;;  %v4865_v36 = vld [vmem:[%s8761_s19 + $0x448] sm:$0xff] }
0x1198   : > { %v6603_v35 = vpack.c.bf16 %v4895_v4, %v4894_v28  ;;  %v4896_v14 = vld [vmem:[%s8761_s19 + $0x540] sm:$0xff]  ;;  %v4882_v11 = vld [vmem:[%s8761_s19 + $0x4d0] sm:$0xff]  ;;  %v4871_v59 = vld [vmem:[%s8761_s19 + $0x478] sm:$0xff]  ;;  %v4116_v28 = vrot.slane %v8027_v29, %v4083_v53 }
0x1199   : > { %6516 = vmatpush3.bf16.msra.mxu1 %v6515_v38  ;;  %6548 = vmatpush3.bf16.msra.mxu0 %v6547_v39  ;;  %v6593_v38 = vpack.c.bf16 %v4907_v18, %v4906_v0  ;;  %v4891_v39 = vld [vmem:[%s8761_s19 + $0x518] sm:$0xff]  ;;  %v4914_v17 = vld [vmem:[%s8761_s19 + $0x5d0] sm:$0xff]  ;;  %v6575_v18 = vpack.c.bf16 %v4865_v36, %v4864_v12  ;;  %v4936_v1 = vld [vmem:[%s8761_s19 + $0x680] sm:$0xff] }
0x119a   : > { %6518 = vmatprep.subr.bf16.mxu1 %v6517_v40  ;;  %6550 = vmatprep.subr.bf16.mxu0 %v6549_v47  ;;  %v4876_v40 = vld [vmem:[%s8761_s19 + $0x4a0] sm:$0xff]  ;;  %v6595_v30 = vpack.c.bf16 %v4891_v39, %v4890_v26  ;;  %v4915_v0 = vld [vmem:[%s8761_s19 + $0x5d8] sm:$0xff]  ;;  %v4898_v24 = vld [vmem:[%s8761_s19 + $0x550] sm:$0xff] }
0x119b   : > { %v4908_v47 = vld [vmem:[%s8761_s19 + $0x5a0] sm:$0xff]  ;;  %v6565_v49 = vpack.c.bf16 %v4877_v41, %v4876_v40  ;;  %v6609_v25 = vpack.c.bf16 %v4915_v0, %v4914_v17  ;;  %v4899_v26 = vld [vmem:[%s8761_s19 + $0x558] sm:$0xff]  ;;  %v4917_v39 = vld [vmem:[%s8761_s19 + $0x5e8] sm:$0xff]  ;;  %v4722_v0 = vmax.f32 %v8177_v8, 0.0 }
0x119c   : > { %v6611_v41 = vpack.c.bf16 %v4899_v26, %v4898_v24  ;;  %v4870_v58 = vld [vmem:[%s8761_s19 + $0x470] sm:$0xff]  ;;  %v4937_v2 = vld [vmem:[%s8761_s19 + $0x688] sm:$0xff]  ;;  %v4920_v53 = vld [vmem:[%s8761_s19 + $0x600] sm:$0xff] }
0x119d   : > { %6520 = vmatpush3.bf16.msra.mxu1 %v6519_v33  ;;  %6552 = vmatpush3.bf16.msra.mxu0 %v6551_v54  ;;  %v6597_v33 = vpack.c.bf16 %v4909_v48, %v4908_v47  ;;  %v4893_v54 = vld [vmem:[%s8761_s19 + $0x528] sm:$0xff]  ;;  %v4868_v47 = vld [vmem:[%s8761_s19 + $0x460] sm:$0xff]  ;;  %v4939_v12 = vld [vmem:[%s8761_s19 + $0x698] sm:$0xff] }
0x119e   : > { %6522 = vmatprep.subr.bf16.mxu1 %v6521_v60  ;;  %6554 = vmatprep.subr.bf16.mxu0 %v6553_v61  ;;  %v6567_v60 = vpack.c.bf16 %v4861_v51, %v4860_v50  ;;  %v6599_v61 = vpack.c.bf16 %v4893_v54, %v4892_v52  ;;  %v4869_v48 = vld [vmem:[%s8761_s19 + $0x468] sm:$0xff]  ;;  %v4886_v50 = vld [vmem:[%s8761_s19 + $0x4f0] sm:$0xff]  ;;  %v4887_v51 = vld [vmem:[%s8761_s19 + $0x4f8] sm:$0xff] }
0x119f   : > { %v4918_v52 = vld [vmem:[%s8761_s19 + $0x5f0] sm:$0xff]  ;;  %v6583_v54 = vpack.c.bf16 %v4869_v48, %v4868_v47  ;;  %v6585_v56 = vpack.c.bf16 %v4887_v51, %v4886_v50  ;;  %v4969_v4 = vld [vmem:[%s8761_s19 + $0x788] sm:$0xff]  ;;  %v4972_v8 = vld [vmem:[%s8761_s19 + $0x7a0] sm:$0xff] }
0x11a0   : > { %v4954_v17 = vld [vmem:[%s8761_s19 + $0x710] sm:$0xff]  ;;  %v4973_v24 = vld [vmem:[%s8761_s19 + $0x7a8] sm:$0xff]  ;;  %v4943_v48 = vld [vmem:[%s8761_s19 + $0x6b8] sm:$0xff] }
0x11a1   : > { %6524 = vmatpush3.bf16.msra.mxu1 %v6523_v32  ;;  %6556 = vmatpush3.bf16.msra.mxu0 %v6555_v5  ;;  %v4881_v32 = vld [vmem:[%s8761_s19 + $0x4c8] sm:$0xff]  ;;  %v4912_v5 = vld [vmem:[%s8761_s19 + $0x5c0] sm:$0xff]  ;;  %v4942_v47 = vld [vmem:[%s8761_s19 + $0x6b0] sm:$0xff] }
0x11a2   : > { %6558 = vmatprep.subr.bf16.mxu1 %v6557_v22  ;;  %6590 = vmatprep.subr.bf16.mxu0 %v6589_v9  ;;  %v4913_v22 = vld [vmem:[%s8761_s19 + $0x5c8] sm:$0xff]  ;;  %v6573_v9 = vpack.c.bf16 %v4881_v32, %v4880_v13  ;;  %v4124_v13 = vrot.slane %v8027_v29, %v4091_v3  ;;  %v6587_v32 = vpack.c.bf16 %v4871_v59, %v4870_v58  ;;  %v4944_v58 = vld [vmem:[%s8761_s19 + $0x6c0] sm:$0xff] }
0x11a3   : > { %v6605_v15 = vpack.c.bf16 %v4913_v22, %v4912_v5  ;;  %v6621_v22 = vpack.c.bf16 %v4937_v2, %v4936_v1  ;;  %v4953_v29 = vld [vmem:[%s8761_s19 + $0x708] sm:$0xff]  ;;  %v4639_v3 = vadd.f32 %v8238_v45, %v4116_v28  ;;  %v4971_v45 = vld [vmem:[%s8761_s19 + $0x798] sm:$0xff]  ;;  %v6633_v51 = vpack.c.bf16 %v4943_v48, %v4942_v47  ;;  %v4928_v28 = vld [vmem:[%s8761_s19 + $0x640] sm:$0xff] }
0x11a4   : > { %5196 = vmatmul.mubr.f32.vlgmr.msra.gmra.mrb[50].mxu1 %v4716_v20  ;;  %5266 = vmatmul.mubr.f32.vlgmr.msra.gmra.mrb[44].mxu0 %v4718_v23  ;;  %v6577_v20 = vpack.c.bf16 %v4883_v16, %v4882_v11  ;;  %v4866_v23 = vld [vmem:[%s8761_s19 + $0x450] sm:$0xff]  ;;  %v4710_v36 = vadd.f32 %v8240_v46, %v4124_v13  ;;  %v6655_v11 = vpack.c.bf16 %v4953_v29, %v4952_v27  ;;  %v4923_v46 = vld [vmem:[%s8761_s19 + $0x618] sm:$0xff]  ;;  %v4945_v59 = vld [vmem:[%s8761_s19 + $0x6c8] sm:$0xff]  ;;  %v4724_v48 = vmax.f32 %v8233_v43, 0.0 }
0x11a5   : > { %6560 = vmatpush3.bf16.msra.mxu1 %v6559_v19  ;;  %5335 = vmatprep.mubr.f32.mxu1 %v4721_v21  ;;  %v6607_v19 = vpack.c.bf16 %v4897_v10, %v4896_v14  ;;  %v4884_v21 = vld [vmem:[%s8761_s19 + $0x4e0] sm:$0xff]  ;;  %v4720_v10 = vmax.f32 %v8175_v63, 0.0  ;;  %v4922_v16 = vld [vmem:[%s8761_s19 + $0x610] sm:$0xff]  ;;  %v4955_v63 = vld [vmem:[%s8761_s19 + $0x718] sm:$0xff]  ;;  %v6637_v2 = vpack.c.bf16 %v4945_v59, %v4944_v58 }
0x11a6   : > { %6592 = vmatpush3.bf16.msra.mxu0 %v6591_v6  ;;  %5405 = vmatprep.mubr.f32.mxu0 %v4723_v42  ;;  %v4867_v6 = vld [vmem:[%s8761_s19 + $0x458] sm:$0xff]  ;;  %v6627_v26 = vpack.c.bf16 %v4923_v46, %v4922_v16 }
0x11a7   : > { %6562 = vmatprep.subr.bf16.mxu1 %v6561_v37  ;;  %6594 = vmatprep.subr.bf16.mxu0 %v6593_v38  ;;  %v4885_v37 = vld [vmem:[%s8761_s19 + $0x4e8] sm:$0xff]  ;;  %v4916_v38 = vld [vmem:[%s8761_s19 + $0x5e0] sm:$0xff]  ;;  %v6579_v40 = vpack.c.bf16 %v4867_v6, %v4866_v23  ;;  %v4725_v23 = vmax.f32 %v4639_v3, 0.0  ;;  %v4930_v3 = vld [vmem:[%s8761_s19 + $0x650] sm:$0xff] }
0x11a8   : > { %v6581_v42 = vpack.c.bf16 %v4885_v37, %v4884_v21  ;;  %v6659_v21 = vpack.c.bf16 %v4955_v63, %v4954_v17  ;;  %v4964_v63 = vld [vmem:[%s8761_s19 + $0x760] sm:$0xff] }
0x11a9   : > { %6564 = vmatpush3.bf16.msra.mxu1 %v6563_v31  ;;  %v4900_v31 = vld [vmem:[%s8761_s19 + $0x560] sm:$0xff] }
0x11aa   : > { %6596 = vmatpush3.bf16.msra.mxu0 %v6595_v30  ;;  %6566 = vmatprep.subr.bf16.mxu1 %v6565_v49  ;;  %v6613_v30 = vpack.c.bf16 %v4917_v39, %v4916_v38  ;;  %v4901_v49 = vld [vmem:[%s8761_s19 + $0x568] sm:$0xff]  ;;  %v4924_v38 = vld [vmem:[%s8761_s19 + $0x620] sm:$0xff] }
0x11ab   : > { %6598 = vmatprep.subr.bf16.mxu0 %v6597_v33  ;;  %v4919_v33 = vld [vmem:[%s8761_s19 + $0x5f8] sm:$0xff]  ;;  %v6615_v55 = vpack.c.bf16 %v4901_v49, %v4900_v31  ;;  %v4925_v39 = vld [vmem:[%s8761_s19 + $0x628] sm:$0xff]  ;;  %v4974_v31 = vld [vmem:[%s8761_s19 + $0x7b0] sm:$0xff] }
0x11ac   : > { %v6631_v49 = vpack.c.bf16 %v4925_v39, %v4924_v38  ;;  %v4935_v38 = vld [vmem:[%s8761_s19 + $0x678] sm:$0xff] }
0x11ad   : > { %6568 = vmatpush3.bf16.msra.mxu1 %v6567_v60  ;;  %v4902_v60 = vld [vmem:[%s8761_s19 + $0x570] sm:$0xff] }
0x11ae   : > { %6600 = vmatpush3.bf16.msra.mxu0 %v6599_v61  ;;  %6570 = vmatprep.subr.bf16.mxu1 %v6569_v62  ;;  %v6617_v61 = vpack.c.bf16 %v4919_v33, %v4918_v52  ;;  %v4903_v62 = vld [vmem:[%s8761_s19 + $0x578] sm:$0xff]  ;;  %v4926_v52 = vld [vmem:[%s8761_s19 + $0x630] sm:$0xff] }
0x11af   : > { %6602 = vmatprep.subr.bf16.mxu0 %v6601_v34  ;;  %v4968_v34 = vld [vmem:[%s8761_s19 + $0x780] sm:$0xff]  ;;  %v6619_v5 = vpack.c.bf16 %v4903_v62, %v4902_v60  ;;  %v4927_v33 = vld [vmem:[%s8761_s19 + $0x638] sm:$0xff] }
0x11b0   : > { %v4976_v60 = vld [vmem:[%s8761_s19 + $0x7c0] sm:$0xff]  ;;  %v6635_v62 = vpack.c.bf16 %v4927_v33, %v4926_v52 }
0x11b1   : > { %6572 = vmatpush3.bf16.msra.mxu1 %v6571_v7  ;;  %v4921_v7 = vld [vmem:[%s8761_s19 + $0x608] sm:$0xff] }
0x11b2   : > { %6604 = vmatpush3.bf16.msra.mxu0 %v6603_v35  ;;  %6574 = vmatprep.subr.bf16.mxu1 %v6573_v9  ;;  %v6653_v35 = vpack.c.bf16 %v4969_v4, %v4968_v34  ;;  %v4938_v9 = vld [vmem:[%s8761_s19 + $0x690] sm:$0xff]  ;;  %v6623_v14 = vpack.c.bf16 %v4921_v7, %v4920_v53  ;;  %v4929_v34 = vld [vmem:[%s8761_s19 + $0x648] sm:$0xff]  ;;  %v4960_v4 = vld [vmem:[%s8761_s19 + $0x740] sm:$0xff] }
0x11b3   : > { %6606 = vmatprep.subr.bf16.mxu0 %v6605_v15  ;;  %v4970_v15 = vld [vmem:[%s8761_s19 + $0x790] sm:$0xff]  ;;  %v4979_v7 = vld [vmem:[%s8761_s19 + $0x7d8] sm:$0xff] }
0x11b4   : > { %v6657_v6 = vpack.c.bf16 %v4971_v45, %v4970_v15  ;;  %v4978_v53 = vld [vmem:[%s8761_s19 + $0x7d0] sm:$0xff]  ;;  %v4948_v15 = vld [vmem:[%s8761_s19 + $0x6e0] sm:$0xff]  ;;  %v4949_v45 = vld [vmem:[%s8761_s19 + $0x6e8] sm:$0xff] }
0x11b5   : > { %6576 = vmatpush3.bf16.msra.mxu1 %v6575_v18  ;;  %v6625_v18 = vpack.c.bf16 %v4939_v12, %v4938_v9  ;;  %v4931_v9 = vld [vmem:[%s8761_s19 + $0x658] sm:$0xff]  ;;  %v4962_v12 = vld [vmem:[%s8761_s19 + $0x750] sm:$0xff]  ;;  %v6645_v17 = vpack.c.bf16 %v4949_v45, %v4948_v15 }
0x11b6   : > { %6608 = vmatpush3.bf16.msra.mxu0 %v6607_v19  ;;  %6578 = vmatprep.subr.bf16.mxu1 %v6577_v20  ;;  %v4940_v19 = vld [vmem:[%s8761_s19 + $0x6a0] sm:$0xff]  ;;  %v4941_v20 = vld [vmem:[%s8761_s19 + $0x6a8] sm:$0xff]  ;;  %v6643_v16 = vpack.c.bf16 %v4931_v9, %v4930_v3 }
0x11b7   : > { %6610 = vmatprep.subr.bf16.mxu0 %v6609_v25  ;;  %v4727_v25 = vmax.f32 %v4710_v36, 0.0  ;;  %v6629_v37 = vpack.c.bf16 %v4941_v20, %v4940_v19  ;;  %v6673_v36 = vpack.c.bf16 %v4979_v7, %v4978_v53  ;;  %v4965_v20 = vld [vmem:[%s8761_s19 + $0x768] sm:$0xff] }
0x11b9   : > { %6580 = vmatpush3.bf16.msra.mxu1 %v6579_v40  ;;  %v4956_v40 = vld [vmem:[%s8761_s19 + $0x720] sm:$0xff] }
0x11ba   : > { %6612 = vmatpush3.bf16.msra.mxu0 %v6611_v41  ;;  %6582 = vmatprep.subr.bf16.mxu1 %v6581_v42  ;;  %v6661_v41 = vpack.c.bf16 %v4973_v24, %v4972_v8  ;;  %v4957_v42 = vld [vmem:[%s8761_s19 + $0x728] sm:$0xff]  ;;  %v4982_v8 = vld [vmem:[%s8761_s19 + $0x7f0] sm:$0xff]  ;;  %v4983_v24 = vld [vmem:[%s8761_s19 + $0x7f8] sm:$0xff] }
0x11bb   : > { %6614 = vmatprep.subr.bf16.mxu0 %v6613_v30  ;;  %v4975_v30 = vld [vmem:[%s8761_s19 + $0x7b8] sm:$0xff]  ;;  %v6663_v50 = vpack.c.bf16 %v4957_v42, %v4956_v40  ;;  %v6681_v39 = vpack.c.bf16 %v4983_v24, %v4982_v8  ;;  %v4966_v40 = vld [vmem:[%s8761_s19 + $0x770] sm:$0xff] }
0x11bd   : > { %6584 = vmatpush3.bf16.msra.mxu1 %v6583_v54  ;;  %v4958_v54 = vld [vmem:[%s8761_s19 + $0x730] sm:$0xff] }
0x11be   : > { %6616 = vmatpush3.bf16.msra.mxu0 %v6615_v55  ;;  %6586 = vmatprep.subr.bf16.mxu1 %v6585_v56  ;;  %v6665_v55 = vpack.c.bf16 %v4975_v30, %v4974_v31  ;;  %v4959_v56 = vld [vmem:[%s8761_s19 + $0x738] sm:$0xff]  ;;  %v4726_v31 = vmax.f32 %v8236_v44, 0.0 }
0x11bf   : > { %6618 = vmatprep.subr.bf16.mxu0 %v6617_v61  ;;  %v4977_v61 = vld [vmem:[%s8761_s19 + $0x7c8] sm:$0xff]  ;;  %v6667_v1 = vpack.c.bf16 %v4959_v56, %v4958_v54 }
0x11c0   : > { %v6669_v13 = vpack.c.bf16 %v4977_v61, %v4976_v60 }
0x11c1   : > { %6588 = vmatpush3.bf16.msra.mxu1 %v6587_v32  ;;  %v4961_v32 = vld [vmem:[%s8761_s19 + $0x748] sm:$0xff] }
0x11c2   : > { %6620 = vmatpush3.bf16.msra.mxu0 %v6619_v5  ;;  %6622 = vmatprep.subr.bf16.mxu1 %v6621_v22  ;;  %v4946_v5 = vld [vmem:[%s8761_s19 + $0x6d0] sm:$0xff]  ;;  %v4947_v22 = vld [vmem:[%s8761_s19 + $0x6d8] sm:$0xff]  ;;  %v6671_v27 = vpack.c.bf16 %v4961_v32, %v4960_v4 }
0x11c3   : > { %6654 = vmatprep.subr.bf16.mxu0 %v6653_v35  ;;  %v6639_v35 = vpack.c.bf16 %v4929_v34, %v4928_v28  ;;  %v6641_v29 = vpack.c.bf16 %v4947_v22, %v4946_v5 }
0x11c4   : > { %5336 = vmatmul.mubr.f32.vlgmr.msra.gmra.mrb[52].mxu1 %v4720_v10  ;;  %v4980_v10 = vld [vmem:[%s8761_s19 + $0x7e0] sm:$0xff] }
0x11c5   : > { %5406 = vmatmul.mubr.f32.vlgmr.msra.gmra.mrb[46].mxu0 %v4722_v0  ;;  %6624 = vmatpush3.bf16.msra.mxu1 %v6623_v14  ;;  %v4963_v14 = vld [vmem:[%s8761_s19 + $0x758] sm:$0xff]  ;;  %v4932_v0 = vld [vmem:[%s8761_s19 + $0x660] sm:$0xff] }
0x11c6   : > { %5475 = vmatprep.mubr.f32.mxu1 %v4725_v23  ;;  %6656 = vmatpush3.bf16.msra.mxu0 %v6655_v11  ;;  %v4981_v11 = vld [vmem:[%s8761_s19 + $0x7e8] sm:$0xff]  ;;  %v6675_v46 = vpack.c.bf16 %v4963_v14, %v4962_v12  ;;  %v4950_v23 = vld [vmem:[%s8761_s19 + $0x6f0] sm:$0xff] }
0x11c7   : > { %5545 = vmatprep.mubr.f32.mxu0 %v4727_v25  ;;  %6626 = vmatprep.subr.bf16.mxu1 %v6625_v18  ;;  %v4933_v18 = vld [vmem:[%s8761_s19 + $0x668] sm:$0xff]  ;;  %v6677_v19 = vpack.c.bf16 %v4981_v11, %v4980_v10 }
0x11c8   : > { %6658 = vmatprep.subr.bf16.mxu0 %v6657_v6  ;;  %v4951_v6 = vld [vmem:[%s8761_s19 + $0x6f8] sm:$0xff]  ;;  %v6647_v25 = vpack.c.bf16 %v4933_v18, %v4932_v0 }
0x11c9   : > { %6628 = vmatpush3.bf16.msra.mxu1 %v6627_v26  ;;  %v6679_v26 = vpack.c.bf16 %v4965_v20, %v4964_v63 }
0x11ca   : > { %6660 = vmatpush3.bf16.msra.mxu0 %v6659_v21  ;;  %6630 = vmatprep.subr.bf16.mxu1 %v6629_v37  ;;  %v6649_v21 = vpack.c.bf16 %v4951_v6, %v4950_v23  ;;  %v4934_v37 = vld [vmem:[%s8761_s19 + $0x670] sm:$0xff] }
0x11cb   : > { %6662 = vmatprep.subr.bf16.mxu0 %v6661_v41  ;;  %v4967_v41 = vld [vmem:[%s8761_s19 + $0x778] sm:$0xff]  ;;  %v6651_v42 = vpack.c.bf16 %v4935_v38, %v4934_v37 }
0x11cc   : > { %v6683_v47 = vpack.c.bf16 %v4967_v41, %v4966_v40 }
0x11cd   : > { %6632 = vmatpush3.bf16.msra.mxu1 %v6631_v49 }
0x11ce   : > { %6664 = vmatpush3.bf16.msra.mxu0 %v6663_v50  ;;  %6634 = vmatprep.subr.bf16.mxu1 %v6633_v51  ;;  %v5744_v50 = vld [vmem:[%s8762_s20] ss:$0 sm:$0xff] }
0x11cf   : > { %6666 = vmatprep.subr.bf16.mxu0 %v6665_v55 }
0x11d1   : > { %6636 = vmatpush3.bf16.msra.mxu1 %v6635_v62 }
0x11d2   : > { %6668 = vmatpush3.bf16.msra.mxu0 %v6667_v1  ;;  %6638 = vmatprep.subr.bf16.mxu1 %v6637_v2 }
0x11d3   : > { %6670 = vmatprep.subr.bf16.mxu0 %v6669_v13 }
0x11d5   : > { %6640 = vmatpush3.bf16.msra.mxu1 %v6639_v35 }
0x11d6   : > { %6672 = vmatpush3.bf16.msra.mxu0 %v6671_v27  ;;  %6642 = vmatprep.subr.bf16.mxu1 %v6641_v29 }
0x11d7   : > { %6674 = vmatprep.subr.bf16.mxu0 %v6673_v36 }
0x11d9   : > { %6644 = vmatpush3.bf16.msra.mxu1 %v6643_v16 }
0x11da   : > { %6676 = vmatpush3.bf16.msra.mxu0 %v6675_v46  ;;  %6646 = vmatprep.subr.bf16.mxu1 %v6645_v17 }
0x11db   : > { %6678 = vmatprep.subr.bf16.mxu0 %v6677_v19  ;;  %v5746_v19 = vld [vmem:[%s8764_s22] ss:$0 sm:$0xff] }
0x11dd   : > { %6648 = vmatpush3.bf16.msra.mxu1 %v6647_v25 }
0x11de   : > { %6680 = vmatpush3.bf16.msra.mxu0 %v6679_v26  ;;  %6650 = vmatprep.subr.bf16.mxu1 %v6649_v21 }
0x11df   : > { %6682 = vmatprep.subr.bf16.mxu0 %v6681_v39 }
0x11e1   : > { %6652 = vmatpush3.bf16.msra.mxu1 %v6651_v42 }
0x11e2   : > { %6684 = vmatpush3.bf16.msra.mxu0 %v6683_v47 }
0x11e4   : > { %5476 = vmatmul.mubr.f32.vlgmr.msra.gmra.mrb[54].mxu1 %v4724_v48 }
0x11e5   : > { %5546 = vmatmul.mubr.f32.vlgmr.msra.gmra.mrb[48].mxu0 %v4726_v31 }
0x1257   : > { %v5872_v30 = vpop.f32.mrb[48].mxu1  ;;  %v5907_v49 = vpop.f32.mrb[42].mxu0 }
0x1258   : > { %v5873_v51 = vpop.f32.mrb[49].mxu1  ;;  %v5908_v52 = vpop.f32.mrb[43].mxu0 }
0x1259   : > { %v5874_v33 = vadd.f32 %v5873_v51, %v5872_v30  ;;  %v5909_v54 = vadd.f32 %v5908_v52, %v5907_v49 }
0x125b   : > { %v5058_v55 = vadd.f32 %v5874_v33, %v5744_v50 }
0x125d   : > { %v5128_v56 = vadd.f32 %v5909_v54, %v5058_v55 }
0x1277   : > { %v5942_v58 = vpop.f32.mrb[50].mxu1  ;;  %v5977_v59 = vpop.f32.mrb[44].mxu0 }
0x1278   : > { %v5943_v43 = vpop.f32.mrb[51].mxu1  ;;  %v5978_v60 = vpop.f32.mrb[45].mxu0 }
0x1279   : > { %v5944_v61 = vadd.f32 %v5943_v43, %v5942_v58  ;;  %v5979_v44 = vadd.f32 %v5978_v60, %v5977_v59 }
0x127b   : > { %v5198_v62 = vadd.f32 %v5944_v61, %v5128_v56 }
0x127d   : > { %v5268_v1 = vadd.f32 %v5979_v44, %v5198_v62 }
0x1297   : > { %v6012_v2 = vpop.f32.mrb[52].mxu1 }
0x1298   : > { %v6047_v28 = vpop.f32.mrb[46].mxu0  ;;  %v6013_v34 = vpop.f32.mrb[53].mxu1 }
0x1299   : > { %v6014_v4 = vadd.f32 %v6013_v34, %v6012_v2  ;;  %v6048_v13 = vpop.f32.mrb[47].mxu0 }
0x129a   : > { %v6049_v32 = vadd.f32 %v6048_v13, %v6047_v28 }
0x129b   : > { %v5338_v5 = vadd.f32 %v6014_v4, %v5268_v1 }
0x129d   : > { %v5408_v22 = vadd.f32 %v6049_v32, %v5338_v5 }
0x12b7   : > { %v6082_v53 = vpop.f32.mrb[54].mxu1 }
0x12b8   : > { %v6117_v7 = vpop.f32.mrb[48].mxu0  ;;  %v6083_v35 = vpop.f32.mrb[55].mxu1 }
0x12b9   : > { %v6084_v27 = vadd.f32 %v6083_v35, %v6082_v53  ;;  %v6118_v29 = vpop.f32.mrb[49].mxu0 }
0x12ba   : > { %v6119_v3 = vadd.f32 %v6118_v29, %v6117_v7 }
0x12bb   : > { %v5478_v9 = vadd.f32 %v6084_v27, %v5408_v22 }
0x12bd   : > { %v5548_v12 = vadd.f32 %v6119_v3, %v5478_v9 }
0x12bf   : > { %v5551_v36 = vadd.f32 %v5548_v12, %v7691_v57  ;;  %v5745_v57 = vld [vmem:[%s8763_s21] ss:$0 sm:$0xff] }
0x12c1   : > { %v5552_v14 = vsel %vm737_vm1, %v5551_v36, 0.0 }
0x12c2   : > { %5553 = vadd.xlane.f32.xlu0 %v5552_v14 }
0x134f   : > { %v5554_v15 = vpop.xlane.xlu0 %5553 }
0x1350   : > { %v5555_v45 = vmul.f32 0.03125, %v5554_v15 }
0x1352   : > { %v5556_v10 = vsub.f32 %v5551_v36, %v5555_v45 }
0x1354   : > { %v5557_v11 = vmul.f32 %v5556_v10, %v5556_v10 }
0x1356   : > { %v5558_v16 = vsel %vm737_vm1, %v5557_v11, 0.0 }
0x1357   : > { %5559 = vadd.xlane.f32.xlu1 %v5558_v16 }
0x13e4   : > { %v5560_v46 = vpop.xlane.xlu1 %5559 }
0x13e5   : > { %v5561_v17 = vmul.f32 0.03125, %v5560_v46 }
0x13e7   : > { %v5562_v0 = vadd.f32 1e-05, %v5561_v17 }
0x13e9   : > { %6825 = vrsqrt.f32 %v5562_v0 }
0x13f3   : > { %v6826_v18 = vpop.eup %6825 }
0x13f4   : > { %v5564_v63 = vmul.f32 %v6826_v18, %v5556_v10 }
0x13f6   : > { %v5572_v20 = vmul.f32 %v5745_v57, %v5564_v63 }
0x13f8   : > { %v5580_v23 = vadd.f32 %v5746_v19, %v5572_v20 }
0x13fa   : > { %5581 = vst.msk [vmem:[%s714_s6] sm:$0xff] %vm737_vm1, %v5580_v23 }
0x13fb   : > { %6840 = shalt.err (!%p6837_p3)
}
0x13fc   : > { %s6841_s1 = scalar_lea.hbm %s8699_s0, 128  ;;  %s6845_s6 = scalar_lea.hbm %s8765_s23, 256 }
0x13fd   : > { %p6842_p4 = scmp.ne.s32.totalorder %s8699_s0, %s6841_s1  ;;  %p6846_p9 = scmp.lt.u32.totalorder %s8699_s0, %s8765_s23 }
0x13fe   : > { %p6847_p10 = scmp.lt.u32.totalorder %s6845_s6, %s6841_s1  ;;  %p6849_p12 = scmp.lt.u32.totalorder %s6841_s1, %s8699_s0 }
0x13ff   : > { %p6843_p7 = pnand %p6842_p4, %p7083_p5 }
0x1400   : > { %p6848_p11 = por %p6847_p10, %p6846_p9 }
0x1401   : > { %p6844_p8 = pneg %p6843_p7 }
0x1402   : > { %p6850_p13 = por %p6849_p12, %p6848_p11 }
0x1404   : > { %p6851_p0 = pnand %p6850_p13, %p6844_p8 }
0x1406   : > { %6854 = shalt.err (!%p6851_p0)
}
0x1407   : > { %6685 = dma.vmem_to_hbm [thread:$0]  (%p7083_p5), %s8701_s27, 128, %s8699_s0, %s5583_s11  }
0x1408 PF: > { %s8863_s4 = sld [smem:[#allocation7_spill]]  ;;  %p6691_p1 = scmp.ge.s32.totalorder %s6889_s25, 2 }
0x140a   : > { %p6688_p2 = pnand %p6691_p1, %p7087_p6 }
0x140e   : > { %s5608_s29 = sand.u32 1, %s8863_s4  }
0x140f   : > { %s5609_s24 = scalar_lea.sflag [#allocation5], %s5608_s29 }
0x1410   : > { %6872 = dma.done.wait (!%p6688_p2), %s5609_s24, 128  }
0x1411   : > { %6874 = vsyncadd (!%p6688_p2), %s5609_s24, 4294967168  ;;  %s8865_s25 = sld [smem:[#allocation9_spill]]  ;;  %s8866_s1 = sld [smem:[#allocation8_spill]] }
0x1412   : > { %s8867_s24 = sld [smem:[#allocation10_spill]]  ;;  %s8868_s4 = smov %s6881_s30 }
0x1417   : > { %p33_p3 = scmp.ge.s32.totalorder %s8865_s25, 4   ;;  %s8869_s30 = smov %s8866_s1 }
0x1419   :  { %35 = sbr.rel (!%p33_p3) target bundleno = 13 (0xd), region = 150 }
0x1420   :  { %5614 = vsyncpa [#allocation5], 1 }
0x1421   :  { %5616 = vsyncpa [#allocation5 + $0x1], 1 }

</bundles_post_ra>
